<compile_context>
chip_gen: v7x
topology: tpu7x:2x2x1
jax: 0.10.0
libtpu: 0.0.40
codegen_flags: <defaults>
</compile_context>

<pallas_src>
import jax
import jax.numpy as jnp
from jax import lax
from jax.experimental import pallas as pl
from jax.experimental.pallas import tpu as pltpu

OUT_CHANNELS = 256
BN_EPS = 1e-5


# ----------------------------- Pallas kernel ---------------------------------
def _aspp_kernel(xcol_ref, wcat_ref, bcat_ref, wp_ref, bimg_ref, o_ref):
    """One pixel tile of one image.

    xcol_ref : (1, M, Kp)  bf16  K-packed im2col tile (center tap + 27 dilated taps, zero-padded)
    wcat_ref : (Kp, 4*C)   bf16  block-structured conv weights (BN scales folded), 4 branches
    bcat_ref : (1, 4*C)    f32   concatenated branch BN biases
    wp_ref   : (4*C, C)    bf16  1x1 projection weights for the 4 spatial branches (proj-BN scale folded)
    bimg_ref : (1, 1, C)   f32   per-image bias = pooled-branch contribution + projection BN bias
    o_ref    : (1, M, C)   f32   output tile
    """
    f32 = jnp.float32
    # All four conv branches (1x1 + three dilated 3x3) as one MXU matmul: (M,Kp)@(Kp,4C).
    pre = jnp.dot(xcol_ref[0], wcat_ref[...], preferred_element_type=f32)
    # Branch BN bias + ReLU in f32 (v5e has no bf16 VPU), then cast for the projection matmul.
    act = jnp.maximum(pre + bcat_ref[...], 0.0).astype(jnp.bfloat16)
    # All four per-branch projections merged into one (M,4C)@(4C,C) matmul.
    proj = jnp.dot(act, wp_ref[...], preferred_element_type=f32)
    # Pool-branch + projection-BN bias, final ReLU.
    o_ref[0] = jnp.maximum(proj + bimg_ref[0], 0.0).astype(o_ref.dtype)


# ------------------------------- glue (JAX) ----------------------------------
def _fold_bn(gamma, beta, mean, var):
    scale = gamma / jnp.sqrt(var + BN_EPS)
    return scale, beta - mean * scale


def _pick_tile_m(num_pixels, n_batch, target=2048):
    """Largest divisor of num_pixels that is a multiple of 8 and <= target.

    If the batch provides no parallelism (n_batch == 1), cap at num_pixels // 2 so a
    2-TensorCore chip (v7x) still gets >= 2 independent grid units."""
    cap = min(num_pixels, target)
    if n_batch == 1 and num_pixels > 8:
        cap = min(cap, max(8, num_pixels // 2))
    best = None
    for t in range(1, cap + 1):
        if num_pixels % t == 0 and t % 8 == 0:
            best = t
    return best if best is not None else num_pixels


def aspp_forward(x_nchw, params):
    N, Cin, H, W = x_nchw.shape
    C = OUT_CHANNELS
    rates = tuple(params['rates'])
    nb = len(rates)                      # number of dilated 3x3 branches (3)
    D = max(rates)
    f32, bf16 = jnp.float32, jnp.bfloat16

    # ---- K-packed im2col: center tap + 9 taps per dilated branch, packed along channels ----
    K = Cin + 9 * Cin * nb               # 4 + 108 = 112 for Cin=4
    Kp = ((K + 127) // 128) * 128        # pad the PACKED contraction dim (not per-tap Cin) to 128

    x_nhwc = jnp.transpose(x_nchw, (0, 2, 3, 1)).astype(f32)          # (N, H, W, Cin)
    x_bf = x_nhwc.astype(bf16)
    xpad = jnp.pad(x_bf, ((0, 0), (D, D), (D, D), (0, 0)))            # spatial halo once, bf16

    segs = [x_bf]                                                     # center tap for the 1x1 branch
    for d in rates:
        for ky in range(3):
            for kx in range(3):
                oy = D + (ky - 1) * d
                ox = D + (kx - 1) * d
                segs.append(xpad[:, oy:oy + H, ox:ox + W, :])
    xcol = jnp.concatenate(segs, axis=-1)                             # (N, H, W, K) bf16
    xcol = jnp.pad(xcol, ((0, 0), (0, 0), (0, 0), (0, Kp - K)))
    xcol = xcol.reshape(N, H * W, Kp)                                 # lane-dense packed input

    # ---- fold BN into weights / biases ----
    sb, bb = zip(*[_fold_bn(*params['bn'][i]) for i in range(5)])
    sp, bp = _fold_bn(*params['bn_p'])

    # Block-structured conv weight: rows = packed K slots, cols = 4 branches x C outputs.
    wcat = jnp.zeros((Kp, (nb + 1) * C), f32)
    w0_mat = jnp.transpose(params['w0'][:, :, 0, 0]) * sb[0][None, :]          # (Cin, C)
    wcat = wcat.at[0:Cin, 0:C].set(w0_mat)
    w3_list = [params['w1'], params['w2'], params['w3']]
    for bi in range(nb):
        for t in range(9):
            ky, kx = t // 3, t % 3
            tapw = jnp.transpose(w3_list[bi][:, :, ky, kx]) * sb[bi + 1][None, :]   # (Cin, C)
            r0 = Cin + (bi * 9 + t) * Cin
            wcat = wcat.at[r0:r0 + Cin, (bi + 1) * C:(bi + 2) * C].set(tapw)
    wcat = wcat.astype(bf16)                                                    # (Kp, 4C)

    bcat = jnp.concatenate([bb[i] for i in range(nb + 1)], axis=0).reshape(1, (nb + 1) * C)  # f32

    # Projection weights (proj-BN scale folded); first 4C rows used in-kernel, last C rows for pool branch.
    wp_full = jnp.transpose(params['wp'][:, :, 0, 0]) * sp[None, :]             # (5C, C)
    wp_main = wp_full[:(nb + 1) * C].astype(bf16)                               # (4C, C)

    # ---- global-average-pool branch: whole-image reduction, once per image, folded into a bias ----
    pooled = jnp.mean(x_nhwc, axis=(1, 2))                                      # (N, Cin) f32
    w4 = jnp.transpose(params['w4'][:, :, 0, 0]) * sb[4][None, :]               # (Cin, C)
    b4 = jnp.maximum(pooled @ w4 + bb[4][None, :], 0.0)                         # (N, C)
    bias_img = (b4 @ wp_full[(nb + 1) * C:] + bp[None, :]).reshape(N, 1, C)     # (N, 1, C) f32

    # ---- tiling / grid ----
    P = H * W
    tile_m = _pick_tile_m(P, N)
    n_tiles = P // tile_m

    flops = 2 * N * P * (Kp * (nb + 1) * C + (nb + 1) * C * C)
    bytes_accessed = (xcol.size * 2 + wcat.size * 2 + wp_main.size * 2
                      + bcat.size * 4 + bias_img.size * 4 + N * P * C * 4)
    cost = pl.CostEstimate(flops=flops, transcendentals=0, bytes_accessed=bytes_accessed)

    out = pl.pallas_call(
        _aspp_kernel,
        out_shape=jax.ShapeDtypeStruct((N, P, C), f32),
        grid_spec=pltpu.PrefetchScalarGridSpec(
            num_scalar_prefetch=0,
            grid=(N, n_tiles),
            in_specs=[
                pl.BlockSpec((1, tile_m, Kp), lambda n, t: (n, t, 0)),          # packed input tile
                pl.BlockSpec((Kp, (nb + 1) * C), lambda n, t: (0, 0)),          # conv weights (resident)
                pl.BlockSpec((1, (nb + 1) * C), lambda n, t: (0, 0)),           # branch BN biases
                pl.BlockSpec(((nb + 1) * C, C), lambda n, t: (0, 0)),           # projection weights
                pl.BlockSpec((1, 1, C), lambda n, t: (n, 0, 0)),                # per-image pool/proj bias
            ],
            out_specs=pl.BlockSpec((1, tile_m, C), lambda n, t: (n, t, 0)),
        ),
        compiler_params=pltpu.CompilerParams(
            dimension_semantics=("parallel", "parallel"),
            vmem_limit_bytes=32 * 1024 * 1024,
        ),
        cost_estimate=cost,
    )(xcol, wcat, bcat, wp_main, bias_img)

    # Dropout(0.1) is identity at inference; convert back to NCHW to match the PyTorch module.
    return jnp.transpose(out.reshape(N, H, W, C), (0, 3, 1, 2))


# -------------------------- deterministic params ------------------------------
def init_params(key, in_channels, rates):
    C = OUT_CHANNELS
    ks = jax.random.split(key, 12)

    def conv_w(k, shape):
        fan_in = shape[1] * shape[2] * shape[3]
        return jax.random.normal(k, shape, jnp.float32) / jnp.sqrt(float(fan_in))

    def bn(k):
        k1, k2, k3, k4 = jax.random.split(k, 4)
        gamma = 1.0 + 0.1 * jax.random.normal(k1, (C,), jnp.float32)
        beta = 0.1 * jax.random.normal(k2, (C,), jnp.float32)
        mean = 0.1 * jax.random.normal(k3, (C,), jnp.float32)
        var = jax.random.uniform(k4, (C,), jnp.float32, minval=0.5, maxval=1.5)
        return gamma, beta, mean, var

    return {
        'rates': tuple(rates),
        'w0': conv_w(ks[0], (C, in_channels, 1, 1)),
        'w1': conv_w(ks[1], (C, in_channels, 3, 3)),
        'w2': conv_w(ks[2], (C, in_channels, 3, 3)),
        'w3': conv_w(ks[3], (C, in_channels, 3, 3)),
        'w4': conv_w(ks[4], (C, in_channels, 1, 1)),
        'wp': conv_w(ks[5], (C, 5 * C, 1, 1)),
        'bn': [bn(ks[6 + i]) for i in range(5)],
        'bn_p': bn(ks[11]),
    }


# ------------------------------ pure-JAX reference ----------------------------
def aspp_reference(x, params):
    def bn_relu(y, bnp):
        s, b = _fold_bn(*bnp)
        return jnp.maximum(y * s[None, :, None, None] + b[None, :, None, None], 0.0)

    def conv(inp, w, d=1, pad=0):
        return lax.conv_general_dilated(
            inp, w, (1, 1), [(pad, pad), (pad, pad)], rhs_dilation=(d, d),
            dimension_numbers=('NCHW', 'OIHW', 'NCHW'))

    r1, r2, r3 = params['rates']
    b0 = bn_relu(conv(x, params['w0']), params['bn'][0])
    b1 = bn_relu(conv(x, params['w1'], r1, r1), params['bn'][1])
    b2 = bn_relu(conv(x, params['w2'], r2, r2), params['bn'][2])
    b3 = bn_relu(conv(x, params['w3'], r3, r3), params['bn'][3])
    pooled = jnp.mean(x, axis=(2, 3), keepdims=True)
    b4 = jnp.broadcast_to(bn_relu(conv(pooled, params['w4']), params['bn'][4]), b0.shape)
    cat = jnp.concatenate([b0, b1, b2, b3, b4], axis=1)
    return bn_relu(conv(cat, params['wp']), params['bn_p'])


if __name__ == "__main__":
    key = jax.random.PRNGKey(0)
    kx, kp = jax.random.split(key)
    N, Cin, H, W = 2, 4, 16, 16
    rates = (1, 2, 3)

    x = jax.random.normal(kx, (N, Cin, H, W), jnp.float32)
    params = init_params(kp, Cin, rates)

    out = jax.block_until_ready(aspp_forward(x, params))
    ref = aspp_reference(x, params)

    assert out.shape == (N, OUT_CHANNELS, H, W), out.shape
    max_err = float(jnp.max(jnp.abs(out - ref)))
    # bf16 MXU operands (f32 accumulation / f32 epilogue) vs f32 reference -> relaxed tolerance.
    assert max_err < 3e-2, max_err
    print("KERNEL_OK")
</pallas_src>

<mosaic_0001>
module attributes {stable_mosaic.version = 11 : i64} {
  func.func @_aspp_kernel(%arg0: i32, %arg1: i32, %arg2: memref<1x256x128xbf16, #tpu.memory_space<vmem>>, %arg3: memref<128x1024xbf16, #tpu.memory_space<vmem>>, %arg4: memref<1x1024xf32, #tpu.memory_space<vmem>>, %arg5: memref<1024x256xbf16, #tpu.memory_space<vmem>>, %arg6: memref<1x1x256xf32, #tpu.memory_space<vmem>>, %arg7: memref<1x256x256xf32, #tpu.memory_space<vmem>>) attributes {dimension_semantics = [#tpu.dimension_semantics<parallel>, #tpu.dimension_semantics<parallel>], iteration_bounds = array<i64: 2, 1>, scalar_prefetch = 0 : i64, scratch_operands = 0 : i64, tpu.core_type = #tpu.core_type<tc>, window_params = [{transform_indices = @transform_0, window_bounds = array<i64: 1, 256, 128>}, {pipeline_mode = #tpu.pipeline_mode<synchronous>, transform_indices = @transform_1, window_bounds = array<i64: 128, 1024>}, {pipeline_mode = #tpu.pipeline_mode<synchronous>, transform_indices = @transform_2, window_bounds = array<i64: 1, 1024>}, {pipeline_mode = #tpu.pipeline_mode<synchronous>, transform_indices = @transform_3, window_bounds = array<i64: 1024, 256>}, {transform_indices = @transform_4, window_bounds = array<i64: 1, 1, 256>}, {transform_indices = @transform_5, window_bounds = array<i64: 1, 256, 256>}]} {
    %c0 = arith.constant 0 : index
    %c0_0 = arith.constant 0 : index
    %c0_1 = arith.constant 0 : index
    %0 = vector.load %arg2[%c0, %c0_0, %c0_1] : memref<1x256x128xbf16, #tpu.memory_space<vmem>>, vector<1x256x128xbf16>
    %1 = vector.shape_cast %0 : vector<1x256x128xbf16> to vector<256x128xbf16>
    %c0_2 = arith.constant 0 : index
    %c0_3 = arith.constant 0 : index
    %2 = vector.load %arg3[%c0_2, %c0_3] : memref<128x1024xbf16, #tpu.memory_space<vmem>>, vector<128x1024xbf16>
    %cst = arith.constant dense<0.000000e+00> : vector<256x1024xf32>
    %3 = tpu.matmul %1, %2, %cst {dimension_numbers = #tpu.dot_dimension_numbers<[1], [0], [0], [1], [0, 0, 1, 1], [], []>} : vector<256x128xbf16>, vector<128x1024xbf16>, vector<256x1024xf32> -> vector<256x1024xf32>
    %c0_4 = arith.constant 0 : index
    %c0_5 = arith.constant 0 : index
    %4 = vector.load %arg4[%c0_4, %c0_5] : memref<1x1024xf32, #tpu.memory_space<vmem>>, vector<1x1024xf32>
    %5 = vector.broadcast %4 : vector<1x1024xf32> to vector<256x1024xf32>
    %6 = arith.addf %3, %5 : vector<256x1024xf32>
    %cst_6 = arith.constant 0.000000e+00 : f32
    %7 = vector.broadcast %cst_6 : f32 to vector<256x1024xf32>
    %8 = arith.maximumf %6, %7 : vector<256x1024xf32>
    %9 = arith.truncf %8 : vector<256x1024xf32> to vector<256x1024xbf16>
    %c0_7 = arith.constant 0 : index
    %c0_8 = arith.constant 0 : index
    %10 = vector.load %arg5[%c0_7, %c0_8] : memref<1024x256xbf16, #tpu.memory_space<vmem>>, vector<1024x256xbf16>
    %cst_9 = arith.constant dense<0.000000e+00> : vector<256x256xf32>
    %11 = tpu.matmul %9, %10, %cst_9 {dimension_numbers = #tpu.dot_dimension_numbers<[1], [0], [0], [1], [0, 0, 1, 1], [], []>} : vector<256x1024xbf16>, vector<1024x256xbf16>, vector<256x256xf32> -> vector<256x256xf32>
    %c0_10 = arith.constant 0 : index
    %c0_11 = arith.constant 0 : index
    %c0_12 = arith.constant 0 : index
    %12 = vector.load %arg6[%c0_10, %c0_11, %c0_12] : memref<1x1x256xf32, #tpu.memory_space<vmem>>, vector<1x1x256xf32>
    %13 = vector.shape_cast %12 : vector<1x1x256xf32> to vector<1x256xf32>
    %14 = vector.broadcast %13 : vector<1x256xf32> to vector<256x256xf32>
    %15 = arith.addf %11, %14 : vector<256x256xf32>
    %cst_13 = arith.constant 0.000000e+00 : f32
    %16 = vector.broadcast %cst_13 : f32 to vector<256x256xf32>
    %17 = arith.maximumf %15, %16 : vector<256x256xf32>
    %c0_14 = arith.constant 0 : index
    %c0_15 = arith.constant 0 : index
    %c0_16 = arith.constant 0 : index
    %18 = vector.load %arg7[%c0_14, %c0_15, %c0_16] : memref<1x256x256xf32, #tpu.memory_space<vmem>>, vector<1x256x256xf32>
    %19 = vector.shape_cast %18 : vector<1x256x256xf32> to vector<256x256xf32>
    %20 = vector.shape_cast %17 : vector<256x256xf32> to vector<1x256x256xf32>
    tpu.vector_store %arg7[%c0_14, %c0_15, %c0_16], %20 {strides = array<i32>} : memref<1x256x256xf32, #tpu.memory_space<vmem>>, vector<1x256x256xf32>,
    return
  }
  func.func @transform_0(%arg0: i32, %arg1: i32) -> (i32, i32, i32) {
    %c0_i32 = arith.constant 0 : i32
    %c0_i32_0 = arith.constant 0 : i32
    return %arg0, %arg1, %c0_i32 : i32, i32, i32
  }
  func.func @transform_1(%arg0: i32, %arg1: i32) -> (i32, i32) {
    %c0_i32 = arith.constant 0 : i32
    %c0_i32_0 = arith.constant 0 : i32
    %c0_i32_1 = arith.constant 0 : i32
    return %c0_i32, %c0_i32_0 : i32, i32
  }
  func.func @transform_2(%arg0: i32, %arg1: i32) -> (i32, i32) {
    %c0_i32 = arith.constant 0 : i32
    %c0_i32_0 = arith.constant 0 : i32
    %c0_i32_1 = arith.constant 0 : i32
    return %c0_i32, %c0_i32_0 : i32, i32
  }
  func.func @transform_3(%arg0: i32, %arg1: i32) -> (i32, i32) {
    %c0_i32 = arith.constant 0 : i32
    %c0_i32_0 = arith.constant 0 : i32
    %c0_i32_1 = arith.constant 0 : i32
    return %c0_i32, %c0_i32_0 : i32, i32
  }
  func.func @transform_4(%arg0: i32, %arg1: i32) -> (i32, i32, i32) {
    %c0_i32 = arith.constant 0 : i32
    %c0_i32_0 = arith.constant 0 : i32
    %c0_i32_1 = arith.constant 0 : i32
    return %arg0, %c0_i32, %c0_i32_0 : i32, i32, i32
  }
  func.func @transform_5(%arg0: i32, %arg1: i32) -> (i32, i32, i32) {
    %c0_i32 = arith.constant 0 : i32
    %c0_i32_0 = arith.constant 0 : i32
    return %arg0, %arg1, %c0_i32 : i32, i32, i32
  }
}

</mosaic_0001>

<bundles_post_ra>
// kernel: tpu_custom_call.1
= control target key start
LH: loop header
LB: loop body
LE: loop exit
PB: predicated region body
PF: predicated region fallthrough
CT: control target
= control target key end

     0   :  { %10 = vsyncpa [#allocation3], 0  ;;  %s6295_s0 = inlined_call_operand.hbm [shape: bf16[2,256,128], index: 0, kind: input, shape index: {}]   ;;  %s6296_s1 = inlined_call_operand.hbm [shape: bf16[128,1024], index: 1, kind: input, shape index: {}]   ;;  %s6297_s2 = inlined_call_operand.hbm [shape: f32[1,1024], index: 2, kind: input, shape index: {}]   ;;  %s6298_s3 = inlined_call_operand.hbm [shape: bf16[1024,256], index: 3, kind: input, shape index: {}]   ;;  %s6299_s4 = inlined_call_operand.vmem [shape: f32[2,1,256], index: 4, kind: input, shape index: {}]   ;;  %s6300_s5 = inlined_call_operand.hbm [shape: f32[2,256,256], index: 5, kind: output, shape index: {}]  }
   0x1   :  { %12 = vsyncpa [#allocation3 + $0x1], 0 }
   0x2   :  { %13 = vsyncpa [#allocation6], 0 }
   0x3   :  { %14 = vsyncpa [#allocation9], 0 }
   0x4   :  { %15 = vsyncpa [#allocation4], 0 }
   0x5   :  { %17 = vsyncpa [#allocation4 + $0x1], 0  ;;  %s4918_s18 = smov 0   ;;  %s4920_s19 = smov 0  }
   0x6   :  { %s4922_s20 = smov 0   ;;  %s4924_s21 = smov 0  }
   0x7   :  { %s4926_s22 = smov 0   ;;  %s4928_s23 = smov 0  }
   0x8 LB: > { %6311 = sst [smem:[#allocation15_spill]] %s4852_s18  ;;  %s3858_s24 = sadd.s32 4294967295, %s4872_s23   ;;  %s4872_s23 = sphi %s4928_s23, %s23_s23   ;;  %s4868_s22 = sphi %s4926_s22, %s6393_s22   ;;  %s4864_s21 = sphi %s4924_s21, %s6392_s21   ;;  %s4860_s20 = sphi %s4922_s20, %s6391_s20   ;;  %s4856_s19 = sphi %s4920_s19, %s6390_s19   ;;  %s4852_s18 = sphi %s4918_s18, %s6389_s18  }
   0x9   : > { %s3859_s25 = sadd.s32 4294967294, %s4872_s23   ;;  %p57_p0 = scmp.ne.s32.totalorder %s4856_s19, %s4852_s18 }
   0xa   : > { %p4952_p1 = scmp.eq.s32.totalorder %s3858_s24, 0  ;;  %p4956_p2 = scmp.eq.s32.totalorder %s3858_s24, 1 }
   0xb   : > { %p178_p3 = scmp.eq.s32.totalorder %s3859_s25, 1  ;;  %p3860_p5 = scmp.ge.s32.totalorder %s4872_s23, 1 }
   0xc   : > { %s6312_s26 = scalar_select %p4952_p1, 1, 0 }
   0xd   : > { %s6313_s27 = scalar_select %p4956_p2, 1, 0 }
   0xe   : > { %p4962_p4 = por %p4952_p1, %p57_p0  ;;  %p4967_p6 = por %p178_p3, %p57_p0 }
   0xf   : > { %p185_p7 = scmp.lt.s32.totalorder %s4872_s23, 3  ;;  %s4874_s6 = smov [#allocation5]  }
  0x10   : > { %s6314_s28 = scalar_select %p4962_p4, 1, 0 }
  0x11   : > { %s6315_s29 = scalar_select %p4967_p6, 1, 0 }
  0x12   : > { %p4972_p8 = pnand %p3860_p5, %p185_p7  ;;  %s197_s7 = sshll.u32 %s4874_s6, 4  ;;  %s4976_s7 = int_to_ptr.vmem [resolvable:$true] %s197_s7 }
  0x13   : > { %6316 = sst [smem:[#allocation16_spill]] %s6315_s29  ;;  %s4875_s9 = smov [#allocation7]  }
  0x14   : > { %s6317_s30 = scalar_select %p4972_p8, 1, 0 }
  0x15   : > { %p4362_p9 = pneg %p4972_p8  ;;  %s211_s10 = sshll.u32 %s4875_s9, 4  ;;  %s4987_s10 = int_to_ptr.vmem [resolvable:$true] %s211_s10 }
  0x16   : > { %s4876_s11 = smov [#allocation8]   ;;  %s4668_s15 = scalar_lea.hbm %s6296_s1, 8192 }
  0x17   : > { %p4983_p11 = pnand %p4362_p9, %p4952_p1  ;;  %s4989_s12 = sshll.u32 %s4876_s11, 4  ;;  %s222_s12 = int_to_ptr.vmem [resolvable:$true] %s4989_s12 }
  0x18   : > { %p4669_p12 = scmp.ne.s32.totalorder %s6296_s1, %s4668_s15  ;;  %p4675_p5 = scmp.lt.u32.totalorder %s4668_s15, %s6296_s1 }
  0x19   : > { %p4999_p13 = pneg %p4983_p11 }
  0x1b   : > { %p4671_p0 = pnand %p4999_p13, %p4669_p12 }
  0x1d   : > { %p4672_p3 = pneg %p4671_p0 }
  0x1f   : > { %p4677_p7 = pnand %p4675_p5, %p4672_p3 }
  0x21   : > { %4680 = shalt.err (!%p4677_p7)
}
  0x22   : > { %s4681_s9 = scalar_lea.vmem %s4976_s7, 8192  ;;  %p4689_p1 = scmp.lt.s32.totalorder %s4976_s7, %s4976_s7 }
  0x23   : > { %p4682_p9 = scmp.ne.s32.totalorder %s4976_s7, %s4681_s9  ;;  %p4690_p4 = scmp.lt.s32.totalorder %s4681_s9, %s4681_s9 }
  0x25   : > { %p4684_p10 = pnand %p4682_p9, %p4999_p13  ;;  %p4691_p12 = por %p4690_p4, %p4689_p1 }
  0x27   : > { %p4685_p6 = pneg %p4684_p10 }
  0x29   : > { %p4692_p0 = pnand %p4691_p12, %p4685_p6 }
  0x2b   : > { %4695 = shalt.err (!%p4692_p0)
}
  0x2c   : > { %s4877_s11 = smov 512   ;;  %s4878_s13 = smov 32  }
  0x2d   : > { %4365 = dma.hbm_to_vmem [thread:$0]  (!%p4983_p11), %s6296_s1, 8192, %s4976_s7, [#allocation6], %s4877_s11, %s4877_s11, %s4878_s13  }
  0x2e   : > { %s4696_s25 = scalar_lea.hbm %s6297_s2, 128 }
  0x2f   : > { %p4697_p1 = scmp.ne.s32.totalorder %s6297_s2, %s4696_s25  ;;  %p4703_p10 = scmp.lt.u32.totalorder %s4696_s25, %s6297_s2 }
  0x31   : > { %p4699_p4 = pnand %p4697_p1, %p4999_p13 }
  0x33   : > { %p4700_p6 = pneg %p4699_p4 }
  0x35   : > { %p4705_p3 = pnand %p4703_p10, %p4700_p6 }
  0x37   : > { %4708 = shalt.err (!%p4705_p3)
}
  0x38   : > { %s4709_s7 = scalar_lea.vmem %s4987_s10, 128  ;;  %p4717_p12 = scmp.lt.s32.totalorder %s4987_s10, %s4987_s10 }
  0x39   : > { %p4710_p5 = scmp.ne.s32.totalorder %s4987_s10, %s4709_s7  ;;  %p4718_p0 = scmp.lt.s32.totalorder %s4709_s7, %s4709_s7 }
  0x3b   : > { %p4712_p7 = pnand %p4710_p5, %p4999_p13  ;;  %p4719_p1 = por %p4718_p0, %p4717_p12 }
  0x3d   : > { %p4713_p9 = pneg %p4712_p7 }
  0x3f   : > { %p4720_p4 = pnand %p4719_p1, %p4713_p9 }
  0x41   : > { %4723 = shalt.err (!%p4720_p4)
}
  0x42   : > { %4368 = dma.hbm_to_vmem [thread:$0]  (!%p4983_p11), %s6297_s2, 128, %s4987_s10, [#allocation6]  }
  0x43   : > { %s4724_s14 = scalar_lea.hbm %s6298_s3, 16384 }
  0x44   : > { %p4725_p6 = scmp.ne.s32.totalorder %s6298_s3, %s4724_s14  ;;  %p4731_p5 = scmp.lt.u32.totalorder %s4724_s14, %s6298_s3 }
  0x46   : > { %p4727_p10 = pnand %p4725_p6, %p4999_p13 }
  0x48   : > { %p4728_p3 = pneg %p4727_p10 }
  0x4a   : > { %p4733_p7 = pnand %p4731_p5, %p4728_p3 }
  0x4c   : > { %4736 = shalt.err (!%p4733_p7)
}
  0x4d   : > { %s4737_s6 = scalar_lea.vmem %s222_s12, 16384  ;;  %p4745_p1 = scmp.lt.s32.totalorder %s222_s12, %s222_s12 }
  0x4e   : > { %p4738_p9 = scmp.ne.s32.totalorder %s222_s12, %s4737_s6  ;;  %p4746_p4 = scmp.lt.s32.totalorder %s4737_s6, %s4737_s6 }
  0x50   : > { %p4740_p12 = pnand %p4738_p9, %p4999_p13  ;;  %p4747_p8 = por %p4746_p4, %p4745_p1 }
  0x52   : > { %p4741_p0 = pneg %p4740_p12 }
  0x54   : > { %p4748_p2 = pnand %p4747_p8, %p4741_p0 }
  0x56   : > { %4751 = shalt.err (!%p4748_p2)
}
  0x57   : > { %s4879_s10 = smov 128   ;;  %s4880_s24 = smov 8  }
  0x58   : > { %4371 = dma.hbm_to_vmem [thread:$0]  (!%p4983_p11), %s6298_s3, 16384, %s222_s12, [#allocation9], %s4879_s10, %s4879_s10, %s4880_s24  }
  0x59   : > { %s44_s18 = sadd.s32 1, %s4860_s20  ;;  %s35_s29 = sadd.s32 1, %s4868_s22 }
  0x5a   : > { %p51_p2 = scmp.ne.s32.totalorder %s4860_s20, %s4856_s19  ;;  %p37_p8 = scmp.ge.s32.totalorder %s35_s29, 2 }
  0x5b   : > { %p52_p13 = scmp.eq.s32.totalorder %s4872_s23, 0  ;;  %p6320_p6 = scmp.ne.s32.totalorder %s6313_s27, 0 }
  0x5c   : > { %p4383_p3 = scmp.lt.s32.totalorder %s4872_s23, 2  ;;  %s6395_s29 = smov (%p37_p8, %s35_s29), 0 }
  0x5d   : > { %p5069_p10 = por %p6320_p6, %p51_p2  ;;  %p53_p5 = por %p52_p13, %p51_p2 }
  0x5e   : > { %s235_s8 = sand.u32 1, %s4860_s20   ;;  %s39_s13 = ssub.s32 %s4868_s22, %s6395_s29 }
  0x5f   : > { %p42_p7 = scmp.eq.s32.totalorder %s39_s13, 0  ;;  %s3865_s12 = sshll.u32 %s235_s8, 7 }
  0x60   : > { %s4088_s14 = sshll.u32 %s4868_s22, 11  ;;  %s239_s25 = scalar_lea.vmem [#allocation2], %s3865_s12 }
  0x61   : > { %s5081_s15 = scalar_select %p42_p7, %s4860_s20, %s44_s18  }
  0x62   : > { %s5086_s27 = scalar_lea.hbm %s6295_s0, %s4088_s14  ;;  %s248_s6 = sshll.u32 %s239_s25, 4  ;;  %s5088_s6 = int_to_ptr.vmem [resolvable:$true] %s248_s6 }
  0x63   : > { %p5092_p11 = pnand %p4383_p3, %p53_p5  ;;  %s5096_s24 = scalar_lea.sflag [#allocation3], %s235_s8 }
  0x64   : > { %s4752_s9 = scalar_lea.hbm %s5086_s27, 2048  ;;  %s4757_s13 = scalar_lea.hbm %s6295_s0, 4096 }
  0x65   : > { %p4753_p9 = scmp.ne.s32.totalorder %s5086_s27, %s4752_s9  ;;  %p4754_p12 = pneg %p5092_p11 }
  0x66   : > { %p4758_p4 = scmp.lt.u32.totalorder %s5086_s27, %s6295_s0  ;;  %p4759_p2 = scmp.lt.u32.totalorder %s4757_s13, %s4752_s9 }
  0x67   : > { %p4755_p0 = pnand %p4754_p12, %p4753_p9  ;;  %p4761_p13 = scmp.lt.u32.totalorder %s4752_s9, %s5086_s27 }
  0x68   : > { %p4760_p8 = por %p4759_p2, %p4758_p4 }
  0x69   : > { %p4756_p1 = pneg %p4755_p0 }
  0x6a   : > { %p4762_p6 = por %p4761_p13, %p4760_p8 }
  0x6c   : > { %p4763_p3 = pnand %p4762_p6, %p4756_p1 }
  0x6e   : > { %4766 = shalt.err (!%p4763_p3)
}
  0x6f   : > { %s4767_s8 = scalar_lea.vmem %s5088_s6, 2048  ;;  %s4881_s16 = smov [#allocation2]  }
  0x70   : > { %p4768_p5 = scmp.ne.s32.totalorder %s5088_s6, %s4767_s8  ;;  %s4772_s17 = sshll.u32 %s4881_s16, 4  ;;  %s4773_s17 = int_to_ptr.vmem [resolvable:$false] %s4772_s17 }
  0x71   : > { %s4774_s25 = scalar_lea.vmem %s4773_s17, 4096  ;;  %p4775_p0 = scmp.lt.s32.totalorder %s5088_s6, %s4773_s17 }
  0x72   : > { %p4770_p7 = pnand %p4768_p5, %p4754_p12  ;;  %p4776_p4 = scmp.lt.s32.totalorder %s4774_s25, %s4767_s8 }
  0x74   : > { %p4771_p9 = pneg %p4770_p7  ;;  %p4777_p2 = por %p4776_p4, %p4775_p0 }
  0x76   : > { %p4778_p8 = pnand %p4777_p2, %p4771_p9 }
  0x78   : > { %4781 = shalt.err (!%p4778_p8)
}
  0x79   : > { %s4882_s9 = smov 64   ;;  %s4883_s7 = smov 4  }
  0x7a   : > { %4375 = dma.hbm_to_vmem [thread:$0]  (!%p5092_p11), %s5086_s27, 2048, %s5088_s6, %s5096_s24, %s4882_s9, %s4882_s9, %s4883_s7  }
  0x7b   : > { %p6323_p12 = scmp.ne.s32.totalorder %s6317_s30, 0 }
  0x7d   : > { %267 = sbr.rel (%p6323_p12) target bundleno = 1137 (0x471), region = 40 }
  0x84   : > { %s5127_s18 = sand.u32 1, %s4856_s19   ;;  %p6324_p1 = scmp.ne.s32.totalorder %s6314_s28, 0 }
  0x85   : > { %s3869_s13 = sshll.u32 %s5127_s18, 7  ;;  %s270_s12 = scalar_lea.sflag [#allocation3], %s5127_s18 }
  0x86   : > { %s5131_s14 = scalar_lea.vmem [#allocation2], %s3869_s13 }
  0x87   : > { %4835 = dma.done.wait (%p6324_p1), %s270_s12, 2048  }
  0x88   : > { %4837 = vsyncadd (%p6324_p1), %s270_s12, 4294965248  ;;  %p6325_p11 = scmp.ne.s32.totalorder %s6312_s26, 0 }
  0x8a   : > { %4839 = dma.done.wait (%p6325_p11), [#allocation6], 8320  }
  0x8b   : > { %4841 = vsyncadd (%p6325_p11), [#allocation6], 4294958976 }
  0x8c   : > { %4843 = dma.done.wait (%p6325_p11), [#allocation9], 16384  }
  0x8d   : > { %4845 = vsyncadd (%p6325_p11), [#allocation9], 4294950912  ;;  %v6309_v0 = vmov 0   ;;  %v355_v1 = vld [vmem:[#allocation5] sm:$0xff]  ;;  %v356_v32 = vld [vmem:[#allocation5 + $0x8] sm:$0xff]  ;;  %p317_p13 = scmp.lt.s32.totalorder %s4864_s21, 1 }
  0x8e   : > { %909 = vmatprep.mubr.bf16.mxu1 %v6309_v0  ;;  %1295 = vmatprep.mubr.bf16.mxu0 %v6309_v0  ;;  %v359_v2 = vld [vmem:[#allocation5 + $0x20] sm:$0xff]  ;;  %v360_v33 = vld [vmem:[#allocation5 + $0x28] sm:$0xff]  ;;  %v5158_v55 = vld [vmem:[%s5131_s14 + $0x10] sm:$0xff]   ;;  %s3873_s10 = sshll.u32 %s5127_s18, 9  ;;  %s4089_s8 = sshll.u32 %s4864_s21, 13 }
  0x8f   : > { %v363_v3 = vld [vmem:[#allocation5 + $0x40] sm:$0xff]  ;;  %v3892_v4 = vcombine.high %v355_v1, %v359_v2  ;;  %v3891_v5 = vcombine.low %v355_v1, %v359_v2  ;;  %v364_v35 = vld [vmem:[#allocation5 + $0x48] sm:$0xff]  ;;  %v3894_v38 = vcombine.high %v356_v32, %v360_v33  ;;  %v3893_v39 = vcombine.low %v356_v32, %v360_v33  ;;  %v5163_v1 = vld [vmem:[%s5131_s14 + $0x18] sm:$0xff]   ;;  %s318_s26 = scalar_select %p317_p13, %s4864_s21, 1 }
  0x90   : > { %v367_v6 = vld [vmem:[#allocation5 + $0x60] sm:$0xff]  ;;  %v368_v36 = vld [vmem:[#allocation5 + $0x68] sm:$0xff]  ;;  %v5198_v32 = vld [vmem:[%s5131_s14 + $0x50] sm:$0xff]   ;;  %s6053_s24 = scalar_lea.vmem [#allocation10], %s3873_s10  ;;  %s6241_s9 = scalar_lea.hbm %s6300_s5, %s4089_s8 }
  0x91   : > { %v3900_v7 = vcombine.high %v363_v3, %v367_v6  ;;  %v371_v8 = vld [vmem:[#allocation5 + $0x80] sm:$0xff]  ;;  %877 = vmatprep.subr.bf16.mxu1 %v3892_v4  ;;  %v3899_v10 = vcombine.low %v363_v3, %v367_v6  ;;  %v372_v40 = vld [vmem:[#allocation5 + $0x88] sm:$0xff]  ;;  %v3902_v42 = vcombine.high %v364_v35, %v368_v36  ;;  %v3901_v43 = vcombine.low %v364_v35, %v368_v36  ;;  %v397_v33 = vld [vmem:[#allocation5 + $0x150] sm:$0xff]  ;;  %s3874_s28 = sshll.u32 %s318_s26, 1  ;;  %s3730_s16 = sshll.u32 %s6053_s24, 4  ;;  %s6243_s16 = int_to_ptr.vmem [resolvable:$true] %s3730_s16 }
  0x92   : > { %v375_v9 = vld [vmem:[#allocation5 + $0xa0] sm:$0xff]  ;;  %878 = vmatpush1.bf16.msra.mxu1 %v3891_v5  ;;  %v376_v41 = vld [vmem:[#allocation5 + $0xa8] sm:$0xff]  ;;  %s320_s6 = scalar_lea.vmem %s6299_s4, %s3874_s28  ;;  %s3714_s21 = scalar_lea.sflag [#allocation4], %s5127_s18 }
  0x93   : > { %879 = vmatprep.subr.bf16.mxu1 %v3900_v7  ;;  %v3908_v11 = vcombine.high %v371_v8, %v375_v9  ;;  %v379_v12 = vld [vmem:[#allocation5 + $0xc0] sm:$0xff]  ;;  %v3907_v14 = vcombine.low %v371_v8, %v375_v9  ;;  %v380_v44 = vld [vmem:[#allocation5 + $0xc8] sm:$0xff]  ;;  %v3910_v47 = vcombine.high %v372_v40, %v376_v41  ;;  %v3909_v48 = vcombine.low %v372_v40, %v376_v41  ;;  %v5178_v8 = vld [vmem:[%s5131_s14 + $0x30] sm:$0xff]   ;;  %s4782_s7 = scalar_lea.vmem %s6243_s16, 8192  ;;  %s4885_s13 = smov [#allocation10]  }
  0x94   : > { %v383_v13 = vld [vmem:[#allocation5 + $0xe0] sm:$0xff]  ;;  %v384_v45 = vld [vmem:[#allocation5 + $0xe8] sm:$0xff]  ;;  %v5183_v9 = vld [vmem:[%s5131_s14 + $0x38] sm:$0xff]   ;;  %p4783_p6 = scmp.ne.s32.totalorder %s6243_s16, %s4782_s7  ;;  %s4786_s12 = sshll.u32 %s4885_s13, 4  ;;  %s4787_s12 = int_to_ptr.vmem [resolvable:$false] %s4786_s12 }
  0x95   : > { %v3916_v15 = vcombine.high %v379_v12, %v383_v13  ;;  %v387_v16 = vld [vmem:[#allocation5 + $0x100] sm:$0xff]  ;;  %v3915_v18 = vcombine.low %v379_v12, %v383_v13  ;;  %v5153_v46 = vld [vmem:[%s5131_s14 + $0x8] sm:$0xff]   ;;  %v3918_v51 = vcombine.high %v380_v44, %v384_v45  ;;  %v3917_v52 = vcombine.low %v380_v44, %v384_v45  ;;  %v417_v44 = vld [vmem:[#allocation5 + $0x1f0] sm:$0xff]  ;;  %p4789_p7 = scmp.lt.s32.totalorder %s6243_s16, %s4787_s12 }
  0x96   : > { %880 = vmatpush1.bf16.msra.mxu1 %v3899_v10  ;;  %v391_v17 = vld [vmem:[#allocation5 + $0x120] sm:$0xff]  ;;  %v388_v49 = vld [vmem:[#allocation5 + $0x108] sm:$0xff]  ;;  %v357_v10 = vld [vmem:[#allocation5 + $0x10] sm:$0xff]  ;;  %p4784_p3 = pnand %p4783_p6, %p5069_p10 }
  0x97   : > { %881 = vmatprep.subr.bf16.mxu1 %v3908_v11  ;;  %v3924_v19 = vcombine.high %v387_v16, %v391_v17  ;;  %v395_v20 = vld [vmem:[#allocation5 + $0x140] sm:$0xff]  ;;  %v3923_v22 = vcombine.low %v387_v16, %v391_v17  ;;  %v392_v50 = vld [vmem:[#allocation5 + $0x128] sm:$0xff]  ;;  %v361_v11 = vld [vmem:[#allocation5 + $0x30] sm:$0xff] }
  0x98   : > { %v399_v21 = vld [vmem:[#allocation5 + $0x160] sm:$0xff]  ;;  %v396_v53 = vld [vmem:[#allocation5 + $0x148] sm:$0xff]  ;;  %v3926_v56 = vcombine.high %v388_v49, %v392_v50  ;;  %v3925_v57 = vcombine.low %v388_v49, %v392_v50  ;;  %v3896_v12 = vcombine.high %v357_v10, %v361_v11  ;;  %v3895_v13 = vcombine.low %v357_v10, %v361_v11  ;;  %v369_v16 = vld [vmem:[#allocation5 + $0x70] sm:$0xff]  ;;  %p4785_p5 = pneg %p4784_p3 }
  0x99   : > { %v3932_v23 = vcombine.high %v395_v20, %v399_v21  ;;  %v403_v24 = vld [vmem:[#allocation5 + $0x180] sm:$0xff]  ;;  %v3931_v26 = vcombine.low %v395_v20, %v399_v21  ;;  %v400_v54 = vld [vmem:[#allocation5 + $0x168] sm:$0xff]  ;;  %v377_v20 = vld [vmem:[#allocation5 + $0xb0] sm:$0xff] }
  0x9a   : > { %882 = vmatpush1.bf16.msra.mxu1 %v3907_v14  ;;  %v407_v25 = vld [vmem:[#allocation5 + $0x1a0] sm:$0xff]  ;;  %v404_v58 = vld [vmem:[#allocation5 + $0x188] sm:$0xff]  ;;  %v3934_v60 = vcombine.high %v396_v53, %v400_v54  ;;  %v3933_v61 = vcombine.low %v396_v53, %v400_v54  ;;  %1263 = vmatprep.subr.bf16.mxu0 %v3896_v12  ;;  %v358_v49 = vld [vmem:[#allocation5 + $0x18] sm:$0xff] }
  0x9b   : > { %883 = vmatprep.subr.bf16.mxu1 %v3916_v15  ;;  %v3940_v27 = vcombine.high %v403_v24, %v407_v25  ;;  %v411_v28 = vld [vmem:[#allocation5 + $0x1c0] sm:$0xff]  ;;  %v3939_v30 = vcombine.low %v403_v24, %v407_v25  ;;  %v408_v59 = vld [vmem:[#allocation5 + $0x1a8] sm:$0xff]  ;;  %1264 = vmatpush1.bf16.msra.mxu0 %v3895_v13  ;;  %v365_v15 = vld [vmem:[#allocation5 + $0x50] sm:$0xff] }
  0x9c   : > { %v415_v29 = vld [vmem:[#allocation5 + $0x1e0] sm:$0xff]  ;;  %v412_v62 = vld [vmem:[#allocation5 + $0x1c8] sm:$0xff]  ;;  %v3942_v2 = vcombine.high %v404_v58, %v408_v59  ;;  %v3941_v3 = vcombine.low %v404_v58, %v408_v59  ;;  %v3904_v17 = vcombine.high %v365_v15, %v369_v16  ;;  %v381_v24 = vld [vmem:[#allocation5 + $0xd0] sm:$0xff] }
  0x9d   : > { %v3948_v31 = vcombine.high %v411_v28, %v415_v29  ;;  %v3947_v34 = vcombine.low %v411_v28, %v415_v29  ;;  %v5148_v37 = vld [vmem:[%s5131_s14] sm:$0xff]   ;;  %v416_v63 = vld [vmem:[#allocation5 + $0x1e8] sm:$0xff]  ;;  %v385_v25 = vld [vmem:[#allocation5 + $0xf0] sm:$0xff] }
  0x9e   : > { %884 = vmatpush1.bf16.msra.mxu1 %v3915_v18  ;;  %v3950_v4 = vcombine.high %v412_v62, %v416_v63  ;;  %v3949_v5 = vcombine.low %v412_v62, %v416_v63  ;;  %v5168_v6 = vld [vmem:[%s5131_s14 + $0x20] sm:$0xff]   ;;  %v5173_v7 = vld [vmem:[%s5131_s14 + $0x28] sm:$0xff]   ;;  %v3903_v18 = vcombine.low %v365_v15, %v369_v16  ;;  %1265 = vmatprep.subr.bf16.mxu0 %v3904_v17  ;;  %v389_v28 = vld [vmem:[#allocation5 + $0x110] sm:$0xff] }
  0x9f   : > { %885 = vmatprep.subr.bf16.mxu1 %v3924_v19  ;;  %v5188_v14 = vld [vmem:[%s5131_s14 + $0x40] sm:$0xff]   ;;  %v373_v19 = vld [vmem:[#allocation5 + $0x90] sm:$0xff]  ;;  %v362_v50 = vld [vmem:[#allocation5 + $0x38] sm:$0xff] }
  0xa0   : > { %1266 = vmatpush1.bf16.msra.mxu0 %v3903_v18  ;;  %v3912_v21 = vcombine.high %v373_v19, %v377_v20  ;;  %v393_v29 = vld [vmem:[#allocation5 + $0x130] sm:$0xff]  ;;  %v5216_v54 = vld [vmem:[%s5131_s14 + $0x68] sm:$0xff]   ;;  %v366_v62 = vld [vmem:[#allocation5 + $0x58] sm:$0xff] }
  0xa1   : > { %v4466_v53 = vld [vmem:[#allocation8 + $0x104] ss:$8 sps:$4 sm:$0xff]   ;;  %v4470_v59 = vld [vmem:[#allocation8 + $0x120] ss:$8 sps:$4 sm:$0xff]   ;;  %v370_v63 = vld [vmem:[#allocation5 + $0x78] sm:$0xff] }
  0xa2   : > { %886 = vmatpush1.bf16.msra.mxu1 %v3923_v22  ;;  %v3911_v22 = vcombine.low %v373_v19, %v377_v20  ;;  %1267 = vmatprep.subr.bf16.mxu0 %v3912_v21  ;;  %v5223_v58 = vld [vmem:[%s5131_s14 + $0x70] sm:$0xff]   ;;  %v374_v10 = vld [vmem:[#allocation5 + $0x98] sm:$0xff]  ;;  %v3905_v12 = vcombine.low %v366_v62, %v370_v63 }
  0xa3   : > { %887 = vmatprep.subr.bf16.mxu1 %v3932_v23  ;;  %v5193_v23 = vld [vmem:[%s5131_s14 + $0x48] sm:$0xff]   ;;  %v378_v11 = vld [vmem:[#allocation5 + $0xb8] sm:$0xff] }
  0xa4   : > { %1268 = vmatpush1.bf16.msra.mxu0 %v3911_v22  ;;  %v3914_v13 = vcombine.high %v374_v10, %v378_v11  ;;  %v382_v15 = vld [vmem:[#allocation5 + $0xd8] sm:$0xff]  ;;  %v4476_v17 = vld [vmem:[#allocation8 + $0x140] ss:$8 sps:$4 sm:$0xff]   ;;  %v4478_v18 = vld [vmem:[#allocation8 + $0x144] ss:$8 sps:$4 sm:$0xff]   ;;  %v3913_v19 = vcombine.low %v374_v10, %v378_v11 }
  0xa5   : > { %v386_v16 = vld [vmem:[#allocation5 + $0xf8] sm:$0xff] }
  0xa6   : > { %888 = vmatpush1.bf16.msra.mxu1 %v3931_v26  ;;  %v3920_v26 = vcombine.high %v381_v24, %v385_v25  ;;  %v3922_v20 = vcombine.high %v382_v15, %v386_v16  ;;  %v394_v21 = vld [vmem:[#allocation5 + $0x138] sm:$0xff]  ;;  %v3921_v22 = vcombine.low %v382_v15, %v386_v16 }
  0xa7   : > { %889 = vmatprep.subr.bf16.mxu1 %v3940_v27  ;;  %v3919_v27 = vcombine.low %v381_v24, %v385_v25  ;;  %v398_v25 = vld [vmem:[#allocation5 + $0x158] sm:$0xff] }
  0xa8   : > { %1269 = vmatprep.subr.bf16.mxu0 %v3920_v26  ;;  %v402_v26 = vld [vmem:[#allocation5 + $0x178] sm:$0xff] }
  0xa9   : > { %1270 = vmatpush1.bf16.msra.mxu0 %v3919_v27  ;;  %v4479_v27 = vld [vmem:[#allocation8 + $0x150] ss:$8 sps:$4 sm:$0xff]  }
  0xaa   : > { %890 = vmatpush1.bf16.msra.mxu1 %v3939_v30  ;;  %v3928_v30 = vcombine.high %v389_v28, %v393_v29 }
  0xab   : > { %891 = vmatprep.subr.bf16.mxu1 %v3948_v31  ;;  %v3927_v31 = vcombine.low %v389_v28, %v393_v29  ;;  %v4481_v28 = vld [vmem:[#allocation8 + $0x154] ss:$8 sps:$4 sm:$0xff]  }
  0xac   : > { %1271 = vmatprep.subr.bf16.mxu0 %v3928_v30  ;;  %v3938_v30 = vcombine.high %v398_v25, %v402_v26 }
  0xad   : > { %1272 = vmatpush1.bf16.msra.mxu0 %v3927_v31  ;;  %v410_v31 = vld [vmem:[#allocation5 + $0x1b8] sm:$0xff] }
  0xae   : > { %892 = vmatpush1.bf16.msra.mxu1 %v3947_v34  ;;  %v401_v34 = vld [vmem:[#allocation5 + $0x170] sm:$0xff] }
  0xaf   : > { %1070 = vmatprep.subr.bf16.mxu1 %v3894_v38  ;;  %v3936_v35 = vcombine.high %v397_v33, %v401_v34  ;;  %v3935_v36 = vcombine.low %v397_v33, %v401_v34  ;;  %v405_v38 = vld [vmem:[#allocation5 + $0x190] sm:$0xff]  ;;  %v3937_v33 = vcombine.low %v398_v25, %v402_v26  ;;  %v4527_v26 = vld [vmem:[#allocation8 + $0x1f0] ss:$8 sps:$4 sm:$0xff]  }
  0xb1   : > { %910 = vmatmul.mubr.bf16.vlgmr.msra.gmra.mrb[0].mxu1 %v5148_v37  ;;  %1273 = vmatprep.subr.bf16.mxu0 %v3936_v35  ;;  %v414_v35 = vld [vmem:[#allocation5 + $0x1d8] sm:$0xff] }
  0xb2   : > { %1071 = vmatpush1.bf16.msra.mxu1 %v3893_v39  ;;  %919 = vmatprep.mubr.bf16.mxu1 %v6309_v0  ;;  %v409_v39 = vld [vmem:[#allocation5 + $0x1b0] sm:$0xff] }
  0xb3   : > { %1072 = vmatprep.subr.bf16.mxu1 %v3902_v42  ;;  %1274 = vmatpush1.bf16.msra.mxu0 %v3935_v36  ;;  %v3944_v40 = vcombine.high %v405_v38, %v409_v39  ;;  %v3943_v41 = vcombine.low %v405_v38, %v409_v39  ;;  %v5203_v42 = vld [vmem:[%s5131_s14 + $0x58] sm:$0xff]   ;;  %v4482_v38 = vld [vmem:[#allocation8 + $0x160] ss:$8 sps:$4 sm:$0xff]   ;;  %v4484_v39 = vld [vmem:[#allocation8 + $0x164] ss:$8 sps:$4 sm:$0xff]  }
  0xb4   : > { %v418_v36 = vld [vmem:[#allocation5 + $0x1f8] sm:$0xff] }
  0xb5   : > { %1275 = vmatprep.subr.bf16.mxu0 %v3944_v40 }
  0xb6   : > { %1073 = vmatpush1.bf16.msra.mxu1 %v3901_v43  ;;  %v413_v43 = vld [vmem:[#allocation5 + $0x1d0] sm:$0xff] }
  0xb7   : > { %1074 = vmatprep.subr.bf16.mxu1 %v3910_v47  ;;  %1276 = vmatpush1.bf16.msra.mxu0 %v3943_v41  ;;  %v3952_v45 = vcombine.high %v413_v43, %v417_v44  ;;  %v3951_v47 = vcombine.low %v413_v43, %v417_v44  ;;  %v3954_v41 = vcombine.high %v414_v35, %v418_v36  ;;  %v4485_v44 = vld [vmem:[#allocation8 + $0x170] ss:$8 sps:$4 sm:$0xff]  }
  0xb8   : > { %v3953_v43 = vcombine.low %v414_v35, %v418_v36 }
  0xb9   : > { %920 = vmatmul.mubr.bf16.gmra.mrb[4].mxu1 %v5153_v46  ;;  %1277 = vmatprep.subr.bf16.mxu0 %v3952_v45  ;;  %v4487_v45 = vld [vmem:[#allocation8 + $0x174] ss:$8 sps:$4 sm:$0xff]  }
  0xba   : > { %929 = vmatprep.mubr.bf16.mxu1 %v6309_v0  ;;  %1075 = vmatpush1.bf16.msra.mxu1 %v3909_v48  ;;  %v5209_v48 = vld [vmem:[%s5131_s14 + $0x60] sm:$0xff]  }
  0xbb   : > { %1076 = vmatprep.subr.bf16.mxu1 %v3918_v51  ;;  %1278 = vmatpush1.bf16.msra.mxu0 %v3951_v47  ;;  %v3898_v51 = vcombine.high %v358_v49, %v362_v50  ;;  %v4488_v47 = vld [vmem:[#allocation8 + $0x180] ss:$8 sps:$4 sm:$0xff]  }
  0xbc   : > { %3006 = vmatprep.subr.bf16.mxu0 %v4466_v53  ;;  %v4496_v53 = vld [vmem:[#allocation8 + $0x1a4] ss:$8 sps:$4 sm:$0xff]  }
  0xbe   : > { %1077 = vmatpush1.bf16.msra.mxu1 %v3917_v52  ;;  %1296 = vmatmul.mubr.bf16.vlgmr.msra.gmra.mrb[0].mxu0 %v5148_v37  ;;  %v4464_v52 = vld [vmem:[#allocation8 + $0x100] ss:$8 sps:$4 sm:$0xff]  }
  0xbf   : > { %1078 = vmatprep.subr.bf16.mxu1 %v3926_v56  ;;  %1305 = vmatprep.mubr.bf16.mxu0 %v6309_v0  ;;  %v4467_v56 = vld [vmem:[#allocation8 + $0x110] ss:$8 sps:$4 sm:$0xff]  }
  0xc0   : > { %3007 = vmatpush1.bf16.msra.mxu0 %v4464_v52  ;;  %v4494_v52 = vld [vmem:[#allocation8 + $0x1a0] ss:$8 sps:$4 sm:$0xff]  }
  0xc1   : > { %930 = vmatmul.mubr.bf16.gmra.mrb[8].mxu1 %v5158_v55 }
  0xc2   : > { %939 = vmatprep.mubr.bf16.mxu1 %v6309_v0  ;;  %1079 = vmatpush1.bf16.msra.mxu1 %v3925_v57  ;;  %v4469_v57 = vld [vmem:[#allocation8 + $0x114] ss:$8 sps:$4 sm:$0xff]  }
  0xc3   : > { %1080 = vmatprep.subr.bf16.mxu1 %v3934_v60  ;;  %3008 = vmatprep.subr.bf16.mxu0 %v4469_v57  ;;  %v4472_v60 = vld [vmem:[#allocation8 + $0x124] ss:$8 sps:$4 sm:$0xff]   ;;  %v4499_v57 = vld [vmem:[#allocation8 + $0x1b4] ss:$8 sps:$4 sm:$0xff]  }
  0xc4   : > { %3009 = vmatpush1.bf16.msra.mxu0 %v4467_v56  ;;  %v4497_v56 = vld [vmem:[#allocation8 + $0x1b0] ss:$8 sps:$4 sm:$0xff]  }
  0xc5   : > { %3010 = vmatprep.subr.bf16.mxu0 %v4472_v60  ;;  %v4500_v60 = vld [vmem:[#allocation8 + $0x1c0] ss:$8 sps:$4 sm:$0xff]  }
  0xc6   : > { %1081 = vmatpush1.bf16.msra.mxu1 %v3933_v61  ;;  %1306 = vmatmul.mubr.bf16.gmra.mrb[4].mxu0 %v5153_v46  ;;  %v5230_v61 = vld [vmem:[%s5131_s14 + $0x78] sm:$0xff]  }
  0xc7   : > { %1082 = vmatprep.subr.bf16.mxu1 %v3942_v2  ;;  %1315 = vmatprep.mubr.bf16.mxu0 %v6309_v0  ;;  %v4473_v2 = vld [vmem:[#allocation8 + $0x130] ss:$8 sps:$4 sm:$0xff]  }
  0xc8   : > { %3011 = vmatpush1.bf16.msra.mxu0 %v4470_v59  ;;  %v4505_v59 = vld [vmem:[#allocation8 + $0x4] ss:$8 sps:$4 sm:$0xff]  }
  0xc9   : > { %940 = vmatmul.mubr.bf16.gmra.mrb[12].mxu1 %v5163_v1 }
  0xca   : > { %949 = vmatprep.mubr.bf16.mxu1 %v6309_v0  ;;  %1083 = vmatpush1.bf16.msra.mxu1 %v3941_v3  ;;  %v4475_v3 = vld [vmem:[#allocation8 + $0x134] ss:$8 sps:$4 sm:$0xff]  }
  0xcb   : > { %1084 = vmatprep.subr.bf16.mxu1 %v3950_v4  ;;  %v3897_v4 = vcombine.low %v358_v49, %v362_v50  ;;  %3012 = vmatprep.subr.bf16.mxu0 %v4475_v3  ;;  %v4490_v49 = vld [vmem:[#allocation8 + $0x184] ss:$8 sps:$4 sm:$0xff]   ;;  %v4491_v50 = vld [vmem:[#allocation8 + $0x190] ss:$8 sps:$4 sm:$0xff]  }
  0xcc   : > { %3013 = vmatpush1.bf16.msra.mxu0 %v4473_v2  ;;  %v4509_v2 = vld [vmem:[#allocation8 + $0x1d0] ss:$8 sps:$4 sm:$0xff]  }
  0xcd   : > { %3014 = vmatprep.subr.bf16.mxu0 %v4478_v18 }
  0xce   : > { %1085 = vmatpush1.bf16.msra.mxu1 %v3949_v5  ;;  %1316 = vmatmul.mubr.bf16.gmra.mrb[8].mxu0 %v5158_v55  ;;  %v3906_v5 = vcombine.high %v366_v62, %v370_v63  ;;  %v4502_v62 = vld [vmem:[#allocation8 + $0x1c4] ss:$8 sps:$4 sm:$0xff]  }
  0xcf   : > { %1456 = vmatprep.subr.bf16.mxu1 %v3898_v51  ;;  %1325 = vmatprep.mubr.bf16.mxu0 %v6309_v0  ;;  %v4493_v51 = vld [vmem:[#allocation8 + $0x194] ss:$8 sps:$4 sm:$0xff]  }
  0xd0   : > { %3015 = vmatpush1.bf16.msra.mxu0 %v4476_v17 }
  0xd1   : > { %950 = vmatmul.mubr.bf16.gmra.mrb[16].mxu1 %v5168_v6  ;;  %3016 = vmatprep.subr.bf16.mxu0 %v4481_v28 }
  0xd2   : > { %959 = vmatprep.mubr.bf16.mxu1 %v6309_v0 }
  0xd4   : > { %3017 = vmatpush1.bf16.msra.mxu0 %v4479_v27 }
  0xd5   : > { %3018 = vmatprep.subr.bf16.mxu0 %v4484_v39 }
  0xd6   : > { %1326 = vmatmul.mubr.bf16.gmra.mrb[12].mxu0 %v5163_v1 }
  0xd7   : > { %1335 = vmatprep.mubr.bf16.mxu0 %v6309_v0 }
  0xd8   : > { %3019 = vmatpush1.bf16.msra.mxu0 %v4482_v38 }
  0xd9   : > { %960 = vmatmul.mubr.bf16.gmra.mrb[20].mxu1 %v5173_v7  ;;  %3020 = vmatprep.subr.bf16.mxu0 %v4487_v45  ;;  %v4538_v45 = vld [vmem:[#allocation8 + $0x204] ss:$8 sps:$4 sm:$0xff]  }
  0xda   : > { %969 = vmatprep.mubr.bf16.mxu1 %v6309_v0 }
  0xdc   : > { %3021 = vmatpush1.bf16.msra.mxu0 %v4485_v44 }
  0xdd   : > { %3022 = vmatprep.subr.bf16.mxu0 %v4490_v49 }
  0xde   : > { %1336 = vmatmul.mubr.bf16.gmra.mrb[16].mxu0 %v5168_v6 }
  0xdf   : > { %1345 = vmatprep.mubr.bf16.mxu0 %v6309_v0 }
  0xe0   : > { %3023 = vmatpush1.bf16.msra.mxu0 %v4488_v47 }
  0xe1   : > { %970 = vmatmul.mubr.bf16.gmra.mrb[24].mxu1 %v5178_v8  ;;  %3024 = vmatprep.subr.bf16.mxu0 %v4493_v51 }
  0xe2   : > { %979 = vmatprep.mubr.bf16.mxu1 %v6309_v0 }
  0xe4   : > { %3025 = vmatpush1.bf16.msra.mxu0 %v4491_v50 }
  0xe5   : > { %3026 = vmatprep.subr.bf16.mxu0 %v4496_v53 }
  0xe6   : > { %1346 = vmatmul.mubr.bf16.gmra.mrb[20].mxu0 %v5173_v7 }
  0xe7   : > { %1355 = vmatprep.mubr.bf16.mxu0 %v6309_v0 }
  0xe8   : > { %3027 = vmatpush1.bf16.msra.mxu0 %v4494_v52 }
  0xe9   : > { %980 = vmatmul.mubr.bf16.gmra.mrb[28].mxu1 %v5183_v9  ;;  %3028 = vmatprep.subr.bf16.mxu0 %v4499_v57 }
  0xea   : > { %989 = vmatprep.mubr.bf16.mxu1 %v6309_v0 }
  0xec   : > { %3029 = vmatpush1.bf16.msra.mxu0 %v4497_v56 }
  0xed   : > { %3030 = vmatprep.subr.bf16.mxu0 %v4502_v62 }
  0xee   : > { %1356 = vmatmul.mubr.bf16.gmra.mrb[24].mxu0 %v5178_v8 }
  0xef   : > { %1365 = vmatprep.mubr.bf16.mxu0 %v6309_v0 }
  0xf0   : > { %3031 = vmatpush1.bf16.msra.mxu0 %v4500_v60 }
  0xf1   : > { %990 = vmatmul.mubr.bf16.gmra.mrb[32].mxu1 %v5188_v14 }
  0xf2   : > { %999 = vmatprep.mubr.bf16.mxu1 %v6309_v0 }
  0xf6   : > { %1366 = vmatmul.mubr.bf16.gmra.mrb[28].mxu0 %v5183_v9 }
  0xf7   : > { %1375 = vmatprep.mubr.bf16.mxu0 %v6309_v0 }
  0xf9   : > { %1000 = vmatmul.mubr.bf16.gmra.mrb[36].mxu1 %v5193_v23 }
  0xfa   : > { %1009 = vmatprep.mubr.bf16.mxu1 %v6309_v0 }
  0xfe   : > { %1376 = vmatmul.mubr.bf16.gmra.mrb[32].mxu0 %v5188_v14 }
  0xff   : > { %1385 = vmatprep.mubr.bf16.mxu0 %v6309_v0 }
 0x101   : > { %1010 = vmatmul.mubr.bf16.gmra.mrb[40].mxu1 %v5198_v32 }
 0x102   : > { %1019 = vmatprep.mubr.bf16.mxu1 %v6309_v0 }
 0x106   : > { %1386 = vmatmul.mubr.bf16.gmra.mrb[36].mxu0 %v5193_v23 }
 0x107   : > { %1395 = vmatprep.mubr.bf16.mxu0 %v6309_v0 }
 0x109   : > { %1020 = vmatmul.mubr.bf16.gmra.mrb[44].mxu1 %v5203_v42 }
 0x10a   : > { %1029 = vmatprep.mubr.bf16.mxu1 %v6309_v0 }
 0x10e   : > { %1396 = vmatmul.mubr.bf16.gmra.mrb[40].mxu0 %v5198_v32 }
 0x10f   : > { %1405 = vmatprep.mubr.bf16.mxu0 %v6309_v0 }
 0x111   : > { %1030 = vmatmul.mubr.bf16.gmra.mrb[48].mxu1 %v5209_v48 }
 0x112   : > { %1039 = vmatprep.mubr.bf16.mxu1 %v6309_v0 }
 0x116   : > { %1406 = vmatmul.mubr.bf16.gmra.mrb[44].mxu0 %v5203_v42 }
 0x117   : > { %1415 = vmatprep.mubr.bf16.mxu0 %v6309_v0 }
 0x119   : > { %1040 = vmatmul.mubr.bf16.gmra.mrb[52].mxu1 %v5216_v54 }
 0x11a   : > { %1049 = vmatprep.mubr.bf16.mxu1 %v6309_v0 }
 0x11e   : > { %1416 = vmatmul.mubr.bf16.gmra.mrb[48].mxu0 %v5209_v48 }
 0x11f   : > { %1425 = vmatprep.mubr.bf16.mxu0 %v6309_v0 }
 0x121   : > { %1050 = vmatmul.mubr.bf16.gmra.mrb[56].mxu1 %v5223_v58 }
 0x122   : > { %1059 = vmatprep.mubr.bf16.mxu1 %v6309_v0 }
 0x126   : > { %1426 = vmatmul.mubr.bf16.gmra.mrb[52].mxu0 %v5216_v54 }
 0x127   : > { %1435 = vmatprep.mubr.bf16.mxu0 %v6309_v0 }
 0x129   : > { %1060 = vmatmul.mubr.bf16.gmra.mrb[60].mxu1 %v5230_v61 }
 0x12a   : > { %1102 = vmatprep.mubr.bf16.mxu1 %v6309_v0 }
 0x12e   : > { %1436 = vmatmul.mubr.bf16.gmra.mrb[56].mxu0 %v5223_v58 }
 0x12f   : > { %1445 = vmatprep.mubr.bf16.mxu0 %v6309_v0 }
 0x131   : > { %1103 = vmatmul.mubr.bf16.vlgmr.msra.gmra.mrb[64].mxu1 %v5148_v37  ;;  %v390_v37 = vld [vmem:[#allocation5 + $0x118] sm:$0xff] }
 0x132   : > { %1112 = vmatprep.mubr.bf16.mxu1 %v6309_v0  ;;  %1457 = vmatpush1.bf16.msra.mxu1 %v3897_v4  ;;  %v3930_v24 = vcombine.high %v390_v37, %v394_v21  ;;  %v3929_v29 = vcombine.low %v390_v37, %v394_v21  ;;  %v5280_v4 = vld [vmem:[#allocation7] sm:$0xff] }
 0x133   : > { %1458 = vmatprep.subr.bf16.mxu1 %v3906_v5 }
 0x136   : > { %1459 = vmatpush1.bf16.msra.mxu1 %v3905_v12  ;;  %v4518_v12 = vld [vmem:[#allocation8 + $0x1e0] ss:$8 sps:$4 sm:$0xff]   ;;  %1446 = vmatmul.mubr.bf16.gmra.mrb[60].mxu0 %v5230_v61 }
 0x137   : > { %1460 = vmatprep.subr.bf16.mxu1 %v3914_v13  ;;  %v4520_v13 = vld [vmem:[#allocation8 + $0x1e4] ss:$8 sps:$4 sm:$0xff]  }
 0x139   : > { %1113 = vmatmul.mubr.bf16.gmra.mrb[68].mxu1 %v5153_v46  ;;  %v406_v46 = vld [vmem:[#allocation5 + $0x198] sm:$0xff] }
 0x13a   : > { %1122 = vmatprep.mubr.bf16.mxu1 %v6309_v0  ;;  %1461 = vmatpush1.bf16.msra.mxu1 %v3913_v19  ;;  %v3946_v34 = vcombine.high %v406_v46, %v410_v31  ;;  %v3945_v40 = vcombine.low %v406_v46, %v410_v31 }
 0x13b   : > { %1462 = vmatprep.subr.bf16.mxu1 %v3922_v20 }
 0x13e   : > { %1463 = vmatpush1.bf16.msra.mxu1 %v3921_v22  ;;  %v4529_v22 = vld [vmem:[#allocation8 + $0x1f4] ss:$8 sps:$4 sm:$0xff]  }
 0x13f   : > { %1464 = vmatprep.subr.bf16.mxu1 %v3930_v24 }
 0x141   : > { %1123 = vmatmul.mubr.bf16.gmra.mrb[72].mxu1 %v5158_v55 }
 0x142   : > { %1132 = vmatprep.mubr.bf16.mxu1 %v6309_v0  ;;  %1465 = vmatpush1.bf16.msra.mxu1 %v3929_v29 }
 0x143   : > { %1466 = vmatprep.subr.bf16.mxu1 %v3938_v30 }
 0x146   : > { %1467 = vmatpush1.bf16.msra.mxu1 %v3937_v33 }
 0x147   : > { %1468 = vmatprep.subr.bf16.mxu1 %v3946_v34 }
 0x149   : > { %1133 = vmatmul.mubr.bf16.gmra.mrb[76].mxu1 %v5163_v1 }
 0x14a   : > { %1142 = vmatprep.mubr.bf16.mxu1 %v6309_v0  ;;  %1469 = vmatpush1.bf16.msra.mxu1 %v3945_v40 }
 0x14b   : > { %1470 = vmatprep.subr.bf16.mxu1 %v3954_v41 }
 0x14e   : > { %1471 = vmatpush1.bf16.msra.mxu1 %v3953_v43 }
 0x14f   : > { %2813 = vmatprep.subr.bf16.mxu1 %v4505_v59 }
 0x151   : > { %1143 = vmatmul.mubr.bf16.gmra.mrb[80].mxu1 %v5168_v6 }
 0x152   : > { %1152 = vmatprep.mubr.bf16.mxu1 %v6309_v0 }
 0x159   : > { %1153 = vmatmul.mubr.bf16.gmra.mrb[84].mxu1 %v5173_v7 }
 0x15a   : > { %1162 = vmatprep.mubr.bf16.mxu1 %v6309_v0 }
 0x161   : > { %1163 = vmatmul.mubr.bf16.gmra.mrb[88].mxu1 %v5178_v8 }
 0x162   : > { %1172 = vmatprep.mubr.bf16.mxu1 %v6309_v0 }
 0x169   : > { %1173 = vmatmul.mubr.bf16.gmra.mrb[92].mxu1 %v5183_v9  ;;  %v421_v9 = vlaneseq }
 0x16a   : > { %1182 = vmatprep.mubr.bf16.mxu1 %v6309_v0 }
 0x16b   : > { %v5274_v63 = vshrl.u32 %v421_v9, 7 }
 0x16d   : > { %v6308_v3 = vsub.s32 0, %v5274_v63  ;;  %v6307_v5 = vsub.s32 1, %v5274_v63 }
 0x16f   : > { %v5292_v10 = vrot.slane %v5280_v4, %v6307_v5 }
 0x171   : > { %1183 = vmatmul.mubr.bf16.gmra.mrb[96].mxu1 %v5188_v14  ;;  %v4511_v14 = vld [vmem:[#allocation8 + $0x1d4] ss:$8 sps:$4 sm:$0xff]  }
 0x172   : > { %1192 = vmatprep.mubr.bf16.mxu1 %v6309_v0  ;;  %3032 = vmatprep.subr.bf16.mxu0 %v4511_v14 }
 0x173   : > { %3033 = vmatpush1.bf16.msra.mxu0 %v4509_v2 }
 0x174   : > { %3034 = vmatprep.subr.bf16.mxu0 %v4520_v13 }
 0x177   : > { %3035 = vmatpush1.bf16.msra.mxu0 %v4518_v12 }
 0x178   : > { %3036 = vmatprep.subr.bf16.mxu0 %v4529_v22 }
 0x179   : > { %1193 = vmatmul.mubr.bf16.gmra.mrb[100].mxu1 %v5193_v23  ;;  %v5287_v23 = vrot.slane %v5280_v4, %v6308_v3 }
 0x17a   : > { %1202 = vmatprep.mubr.bf16.mxu1 %v6309_v0 }
 0x17b   : > { %3037 = vmatpush1.bf16.msra.mxu0 %v4527_v26 }
 0x17c   : > { %3199 = vmatprep.subr.bf16.mxu0 %v4538_v45  ;;  %v4503_v45 = vld [vmem:[#allocation8] ss:$8 sps:$4 sm:$0xff]  }
 0x181   : > { %1203 = vmatmul.mubr.bf16.gmra.mrb[104].mxu1 %v5198_v32 }
 0x182   : > { %1212 = vmatprep.mubr.bf16.mxu1 %v6309_v0 }
 0x184   : > { %v911_v11 = vpop.f32.mrb[0].mxu1 }
 0x185   : > { %v912_v15 = vadd.f32 %v911_v11, %v5287_v23  ;;  %v913_v32 = vpop.f32.mrb[1].mxu1 }
 0x186   : > { %v914_v16 = vadd.f32 %v913_v32, %v5292_v10  ;;  %v915_v17 = vpop.f32.mrb[2].mxu1 }
 0x187   : > { %v916_v18 = vadd.f32 %v915_v17, %v5287_v23  ;;  %v917_v19 = vpop.f32.mrb[3].mxu1  ;;  %v1649_v37 = vmax.f32 %v912_v15, 0.0 }
 0x188   : > { %v918_v20 = vadd.f32 %v917_v19, %v5292_v10  ;;  %v1650_v24 = vmax.f32 %v914_v16, 0.0 }
 0x189   : > { %v1657_v21 = vmax.f32 %v916_v18, 0.0  ;;  %1213 = vmatmul.mubr.bf16.gmra.mrb[108].mxu1 %v5203_v42 }
 0x18a   : > { %v1658_v25 = vmax.f32 %v918_v20, 0.0  ;;  %1222 = vmatprep.mubr.bf16.mxu1 %v6309_v0 }
 0x18b   : > { %v5302_v27 = vpack.c.bf16 %v1657_v21, %v1649_v37 }
 0x18c   : > { %v5304_v28 = vpack.c.bf16 %v1658_v25, %v1650_v24  ;;  %v921_v29 = vpop.f32.mrb[4].mxu1 }
 0x18d   : > { %v922_v30 = vadd.f32 %v921_v29, %v5287_v23  ;;  %v923_v46 = vpop.f32.mrb[5].mxu1 }
 0x18e   : > { %v924_v31 = vadd.f32 %v923_v46, %v5292_v10  ;;  %v925_v33 = vpop.f32.mrb[6].mxu1 }
 0x18f   : > { %v926_v42 = vadd.f32 %v925_v33, %v5287_v23  ;;  %v927_v34 = vpop.f32.mrb[7].mxu1  ;;  %v1665_v36 = vmax.f32 %v922_v30, 0.0 }
 0x190   : > { %v928_v35 = vadd.f32 %v927_v34, %v5292_v10  ;;  %v1666_v39 = vmax.f32 %v924_v31, 0.0 }
 0x191   : > { %v1673_v38 = vmax.f32 %v926_v42, 0.0  ;;  %1223 = vmatmul.mubr.bf16.gmra.mrb[112].mxu1 %v5209_v48 }
 0x192   : > { %v1674_v40 = vmax.f32 %v928_v35, 0.0  ;;  %1232 = vmatprep.mubr.bf16.mxu1 %v6309_v0 }
 0x193   : > { %v5312_v41 = vpack.c.bf16 %v1673_v38, %v1665_v36 }
 0x194   : > { %v5314_v43 = vpack.c.bf16 %v1674_v40, %v1666_v39  ;;  %v931_v44 = vpop.f32.mrb[8].mxu1 }
 0x195   : > { %v932_v47 = vadd.f32 %v931_v44, %v5287_v23  ;;  %v933_v49 = vpop.f32.mrb[9].mxu1 }
 0x196   : > { %v934_v50 = vadd.f32 %v933_v49, %v5292_v10  ;;  %v935_v51 = vpop.f32.mrb[10].mxu1  ;;  %v4508_v49 = vld [vmem:[#allocation8 + $0x14] ss:$8 sps:$4 sm:$0xff]  }
 0x197   : > { %v936_v52 = vadd.f32 %v935_v51, %v5287_v23  ;;  %v937_v48 = vpop.f32.mrb[11].mxu1  ;;  %v1681_v56 = vmax.f32 %v932_v47, 0.0 }
 0x198   : > { %v938_v53 = vadd.f32 %v937_v48, %v5292_v10  ;;  %v1682_v59 = vmax.f32 %v934_v50, 0.0  ;;  %v4656_v48 = vld [vmem:[%s5131_s14] sm:$0xff]  }
 0x199   : > { %v1689_v57 = vmax.f32 %v936_v52, 0.0  ;;  %1233 = vmatmul.mubr.bf16.gmra.mrb[116].mxu1 %v5216_v54 }
 0x19a   : > { %v1690_v60 = vmax.f32 %v938_v53, 0.0  ;;  %1242 = vmatprep.mubr.bf16.mxu1 %v6309_v0 }
 0x19b   : > { %v5322_v62 = vpack.c.bf16 %v1689_v57, %v1681_v56  ;;  %v4506_v57 = vld [vmem:[#allocation8 + $0x10] ss:$8 sps:$4 sm:$0xff]  }
 0x19c   : > { %v5324_v9 = vpack.c.bf16 %v1690_v60, %v1682_v59  ;;  %v941_v2 = vpop.f32.mrb[12].mxu1  ;;  %v4514_v60 = vld [vmem:[#allocation8 + $0x24] ss:$8 sps:$4 sm:$0xff]  }
 0x19d   : > { %v942_v14 = vadd.f32 %v941_v2, %v5287_v23  ;;  %v943_v11 = vpop.f32.mrb[13].mxu1 }
 0x19e   : > { %v944_v12 = vadd.f32 %v943_v11, %v5292_v10  ;;  %v945_v13 = vpop.f32.mrb[14].mxu1 }
 0x19f   : > { %v946_v15 = vadd.f32 %v945_v13, %v5287_v23  ;;  %v947_v32 = vpop.f32.mrb[15].mxu1  ;;  %v1697_v16 = vmax.f32 %v942_v14, 0.0 }
 0x1a0   : > { %v948_v54 = vadd.f32 %v947_v32, %v5292_v10  ;;  %v1698_v18 = vmax.f32 %v944_v12, 0.0  ;;  %v4512_v32 = vld [vmem:[#allocation8 + $0x20] ss:$8 sps:$4 sm:$0xff]  }
 0x1a1   : > { %v1705_v17 = vmax.f32 %v946_v15, 0.0  ;;  %1243 = vmatmul.mubr.bf16.gmra.mrb[120].mxu1 %v5223_v58 }
 0x1a2   : > { %v1706_v19 = vmax.f32 %v948_v54, 0.0  ;;  %1252 = vmatprep.mubr.bf16.mxu1 %v6309_v0 }
 0x1a3   : > { %v5332_v20 = vpack.c.bf16 %v1705_v17, %v1697_v16  ;;  %v4517_v17 = vld [vmem:[#allocation8 + $0x34] ss:$8 sps:$4 sm:$0xff]  }
 0x1a4   : > { %v5334_v37 = vpack.c.bf16 %v1706_v19, %v1698_v18  ;;  %v951_v21 = vpop.f32.mrb[16].mxu1 }
 0x1a5   : > { %v952_v22 = vadd.f32 %v951_v21, %v5287_v23  ;;  %v953_v24 = vpop.f32.mrb[17].mxu1 }
 0x1a6   : > { %v954_v25 = vadd.f32 %v953_v24, %v5292_v10  ;;  %v955_v26 = vpop.f32.mrb[18].mxu1 }
 0x1a7   : > { %v956_v29 = vadd.f32 %v955_v26, %v5287_v23  ;;  %v957_v30 = vpop.f32.mrb[19].mxu1  ;;  %v1713_v46 = vmax.f32 %v952_v22, 0.0  ;;  %v4657_v22 = vld [vmem:[%s5131_s14 + $0x8] sm:$0xff]   ;;  %v4515_v26 = vld [vmem:[#allocation8 + $0x30] ss:$8 sps:$4 sm:$0xff]  }
 0x1a8   : > { %v958_v58 = vadd.f32 %v957_v30, %v5292_v10  ;;  %v1714_v33 = vmax.f32 %v954_v25, 0.0  ;;  %v4523_v30 = vld [vmem:[#allocation8 + $0x44] ss:$8 sps:$4 sm:$0xff]  }
 0x1a9   : > { %v1721_v31 = vmax.f32 %v956_v29, 0.0  ;;  %1253 = vmatmul.mubr.bf16.gmra.mrb[124].mxu1 %v5230_v61 }
 0x1aa   : > { %v1722_v42 = vmax.f32 %v958_v58, 0.0  ;;  %1488 = vmatprep.mubr.bf16.mxu1 %v6309_v0 }
 0x1ab   : > { %v5342_v34 = vpack.c.bf16 %v1721_v31, %v1713_v46 }
 0x1ac   : > { %v5344_v35 = vpack.c.bf16 %v1722_v42, %v1714_v33  ;;  %v961_v36 = vpop.f32.mrb[20].mxu1 }
 0x1ad   : > { %v962_v38 = vadd.f32 %v961_v36, %v5287_v23  ;;  %v963_v39 = vpop.f32.mrb[21].mxu1 }
 0x1ae   : > { %v964_v40 = vadd.f32 %v963_v39, %v5292_v10  ;;  %v965_v44 = vpop.f32.mrb[22].mxu1 }
 0x1af   : > { %v966_v47 = vadd.f32 %v965_v44, %v5287_v23  ;;  %v967_v61 = vpop.f32.mrb[23].mxu1  ;;  %v1729_v51 = vmax.f32 %v962_v38, 0.0  ;;  %v4521_v38 = vld [vmem:[#allocation8 + $0x40] ss:$8 sps:$4 sm:$0xff]   ;;  %v4526_v44 = vld [vmem:[#allocation8 + $0x54] ss:$8 sps:$4 sm:$0xff]  }
 0x1b0   : > { %v968_v50 = vadd.f32 %v967_v61, %v5292_v10  ;;  %v1730_v53 = vmax.f32 %v964_v40, 0.0 }
 0x1b1   : > { %v1737_v52 = vmax.f32 %v966_v47, 0.0  ;;  %1489 = vmatmul.mubr.bf16.vlgmr.msra.gmra.mrb[128].mxu1 %v4656_v48  ;;  %v4532_v48 = vld [vmem:[#allocation8 + $0x64] ss:$8 sps:$4 sm:$0xff]  }
 0x1b2   : > { %v1738_v56 = vmax.f32 %v968_v50, 0.0  ;;  %1498 = vmatprep.mubr.bf16.mxu1 %v6309_v0  ;;  %2814 = vmatpush1.bf16.msra.mxu1 %v4503_v45 }
 0x1b3   : > { %v5352_v59 = vpack.c.bf16 %v1737_v52, %v1729_v51  ;;  %2815 = vmatprep.subr.bf16.mxu1 %v4508_v49  ;;  %v4524_v51 = vld [vmem:[#allocation8 + $0x50] ss:$8 sps:$4 sm:$0xff]  }
 0x1b4   : > { %v5354_v2 = vpack.c.bf16 %v1738_v56, %v1730_v53  ;;  %v971_v14 = vpop.f32.mrb[24].mxu1 }
 0x1b5   : > { %v972_v11 = vadd.f32 %v971_v14, %v5287_v23  ;;  %v973_v12 = vpop.f32.mrb[25].mxu1 }
 0x1b6   : > { %v974_v13 = vadd.f32 %v973_v12, %v5292_v10  ;;  %v975_v15 = vpop.f32.mrb[26].mxu1  ;;  %2816 = vmatpush1.bf16.msra.mxu1 %v4506_v57 }
 0x1b7   : > { %v976_v54 = vadd.f32 %v975_v15, %v5287_v23  ;;  %v977_v16 = vpop.f32.mrb[27].mxu1  ;;  %2817 = vmatprep.subr.bf16.mxu1 %v4514_v60  ;;  %v1745_v19 = vmax.f32 %v972_v11, 0.0  ;;  %v4535_v15 = vld [vmem:[#allocation8 + $0x74] ss:$8 sps:$4 sm:$0xff]  }
 0x1b8   : > { %v978_v18 = vadd.f32 %v977_v16, %v5292_v10  ;;  %v1746_v24 = vmax.f32 %v974_v13, 0.0 }
 0x1b9   : > { %v1753_v21 = vmax.f32 %v976_v54, 0.0  ;;  %1499 = vmatmul.mubr.bf16.gmra.mrb[132].mxu1 %v4657_v22  ;;  %v4541_v22 = vld [vmem:[#allocation8 + $0x84] ss:$8 sps:$4 sm:$0xff]  }
 0x1ba   : > { %v1754_v25 = vmax.f32 %v978_v18, 0.0  ;;  %1508 = vmatprep.mubr.bf16.mxu1 %v6309_v0  ;;  %2818 = vmatpush1.bf16.msra.mxu1 %v4512_v32 }
 0x1bb   : > { %v5362_v29 = vpack.c.bf16 %v1753_v21, %v1745_v19  ;;  %2819 = vmatprep.subr.bf16.mxu1 %v4517_v17  ;;  %v4533_v19 = vld [vmem:[#allocation8 + $0x70] ss:$8 sps:$4 sm:$0xff]  }
 0x1bc   : > { %v5364_v58 = vpack.c.bf16 %v1754_v25, %v1746_v24  ;;  %v981_v46 = vpop.f32.mrb[28].mxu1 }
 0x1bd   : > { %v982_v31 = vadd.f32 %v981_v46, %v5287_v23  ;;  %v983_v33 = vpop.f32.mrb[29].mxu1 }
 0x1be   : > { %v984_v42 = vadd.f32 %v983_v33, %v5292_v10  ;;  %v985_v36 = vpop.f32.mrb[30].mxu1  ;;  %2820 = vmatpush1.bf16.msra.mxu1 %v4515_v26 }
 0x1bf   : > { %v986_v39 = vadd.f32 %v985_v36, %v5287_v23  ;;  %v987_v40 = vpop.f32.mrb[31].mxu1  ;;  %2821 = vmatprep.subr.bf16.mxu1 %v4523_v30  ;;  %v1761_v47 = vmax.f32 %v982_v31, 0.0  ;;  %v4544_v36 = vld [vmem:[#allocation8 + $0x94] ss:$8 sps:$4 sm:$0xff]  }
 0x1c0   : > { %v988_v45 = vadd.f32 %v987_v40, %v5292_v10  ;;  %v1762_v49 = vmax.f32 %v984_v42, 0.0 }
 0x1c1   : > { %v1769_v61 = vmax.f32 %v986_v39, 0.0  ;;  %1509 = vmatmul.mubr.bf16.gmra.mrb[136].mxu1 %v5158_v55  ;;  %v4530_v55 = vld [vmem:[#allocation8 + $0x60] ss:$8 sps:$4 sm:$0xff]  }
 0x1c2   : > { %v1770_v50 = vmax.f32 %v988_v45, 0.0  ;;  %1518 = vmatprep.mubr.bf16.mxu1 %v6309_v0  ;;  %2822 = vmatpush1.bf16.msra.mxu1 %v4521_v38 }
 0x1c3   : > { %v5372_v52 = vpack.c.bf16 %v1769_v61, %v1761_v47  ;;  %2823 = vmatprep.subr.bf16.mxu1 %v4526_v44  ;;  %v4542_v47 = vld [vmem:[#allocation8 + $0x90] ss:$8 sps:$4 sm:$0xff]  }
 0x1c4   : > { %v5374_v53 = vpack.c.bf16 %v1770_v50, %v1762_v49  ;;  %v991_v56 = vpop.f32.mrb[32].mxu1  ;;  %v4550_v49 = vld [vmem:[#allocation8 + $0xa4] ss:$8 sps:$4 sm:$0xff]  }
 0x1c5   : > { %v992_v57 = vadd.f32 %v991_v56, %v5287_v23  ;;  %v993_v60 = vpop.f32.mrb[33].mxu1 }
 0x1c6   : > { %v994_v14 = vadd.f32 %v993_v60, %v5292_v10  ;;  %v995_v11 = vpop.f32.mrb[34].mxu1  ;;  %2824 = vmatpush1.bf16.msra.mxu1 %v4524_v51 }
 0x1c7   : > { %v996_v12 = vadd.f32 %v995_v11, %v5287_v23  ;;  %v997_v13 = vpop.f32.mrb[35].mxu1  ;;  %2825 = vmatprep.subr.bf16.mxu1 %v4532_v48  ;;  %v1777_v54 = vmax.f32 %v992_v57, 0.0 }
 0x1c8   : > { %v998_v32 = vadd.f32 %v997_v13, %v5292_v10  ;;  %v1778_v17 = vmax.f32 %v994_v14, 0.0 }
 0x1c9   : > { %v1785_v16 = vmax.f32 %v996_v12, 0.0  ;;  %1519 = vmatmul.mubr.bf16.gmra.mrb[140].mxu1 %v5163_v1  ;;  %v4539_v1 = vld [vmem:[#allocation8 + $0x80] ss:$8 sps:$4 sm:$0xff]  }
 0x1ca   : > { %v1786_v18 = vmax.f32 %v998_v32, 0.0  ;;  %1528 = vmatprep.mubr.bf16.mxu1 %v6309_v0  ;;  %2826 = vmatpush1.bf16.msra.mxu1 %v4530_v55  ;;  %v4553_v55 = vld [vmem:[#allocation8 + $0xb4] ss:$8 sps:$4 sm:$0xff]  }
 0x1cb   : > { %v5382_v21 = vpack.c.bf16 %v1785_v16, %v1777_v54  ;;  %2827 = vmatprep.subr.bf16.mxu1 %v4535_v15  ;;  %v4551_v16 = vld [vmem:[#allocation8 + $0xb0] ss:$8 sps:$4 sm:$0xff]  }
 0x1cc   : > { %v5384_v24 = vpack.c.bf16 %v1786_v18, %v1778_v17  ;;  %v1001_v25 = vpop.f32.mrb[36].mxu1  ;;  %v4559_v18 = vld [vmem:[#allocation8 + $0xc4] ss:$8 sps:$4 sm:$0xff]  }
 0x1cd   : > { %v1002_v26 = vadd.f32 %v1001_v25, %v5287_v23  ;;  %v1003_v30 = vpop.f32.mrb[37].mxu1 }
 0x1ce   : > { %v1004_v46 = vadd.f32 %v1003_v30, %v5292_v10  ;;  %v1005_v31 = vpop.f32.mrb[38].mxu1  ;;  %2828 = vmatpush1.bf16.msra.mxu1 %v4533_v19 }
 0x1cf   : > { %v1006_v33 = vadd.f32 %v1005_v31, %v5287_v23  ;;  %v1007_v42 = vpop.f32.mrb[39].mxu1  ;;  %2829 = vmatprep.subr.bf16.mxu1 %v4541_v22  ;;  %v1793_v39 = vmax.f32 %v1002_v26, 0.0 }
 0x1d0   : > { %v1008_v38 = vadd.f32 %v1007_v42, %v5292_v10  ;;  %v1794_v44 = vmax.f32 %v1004_v46, 0.0  ;;  %v439_v42 = vsub.s32 4, %v5274_v63 }
 0x1d1   : > { %v1801_v40 = vmax.f32 %v1006_v33, 0.0  ;;  %1529 = vmatmul.mubr.bf16.gmra.mrb[144].mxu1 %v5168_v6  ;;  %v4548_v6 = vld [vmem:[#allocation8 + $0xa0] ss:$8 sps:$4 sm:$0xff]   ;;  %v4562_v33 = vld [vmem:[#allocation8 + $0xd4] ss:$8 sps:$4 sm:$0xff]  }
 0x1d2   : > { %v1802_v45 = vmax.f32 %v1008_v38, 0.0  ;;  %1538 = vmatprep.mubr.bf16.mxu1 %v6309_v0  ;;  %2830 = vmatpush1.bf16.msra.mxu1 %v4539_v1  ;;  %v443_v38 = vsub.s32 5, %v5274_v63 }
 0x1d3   : > { %v5392_v61 = vpack.c.bf16 %v1801_v40, %v1793_v39  ;;  %2831 = vmatprep.subr.bf16.mxu1 %v4544_v36  ;;  %v1297_v36 = vpop.f32.mrb[0].mxu0 }
 0x1d4   : > { %v5394_v50 = vpack.c.bf16 %v1802_v45, %v1794_v44  ;;  %v1011_v51 = vpop.f32.mrb[40].mxu1  ;;  %v1299_v40 = vpop.f32.mrb[1].mxu0 }
 0x1d5   : > { %v1012_v48 = vadd.f32 %v1011_v51, %v5287_v23  ;;  %v1013_v56 = vpop.f32.mrb[41].mxu1  ;;  %v1301_v51 = vpop.f32.mrb[2].mxu0 }
 0x1d6   : > { %v1014_v57 = vadd.f32 %v1013_v56, %v5292_v10  ;;  %v1015_v60 = vpop.f32.mrb[42].mxu1  ;;  %2832 = vmatpush1.bf16.msra.mxu1 %v4542_v47  ;;  %v5414_v47 = vrot.slane %v5280_v4, %v439_v42 }
 0x1d7   : > { %v1016_v14 = vadd.f32 %v1015_v60, %v5287_v23  ;;  %v1017_v11 = vpop.f32.mrb[43].mxu1  ;;  %2833 = vmatprep.subr.bf16.mxu1 %v4550_v49  ;;  %v1809_v13 = vmax.f32 %v1012_v48, 0.0  ;;  %v5417_v49 = vrot.slane %v5280_v4, %v443_v38  ;;  %v1303_v60 = vpop.f32.mrb[3].mxu0 }
 0x1d8   : > { %v1018_v12 = vadd.f32 %v1017_v11, %v5292_v10  ;;  %v1810_v32 = vmax.f32 %v1014_v57, 0.0  ;;  %v4560_v57 = vld [vmem:[#allocation8 + $0xd0] ss:$8 sps:$4 sm:$0xff]   ;;  %v1307_v42 = vpop.f32.mrb[4].mxu0 }
 0x1d9   : > { %v1817_v15 = vmax.f32 %v1016_v14, 0.0  ;;  %1539 = vmatmul.mubr.bf16.gmra.mrb[148].mxu1 %v5173_v7  ;;  %v4557_v7 = vld [vmem:[#allocation8 + $0xc0] ss:$8 sps:$4 sm:$0xff]   ;;  %v4568_v14 = vld [vmem:[#allocation8 + $0xe4] ss:$8 sps:$4 sm:$0xff]   ;;  %v1300_v11 = vadd.f32 %v1299_v40, %v5417_v49 }
 0x1da   : > { %v1818_v54 = vmax.f32 %v1018_v12, 0.0  ;;  %1548 = vmatprep.mubr.bf16.mxu1 %v6309_v0  ;;  %2834 = vmatpush1.bf16.msra.mxu1 %v4548_v6 }
 0x1db   : > { %v5402_v17 = vpack.c.bf16 %v1817_v15, %v1809_v13  ;;  %2835 = vmatprep.subr.bf16.mxu1 %v4553_v55  ;;  %v1302_v55 = vadd.f32 %v1301_v51, %v5414_v47  ;;  %v1304_v15 = vadd.f32 %v1303_v60, %v5417_v49 }
 0x1dc   : > { %v5404_v19 = vpack.c.bf16 %v1818_v54, %v1810_v32  ;;  %v1021_v22 = vpop.f32.mrb[44].mxu1 }
 0x1dd   : > { %v1022_v25 = vadd.f32 %v1021_v22, %v5287_v23  ;;  %v1023_v26 = vpop.f32.mrb[45].mxu1  ;;  %v1661_v22 = vmax.f32 %v1302_v55, 0.0 }
 0x1de   : > { %v1024_v30 = vadd.f32 %v1023_v26, %v5292_v10  ;;  %v1025_v46 = vpop.f32.mrb[46].mxu1  ;;  %2836 = vmatpush1.bf16.msra.mxu1 %v4551_v16 }
 0x1df   : > { %v1026_v31 = vadd.f32 %v1025_v46, %v5287_v23  ;;  %v1027_v1 = vpop.f32.mrb[47].mxu1  ;;  %2837 = vmatprep.subr.bf16.mxu1 %v4559_v18  ;;  %v1825_v44 = vmax.f32 %v1022_v25, 0.0  ;;  %v1654_v18 = vmax.f32 %v1300_v11, 0.0  ;;  %v1662_v46 = vmax.f32 %v1304_v15, 0.0 }
 0x1e0   : > { %v1028_v39 = vadd.f32 %v1027_v1, %v5292_v10  ;;  %v1826_v48 = vmax.f32 %v1024_v30, 0.0  ;;  %v4566_v30 = vld [vmem:[#allocation8 + $0xe0] ss:$8 sps:$4 sm:$0xff]   ;;  %v4571_v1 = vld [vmem:[#allocation8 + $0xf4] ss:$8 sps:$4 sm:$0xff]  }
 0x1e1   : > { %v1833_v45 = vmax.f32 %v1026_v31, 0.0  ;;  %1549 = vmatmul.mubr.bf16.gmra.mrb[152].mxu1 %v5178_v8  ;;  %v1298_v8 = vadd.f32 %v1297_v36, %v5414_v47  ;;  %v5434_v38 = vpack.c.bf16 %v1662_v46, %v1654_v18 }
 0x1e2   : > { %v1834_v56 = vmax.f32 %v1028_v39, 0.0  ;;  %1558 = vmatprep.mubr.bf16.mxu1 %v6309_v0  ;;  %2838 = vmatpush1.bf16.msra.mxu1 %v4557_v7  ;;  %v1309_v39 = vpop.f32.mrb[5].mxu0 }
 0x1e3   : > { %v5420_v6 = vpack.c.bf16 %v1833_v45, %v1825_v44  ;;  %2839 = vmatprep.subr.bf16.mxu1 %v4562_v33  ;;  %v1653_v16 = vmax.f32 %v1298_v8, 0.0  ;;  %v4658_v45 = vld [vmem:[%s5131_s14 + $0x38] sm:$0xff]   ;;  %v1311_v51 = vpop.f32.mrb[6].mxu0  ;;  %v1308_v8 = vadd.f32 %v1307_v42, %v5414_v47  ;;  %v1310_v11 = vadd.f32 %v1309_v39, %v5417_v49 }
 0x1e4   : > { %v5425_v12 = vpack.c.bf16 %v1834_v56, %v1826_v48  ;;  %v1031_v13 = vpop.f32.mrb[48].mxu1  ;;  %v1313_v60 = vpop.f32.mrb[7].mxu0  ;;  %v1312_v55 = vadd.f32 %v1311_v51, %v5414_v47  ;;  %v4659_v51 = vld [vmem:[%s5131_s14 + $0x40] sm:$0xff]  }
 0x1e5   : > { %v1032_v32 = vadd.f32 %v1031_v13, %v5287_v23  ;;  %v1033_v54 = vpop.f32.mrb[49].mxu1  ;;  %v5431_v33 = vpack.c.bf16 %v1661_v22, %v1653_v16  ;;  %v1669_v18 = vmax.f32 %v1308_v8, 0.0  ;;  %v1670_v22 = vmax.f32 %v1310_v11, 0.0  ;;  %v1317_v42 = vpop.f32.mrb[8].mxu0 }
 0x1e6   : > { %v1034_v25 = vadd.f32 %v1033_v54, %v5292_v10  ;;  %v1035_v26 = vpop.f32.mrb[50].mxu1  ;;  %2840 = vmatpush1.bf16.msra.mxu1 %v4560_v57  ;;  %v4569_v57 = vld [vmem:[#allocation8 + $0xf0] ss:$8 sps:$4 sm:$0xff]   ;;  %v1318_v11 = vadd.f32 %v1317_v42, %v5414_v47 }
 0x1e7   : > { %v1036_v7 = vadd.f32 %v1035_v26, %v5287_v23  ;;  %v1037_v31 = vpop.f32.mrb[51].mxu1  ;;  %2841 = vmatprep.subr.bf16.mxu1 %v4568_v14  ;;  %v1841_v40 = vmax.f32 %v1032_v32, 0.0  ;;  %v1314_v32 = vadd.f32 %v1313_v60, %v5417_v49 }
 0x1e8   : > { %v1038_v36 = vadd.f32 %v1037_v31, %v5292_v10  ;;  %v1842_v48 = vmax.f32 %v1034_v25, 0.0  ;;  %v1677_v25 = vmax.f32 %v1312_v55, 0.0 }
 0x1e9   : > { %v1849_v44 = vmax.f32 %v1036_v7, 0.0  ;;  %1559 = vmatmul.mubr.bf16.gmra.mrb[156].mxu1 %v4658_v45  ;;  %v1678_v46 = vmax.f32 %v1314_v32, 0.0 }
 0x1ea   : > { %v1850_v56 = vmax.f32 %v1038_v36, 0.0  ;;  %1568 = vmatprep.mubr.bf16.mxu1 %v6309_v0  ;;  %2842 = vmatpush1.bf16.msra.mxu1 %v4566_v30 }
 0x1eb   : > { %v5438_v14 = vpack.c.bf16 %v1849_v44, %v1841_v40  ;;  %2843 = vmatprep.subr.bf16.mxu1 %v4571_v1  ;;  %v5449_v1 = vpack.c.bf16 %v1677_v25, %v1669_v18  ;;  %v5452_v39 = vpack.c.bf16 %v1678_v46, %v1670_v22  ;;  %v1319_v40 = vpop.f32.mrb[9].mxu0  ;;  %v1685_v25 = vmax.f32 %v1318_v11, 0.0 }
 0x1ec   : > { %v5443_v13 = vpack.c.bf16 %v1850_v56, %v1842_v48  ;;  %v1041_v15 = vpop.f32.mrb[52].mxu1  ;;  %v1321_v48 = vpop.f32.mrb[10].mxu0  ;;  %v1320_v55 = vadd.f32 %v1319_v40, %v5417_v49 }
 0x1ed   : > { %v1042_v54 = vadd.f32 %v1041_v15, %v5287_v23  ;;  %v1043_v16 = vpop.f32.mrb[53].mxu1  ;;  %v1322_v15 = vadd.f32 %v1321_v48, %v5414_v47 }
 0x1ee   : > { %v1044_v26 = vadd.f32 %v1043_v16, %v5292_v10  ;;  %v1045_v30 = vpop.f32.mrb[54].mxu1  ;;  %2844 = vmatpush1.bf16.msra.mxu1 %v4569_v57  ;;  %v1323_v57 = vpop.f32.mrb[11].mxu0 }
 0x1ef   : > { %v1046_v7 = vadd.f32 %v1045_v30, %v5287_v23  ;;  %v1047_v31 = vpop.f32.mrb[55].mxu1  ;;  %v1857_v44 = vmax.f32 %v1042_v54, 0.0  ;;  %v1324_v16 = vadd.f32 %v1323_v57, %v5417_v49  ;;  %v1693_v30 = vmax.f32 %v1322_v15, 0.0  ;;  %v4660_v57 = vld [vmem:[%s5131_s14 + $0x48] sm:$0xff]  }
 0x1f0   : > { %v1048_v36 = vadd.f32 %v1047_v31, %v5292_v10  ;;  %v1858_v56 = vmax.f32 %v1044_v26, 0.0  ;;  %v1686_v26 = vmax.f32 %v1320_v55, 0.0 }
 0x1f1   : > { %v1865_v45 = vmax.f32 %v1046_v7, 0.0  ;;  %1569 = vmatmul.mubr.bf16.gmra.mrb[160].mxu1 %v4659_v51  ;;  %v1694_v31 = vmax.f32 %v1324_v16, 0.0  ;;  %v5467_v40 = vpack.c.bf16 %v1693_v30, %v1685_v25 }
 0x1f2   : > { %v1866_v60 = vmax.f32 %v1048_v36, 0.0  ;;  %1578 = vmatprep.mubr.bf16.mxu1 %v6309_v0 }
 0x1f3   : > { %v5456_v8 = vpack.c.bf16 %v1865_v45, %v1857_v44  ;;  %v1327_v44 = vpop.f32.mrb[12].mxu0  ;;  %v5470_v51 = vpack.c.bf16 %v1694_v31, %v1686_v26 }
 0x1f4   : > { %v5461_v32 = vpack.c.bf16 %v1866_v60, %v1858_v56  ;;  %v1051_v54 = vpop.f32.mrb[56].mxu1  ;;  %v1329_v48 = vpop.f32.mrb[13].mxu0 }
 0x1f5   : > { %v1052_v18 = vadd.f32 %v1051_v54, %v5287_v23  ;;  %v1053_v22 = vpop.f32.mrb[57].mxu1  ;;  %v1331_v11 = vpop.f32.mrb[14].mxu0  ;;  %v1330_v25 = vadd.f32 %v1329_v48, %v5417_v49  ;;  %v435_v48 = vsub.s32 3, %v5274_v63 }
 0x1f6   : > { %v1054_v46 = vadd.f32 %v1053_v22, %v5292_v10  ;;  %v1055_v7 = vpop.f32.mrb[58].mxu1  ;;  %v1333_v54 = vpop.f32.mrb[15].mxu0  ;;  %v1328_v22 = vadd.f32 %v1327_v44, %v5414_v47  ;;  %v1332_v26 = vadd.f32 %v1331_v11, %v5414_v47 }
 0x1f7   : > { %v1056_v42 = vadd.f32 %v1055_v7, %v5287_v23  ;;  %v1057_v36 = vpop.f32.mrb[59].mxu1  ;;  %v1873_v56 = vmax.f32 %v1052_v18, 0.0  ;;  %v431_v7 = vsub.s32 2, %v5274_v63  ;;  %v1334_v31 = vadd.f32 %v1333_v54, %v5417_v49  ;;  %v1337_v5 = vpop.f32.mrb[16].mxu0 }
 0x1f8   : > { %v1058_v45 = vadd.f32 %v1057_v36, %v5292_v10  ;;  %v1874_v55 = vmax.f32 %v1054_v46, 0.0  ;;  %v1701_v36 = vmax.f32 %v1328_v22, 0.0  ;;  %v1339_v22 = vpop.f32.mrb[17].mxu0 }
 0x1f9   : > { %v1881_v60 = vmax.f32 %v1056_v42, 0.0  ;;  %1579 = vmatmul.mubr.bf16.gmra.mrb[164].mxu1 %v4660_v57  ;;  %v1710_v57 = vmax.f32 %v1334_v31, 0.0 }
 0x1fa   : > { %v1882_v15 = vmax.f32 %v1058_v45, 0.0  ;;  %1588 = vmatprep.mubr.bf16.mxu1 %v6309_v0  ;;  %v1702_v45 = vmax.f32 %v1330_v25, 0.0  ;;  %v1341_v0 = vpop.f32.mrb[18].mxu0 }
 0x1fb   : > { %v5474_v16 = vpack.c.bf16 %v1881_v60, %v1873_v56  ;;  %v1709_v56 = vmax.f32 %v1332_v26, 0.0  ;;  %v4661_v26 = vld [vmem:[%s5131_s14 + $0x50] sm:$0xff]  }
 0x1fc   : > { %v5479_v30 = vpack.c.bf16 %v1882_v15, %v1874_v55  ;;  %v1061_v18 = vpop.f32.mrb[60].mxu1 }
 0x1fd   : > { %6326 = vst [vmem:[#allocation17_spill] sm:$0xff] %v5474_v16  ;;  %v1062_v46 = vadd.f32 %v1061_v18, %v5287_v23  ;;  %v1063_v42 = vpop.f32.mrb[61].mxu1  ;;  %v5487_v15 = vpack.c.bf16 %v1709_v56, %v1701_v36  ;;  %v5490_v18 = vpack.c.bf16 %v1710_v57, %v1702_v45  ;;  %v6329_v36 = vmov 0   ;;  %v1343_v56 = vpop.f32.mrb[19].mxu0 }
 0x1fe   : > { %v1064_v44 = vadd.f32 %v1063_v42, %v5292_v10  ;;  %v1065_v60 = vpop.f32.mrb[62].mxu1  ;;  %v5494_v42 = vrot.slane %v5280_v4, %v431_v7  ;;  %v1338_v45 = vadd.f32 %v1337_v5, %v5414_v47 }
 0x1ff   : > { %v1066_v11 = vadd.f32 %v1065_v60, %v5287_v23  ;;  %v1067_v55 = vpop.f32.mrb[63].mxu1  ;;  %6327 = vst [vmem:[#allocation18_spill] sm:$0xff] %v5487_v15  ;;  %6328 = vst [vmem:[#allocation19_spill] sm:$0xff] %v5490_v18  ;;  %v1889_v3 = vmax.f32 %v1062_v46, 0.0  ;;  %v5497_v23 = vrot.slane %v5280_v4, %v435_v48  ;;  %v1340_v46 = vadd.f32 %v1339_v22, %v5417_v49  ;;  %v4662_v15 = vld [vmem:[%s5131_s14 + $0x58] sm:$0xff]   ;;  %v4663_v18 = vld [vmem:[%s5131_s14 + $0x60] sm:$0xff]  }
 0x200   : > { %v1068_v54 = vadd.f32 %v1067_v55, %v5292_v10  ;;  %v1890_v31 = vmax.f32 %v1064_v44, 0.0  ;;  %v1342_v60 = vadd.f32 %v1341_v0, %v5414_v47  ;;  %v1344_v44 = vadd.f32 %v1343_v56, %v5417_v49  ;;  %v1347_v56 = vpop.f32.mrb[20].mxu0 }
 0x201   : > { %v1897_v25 = vmax.f32 %v1066_v11, 0.0  ;;  %1589 = vmatmul.mubr.bf16.gmra.mrb[168].mxu1 %v4661_v26  ;;  %v1717_v48 = vmax.f32 %v1338_v45, 0.0  ;;  %v1718_v55 = vmax.f32 %v1340_v46, 0.0  ;;  %v1348_v45 = vadd.f32 %v1347_v56, %v5414_v47  ;;  %v1349_v46 = vpop.f32.mrb[21].mxu0 }
 0x202   : > { %v1898_v16 = vmax.f32 %v1068_v54, 0.0  ;;  %1598 = vmatprep.mubr.bf16.mxu1 %v6329_v36  ;;  %v1725_v54 = vmax.f32 %v1342_v60, 0.0  ;;  %v1726_v5 = vmax.f32 %v1344_v44, 0.0  ;;  %v1350_v44 = vadd.f32 %v1349_v46, %v5417_v49 }
 0x203   : > { %v5500_v10 = vpack.c.bf16 %v1897_v25, %v1889_v3 }
 0x204   : > { %v5505_v57 = vpack.c.bf16 %v1898_v16, %v1890_v31  ;;  %v1104_v7 = vpop.f32.mrb[64].mxu1  ;;  %v5511_v0 = vpack.c.bf16 %v1725_v54, %v1717_v48  ;;  %v5514_v31 = vpack.c.bf16 %v1726_v5, %v1718_v55  ;;  %v1351_v48 = vpop.f32.mrb[22].mxu0 }
 0x205   : > { %6330 = vst [vmem:[#allocation20_spill] sm:$0xff] %v5500_v10  ;;  %v1105_v11 = vadd.f32 %v1104_v7, %v5494_v42  ;;  %v1106_v4 = vpop.f32.mrb[65].mxu1  ;;  %v1352_v55 = vadd.f32 %v1351_v48, %v5414_v47  ;;  %v1353_v5 = vpop.f32.mrb[23].mxu0 }
 0x206   : > { %6331 = vst [vmem:[#allocation21_spill] sm:$0xff] %v5505_v57  ;;  %v1107_v3 = vadd.f32 %v1106_v4, %v5497_v23  ;;  %v1108_v25 = vpop.f32.mrb[66].mxu1  ;;  %6332 = vst [vmem:[#allocation22_spill] sm:$0xff] %v5511_v0  ;;  %v1734_v0 = vmax.f32 %v1350_v44, 0.0  ;;  %v4545_v44 = vld [vmem:[#allocation8 + $0x210] ss:$8 sps:$4 sm:$0xff]  }
 0x207   : > { %v1109_v22 = vadd.f32 %v1108_v25, %v5494_v42  ;;  %v1110_v26 = vpop.f32.mrb[67].mxu1  ;;  %6333 = vst [vmem:[#allocation23_spill] sm:$0xff] %v5514_v31  ;;  %v1651_v7 = vmax.f32 %v1105_v11, 0.0  ;;  %v1733_v25 = vmax.f32 %v1348_v45, 0.0  ;;  %v1741_v31 = vmax.f32 %v1352_v55, 0.0 }
 0x208   : > { %v1111_v16 = vadd.f32 %v1110_v26, %v5497_v23  ;;  %v1652_v60 = vmax.f32 %v1107_v3, 0.0 }
 0x209   : > { %v1659_v10 = vmax.f32 %v1109_v22, 0.0  ;;  %1599 = vmatmul.mubr.bf16.gmra.mrb[172].mxu1 %v4662_v15  ;;  %v4536_v22 = vld [vmem:[#allocation8 + $0x200] ss:$8 sps:$4 sm:$0xff]   ;;  %v1354_v15 = vadd.f32 %v1353_v5, %v5417_v49  ;;  %v1357_v5 = vpop.f32.mrb[24].mxu0 }
 0x20a   : > { %v1660_v4 = vmax.f32 %v1111_v16, 0.0  ;;  %1608 = vmatprep.mubr.bf16.mxu1 %v6329_v36  ;;  %v4547_v16 = vld [vmem:[#allocation8 + $0x214] ss:$8 sps:$4 sm:$0xff]  }
 0x20b   : > { %v1907_v54 = vpack.c.bf16 %v1659_v10, %v1651_v7  ;;  %v1742_v10 = vmax.f32 %v1354_v15, 0.0  ;;  %v1358_v15 = vadd.f32 %v1357_v5, %v5414_v47 }
 0x20c   : > { %v1908_v26 = vpack.c.bf16 %v1660_v4, %v1652_v60  ;;  %v1114_v11 = vpop.f32.mrb[68].mxu1  ;;  %v5525_v60 = vpack.c.bf16 %v1741_v31, %v1733_v25 }
 0x20d   : > { %v1115_v56 = vadd.f32 %v1114_v11, %v5494_v42  ;;  %v1116_v3 = vpop.f32.mrb[69].mxu1  ;;  %v5528_v48 = vpack.c.bf16 %v1742_v10, %v1734_v0  ;;  %v1749_v0 = vmax.f32 %v1358_v15, 0.0 }
 0x20e   : > { %v1117_v46 = vadd.f32 %v1116_v3, %v5497_v23  ;;  %v1118_v57 = vpop.f32.mrb[70].mxu1  ;;  %3038 = vmatprep.mubr.bf16.mxu0 %v1908_v26  ;;  %6334 = vst [vmem:[#allocation24_spill] sm:$0xff] %v5525_v60  ;;  %v4556_v26 = vld [vmem:[#allocation8 + $0x224] ss:$8 sps:$4 sm:$0xff]   ;;  %v4565_v60 = vld [vmem:[#allocation8 + $0x234] ss:$8 sps:$4 sm:$0xff]  }
 0x20f   : > { %v1119_v7 = vadd.f32 %v1118_v57, %v5494_v42  ;;  %v1120_v45 = vpop.f32.mrb[71].mxu1  ;;  %3039 = vmatmul.mubr.bf16.vlgmr.msra.gmra.mrb[64].mxu0 %v1907_v54  ;;  %6335 = vst [vmem:[#allocation25_spill] sm:$0xff] %v5528_v48  ;;  %v1667_v55 = vmax.f32 %v1115_v56, 0.0  ;;  %v1359_v57 = vpop.f32.mrb[25].mxu0 }
 0x210   : > { %v1121_v4 = vadd.f32 %v1120_v45, %v5497_v23  ;;  %3200 = vmatpush1.bf16.msra.mxu0 %v4536_v22  ;;  %v1668_v3 = vmax.f32 %v1117_v46, 0.0  ;;  %v1360_v31 = vadd.f32 %v1359_v57, %v5417_v49  ;;  %v1361_v25 = vpop.f32.mrb[26].mxu0 }
 0x211   : > { %v1675_v11 = vmax.f32 %v1119_v7, 0.0  ;;  %1609 = vmatmul.mubr.bf16.gmra.mrb[176].mxu1 %v4663_v18  ;;  %3201 = vmatprep.subr.bf16.mxu0 %v4547_v16  ;;  %v1362_v10 = vadd.f32 %v1361_v25, %v5414_v47  ;;  %v1363_v56 = vpop.f32.mrb[27].mxu0  ;;  %v4554_v18 = vld [vmem:[#allocation8 + $0x220] ss:$8 sps:$4 sm:$0xff]  }
 0x212   : > { %v1676_v54 = vmax.f32 %v1121_v4, 0.0  ;;  %1618 = vmatprep.mubr.bf16.mxu1 %v6329_v36  ;;  %v1750_v16 = vmax.f32 %v1360_v31, 0.0  ;;  %v1364_v5 = vadd.f32 %v1363_v56, %v5417_v49  ;;  %v4563_v31 = vld [vmem:[#allocation8 + $0x230] ss:$8 sps:$4 sm:$0xff]  }
 0x213   : > { %v1915_v22 = vpack.c.bf16 %v1675_v11, %v1667_v55  ;;  %v1757_v48 = vmax.f32 %v1362_v10, 0.0 }
 0x214   : > { %v1916_v7 = vpack.c.bf16 %v1676_v54, %v1668_v3  ;;  %v1124_v45 = vpop.f32.mrb[72].mxu1  ;;  %3202 = vmatpush1.bf16.msra.mxu0 %v4545_v44  ;;  %v1758_v15 = vmax.f32 %v1364_v5, 0.0 }
 0x215   : > { %v1125_v46 = vadd.f32 %v1124_v45, %v5494_v42  ;;  %v1126_v4 = vpop.f32.mrb[73].mxu1  ;;  %3203 = vmatprep.subr.bf16.mxu0 %v4556_v26  ;;  %v5539_v44 = vpack.c.bf16 %v1757_v48, %v1749_v0  ;;  %v1367_v26 = vpop.f32.mrb[28].mxu0  ;;  %v4664_v45 = vld [vmem:[%s5131_s14 + $0x68] sm:$0xff]  }
 0x216   : > { %v1127_v55 = vadd.f32 %v1126_v4, %v5497_v23  ;;  %v1128_v11 = vpop.f32.mrb[74].mxu1  ;;  %3048 = vmatprep.mubr.bf16.mxu0 %v1916_v7  ;;  %v5542_v25 = vpack.c.bf16 %v1758_v15, %v1750_v16  ;;  %v4574_v7 = vld [vmem:[#allocation8 + $0x244] ss:$8 sps:$4 sm:$0xff]   ;;  %v1368_v5 = vadd.f32 %v1367_v26, %v5414_v47  ;;  %v1369_v4 = vpop.f32.mrb[29].mxu0 }
 0x217   : > { %v1129_v57 = vadd.f32 %v1128_v11, %v5494_v42  ;;  %v1130_v3 = vpop.f32.mrb[75].mxu1  ;;  %3049 = vmatmul.mubr.bf16.gmra.mrb[68].mxu0 %v1915_v22  ;;  %6336 = vst [vmem:[#allocation26_spill] sm:$0xff] %v5539_v44  ;;  %v1683_v10 = vmax.f32 %v1125_v46, 0.0  ;;  %v1370_v48 = vadd.f32 %v1369_v4, %v5417_v49  ;;  %v1371_v0 = vpop.f32.mrb[30].mxu0  ;;  %v4577_v44 = vld [vmem:[#allocation8 + $0x254] ss:$8 sps:$4 sm:$0xff]  }
 0x218   : > { %v1131_v54 = vadd.f32 %v1130_v3, %v5497_v23  ;;  %3204 = vmatpush1.bf16.msra.mxu0 %v4554_v18  ;;  %6337 = vst [vmem:[#allocation27_spill] sm:$0xff] %v5542_v25  ;;  %v1684_v11 = vmax.f32 %v1127_v55, 0.0  ;;  %v1765_v16 = vmax.f32 %v1368_v5, 0.0  ;;  %v1372_v15 = vadd.f32 %v1371_v0, %v5414_v47  ;;  %v1373_v46 = vpop.f32.mrb[31].mxu0 }
 0x219   : > { %v1691_v56 = vmax.f32 %v1129_v57, 0.0  ;;  %1619 = vmatmul.mubr.bf16.gmra.mrb[180].mxu1 %v4664_v45  ;;  %3205 = vmatprep.subr.bf16.mxu0 %v4565_v60  ;;  %v4572_v60 = vld [vmem:[#allocation8 + $0x240] ss:$8 sps:$4 sm:$0xff]   ;;  %v1766_v45 = vmax.f32 %v1370_v48, 0.0  ;;  %v1374_v26 = vadd.f32 %v1373_v46, %v5417_v49  ;;  %v4575_v48 = vld [vmem:[#allocation8 + $0x250] ss:$8 sps:$4 sm:$0xff]  }
 0x21a   : > { %v1692_v22 = vmax.f32 %v1131_v54, 0.0  ;;  %1628 = vmatprep.mubr.bf16.mxu1 %v6329_v36  ;;  %v1773_v25 = vmax.f32 %v1372_v15, 0.0 }
 0x21b   : > { %v1923_v18 = vpack.c.bf16 %v1691_v56, %v1683_v10  ;;  %v1774_v5 = vmax.f32 %v1374_v26, 0.0 }
 0x21c   : > { %v1924_v57 = vpack.c.bf16 %v1692_v22, %v1684_v11  ;;  %v1134_v3 = vpop.f32.mrb[76].mxu1  ;;  %3206 = vmatpush1.bf16.msra.mxu0 %v4563_v31  ;;  %v5553_v31 = vpack.c.bf16 %v1773_v25, %v1765_v16 }
 0x21d   : > { %v1135_v55 = vadd.f32 %v1134_v3, %v5494_v42  ;;  %v1136_v54 = vpop.f32.mrb[77].mxu1  ;;  %3207 = vmatprep.subr.bf16.mxu0 %v4574_v7  ;;  %v5556_v0 = vpack.c.bf16 %v1774_v5, %v1766_v45  ;;  %v1377_v7 = vpop.f32.mrb[32].mxu0  ;;  %v4665_v3 = vld [vmem:[%s5131_s14 + $0x70] sm:$0xff]  }
 0x21e   : > { %v1137_v10 = vadd.f32 %v1136_v54, %v5497_v23  ;;  %v1138_v56 = vpop.f32.mrb[78].mxu1  ;;  %3058 = vmatprep.mubr.bf16.mxu0 %v1924_v57  ;;  %6338 = vst [vmem:[#allocation28_spill] sm:$0xff] %v5553_v31  ;;  %v4580_v57 = vld [vmem:[#allocation8 + $0x264] ss:$8 sps:$4 sm:$0xff]   ;;  %v1378_v26 = vadd.f32 %v1377_v7, %v5414_v47  ;;  %v1379_v54 = vpop.f32.mrb[33].mxu0 }
 0x21f   : > { %v1139_v4 = vadd.f32 %v1138_v56, %v5494_v42  ;;  %v1140_v11 = vpop.f32.mrb[79].mxu1  ;;  %3059 = vmatmul.mubr.bf16.gmra.mrb[72].mxu0 %v1923_v18  ;;  %v1699_v15 = vmax.f32 %v1135_v55, 0.0  ;;  %v1380_v25 = vadd.f32 %v1379_v54, %v5417_v49  ;;  %v1381_v16 = vpop.f32.mrb[34].mxu0 }
 0x220   : > { %v1141_v22 = vadd.f32 %v1140_v11, %v5497_v23  ;;  %3208 = vmatpush1.bf16.msra.mxu0 %v4572_v60  ;;  %v1700_v56 = vmax.f32 %v1137_v10, 0.0  ;;  %v1781_v45 = vmax.f32 %v1378_v26, 0.0  ;;  %v1382_v5 = vadd.f32 %v1381_v16, %v5414_v47  ;;  %v1383_v55 = vpop.f32.mrb[35].mxu0 }
 0x221   : > { %v1707_v46 = vmax.f32 %v1139_v4, 0.0  ;;  %1629 = vmatmul.mubr.bf16.gmra.mrb[184].mxu1 %v4665_v3  ;;  %3209 = vmatprep.subr.bf16.mxu0 %v4577_v44  ;;  %v4578_v44 = vld [vmem:[#allocation8 + $0x260] ss:$8 sps:$4 sm:$0xff]   ;;  %v1782_v3 = vmax.f32 %v1380_v25, 0.0  ;;  %v1384_v7 = vadd.f32 %v1383_v55, %v5417_v49  ;;  %v4581_v25 = vld [vmem:[#allocation8 + $0x270] ss:$8 sps:$4 sm:$0xff]  }
 0x222   : > { %v1708_v18 = vmax.f32 %v1141_v22, 0.0  ;;  %1638 = vmatprep.mubr.bf16.mxu1 %v6329_v36  ;;  %v4583_v36 = vld [vmem:[#allocation8 + $0x274] ss:$8 sps:$4 sm:$0xff]   ;;  %v1789_v31 = vmax.f32 %v1382_v5, 0.0 }
 0x223   : > { %v1931_v60 = vpack.c.bf16 %v1707_v46, %v1699_v15  ;;  %v1790_v26 = vmax.f32 %v1384_v7, 0.0 }
 0x224   : > { %v1932_v4 = vpack.c.bf16 %v1708_v18, %v1700_v56  ;;  %v1144_v11 = vpop.f32.mrb[80].mxu1  ;;  %3210 = vmatpush1.bf16.msra.mxu0 %v4575_v48  ;;  %v5567_v48 = vpack.c.bf16 %v1789_v31, %v1781_v45 }
 0x225   : > { %v1145_v10 = vadd.f32 %v1144_v11, %v5494_v42  ;;  %v1146_v22 = vpop.f32.mrb[81].mxu1  ;;  %3211 = vmatprep.subr.bf16.mxu0 %v4580_v57  ;;  %v5570_v16 = vpack.c.bf16 %v1790_v26, %v1782_v3  ;;  %v1387_v57 = vpop.f32.mrb[36].mxu0  ;;  %v4666_v11 = vld [vmem:[%s5131_s14 + $0x78] sm:$0xff]   ;;  %s4788_s14 = scalar_lea.vmem %s4787_s12, 16384 }
 0x226   : > { %v1147_v15 = vadd.f32 %v1146_v22, %v5497_v23  ;;  %v1148_v46 = vpop.f32.mrb[82].mxu1  ;;  %3068 = vmatprep.mubr.bf16.mxu0 %v1932_v4  ;;  %6339 = vst [vmem:[#allocation29_spill] sm:$0xff] %v5567_v48  ;;  %v4586_v4 = vld [vmem:[#allocation8 + $0x284] ss:$8 sps:$4 sm:$0xff]   ;;  %v1388_v7 = vadd.f32 %v1387_v57, %v5414_v47  ;;  %v1389_v22 = vpop.f32.mrb[37].mxu0  ;;  %p4790_p9 = scmp.lt.s32.totalorder %s4788_s14, %s4782_s7 }
 0x227   : > { %v1149_v54 = vadd.f32 %v1148_v46, %v5494_v42  ;;  %v1150_v56 = vpop.f32.mrb[83].mxu1  ;;  %3069 = vmatmul.mubr.bf16.gmra.mrb[76].mxu0 %v1931_v60  ;;  %v1715_v5 = vmax.f32 %v1145_v10, 0.0  ;;  %v1390_v31 = vadd.f32 %v1389_v22, %v5417_v49  ;;  %v1391_v45 = vpop.f32.mrb[38].mxu0 }
 0x228   : > { %v1151_v18 = vadd.f32 %v1150_v56, %v5497_v23  ;;  %3212 = vmatpush1.bf16.msra.mxu0 %v4578_v44  ;;  %v1716_v46 = vmax.f32 %v1147_v15, 0.0  ;;  %v1797_v3 = vmax.f32 %v1388_v7, 0.0  ;;  %v1392_v26 = vadd.f32 %v1391_v45, %v5414_v47  ;;  %v1393_v10 = vpop.f32.mrb[39].mxu0  ;;  %p4791_p0 = por %p4790_p9, %p4789_p7 }
 0x229   : > { %v1723_v55 = vmax.f32 %v1149_v54, 0.0  ;;  %1639 = vmatmul.mubr.bf16.gmra.mrb[188].mxu1 %v4666_v11  ;;  %3213 = vmatprep.subr.bf16.mxu0 %v4583_v36  ;;  %v4584_v36 = vld [vmem:[#allocation8 + $0x280] ss:$8 sps:$4 sm:$0xff]   ;;  %v1798_v11 = vmax.f32 %v1390_v31, 0.0  ;;  %v1394_v57 = vadd.f32 %v1393_v10, %v5417_v49  ;;  %v4587_v31 = vld [vmem:[#allocation8 + $0x290] ss:$8 sps:$4 sm:$0xff]  }
 0x22a   : > { %v1724_v60 = vmax.f32 %v1151_v18, 0.0  ;;  %2845 = vmatprep.mubr.bf16.mxu1 %v5304_v28  ;;  %v4589_v28 = vld [vmem:[#allocation8 + $0x294] ss:$8 sps:$4 sm:$0xff]   ;;  %v1805_v48 = vmax.f32 %v1392_v26, 0.0  ;;  %p4792_p4 = pnand %p4791_p0, %p4785_p5 }
 0x22b   : > { %v1939_v44 = vpack.c.bf16 %v1723_v55, %v1715_v5  ;;  %v1806_v55 = vmax.f32 %v1394_v57, 0.0 }
 0x22c   : > { %v1940_v54 = vpack.c.bf16 %v1724_v60, %v1716_v46  ;;  %v1154_v56 = vpop.f32.mrb[84].mxu1  ;;  %3214 = vmatpush1.bf16.msra.mxu0 %v4581_v25  ;;  %v5581_v25 = vpack.c.bf16 %v1805_v48, %v1797_v3 }
 0x22d   : > { %v1155_v15 = vadd.f32 %v1154_v56, %v5494_v42  ;;  %v1156_v18 = vpop.f32.mrb[85].mxu1  ;;  %3215 = vmatprep.subr.bf16.mxu0 %v4586_v4  ;;  %v5584_v45 = vpack.c.bf16 %v1806_v55, %v1798_v11  ;;  %v1397_v4 = vpop.f32.mrb[40].mxu0 }
 0x22e   : > { %v1157_v22 = vadd.f32 %v1156_v18, %v5497_v23  ;;  %v1158_v5 = vpop.f32.mrb[86].mxu1  ;;  %3078 = vmatprep.mubr.bf16.mxu0 %v1940_v54  ;;  %v4592_v54 = vld [vmem:[#allocation8 + $0x2a4] ss:$8 sps:$4 sm:$0xff]   ;;  %v1398_v56 = vadd.f32 %v1397_v4, %v5414_v47  ;;  %v1399_v57 = vpop.f32.mrb[41].mxu0 }
 0x22f   : > { %v1159_v7 = vadd.f32 %v1158_v5, %v5494_v42  ;;  %v1160_v46 = vpop.f32.mrb[87].mxu1  ;;  %3079 = vmatmul.mubr.bf16.gmra.mrb[80].mxu0 %v1939_v44  ;;  %v1731_v10 = vmax.f32 %v1155_v15, 0.0  ;;  %v1400_v48 = vadd.f32 %v1399_v57, %v5417_v49  ;;  %v1401_v3 = vpop.f32.mrb[42].mxu0 }
 0x230   : > { %v1161_v60 = vadd.f32 %v1160_v46, %v5497_v23  ;;  %3216 = vmatpush1.bf16.msra.mxu0 %v4584_v36  ;;  %v1732_v18 = vmax.f32 %v1157_v22, 0.0  ;;  %v1813_v11 = vmax.f32 %v1398_v56, 0.0  ;;  %v1402_v5 = vadd.f32 %v1401_v3, %v5414_v47  ;;  %v1403_v15 = vpop.f32.mrb[43].mxu0 }
 0x231   : > { %v1739_v26 = vmax.f32 %v1159_v7, 0.0  ;;  %2846 = vmatmul.mubr.bf16.vlgmr.msra.gmra.mrb[192].mxu1 %v5302_v27  ;;  %3217 = vmatprep.subr.bf16.mxu0 %v4589_v28  ;;  %v4590_v27 = vld [vmem:[#allocation8 + $0x2a0] ss:$8 sps:$4 sm:$0xff]   ;;  %v1814_v28 = vmax.f32 %v1400_v48, 0.0  ;;  %v1404_v46 = vadd.f32 %v1403_v15, %v5417_v49  ;;  %v4593_v48 = vld [vmem:[#allocation8 + $0x2b0] ss:$8 sps:$4 sm:$0xff]  }
 0x232   : > { %v1740_v44 = vmax.f32 %v1161_v60, 0.0  ;;  %2855 = vmatprep.mubr.bf16.mxu1 %v5314_v43  ;;  %v4595_v43 = vld [vmem:[#allocation8 + $0x2b4] ss:$8 sps:$4 sm:$0xff]   ;;  %v1821_v4 = vmax.f32 %v1402_v5, 0.0 }
 0x233   : > { %v1947_v36 = vpack.c.bf16 %v1739_v26, %v1731_v10  ;;  %v1822_v26 = vmax.f32 %v1404_v46, 0.0 }
 0x234   : > { %v1948_v55 = vpack.c.bf16 %v1740_v44, %v1732_v18  ;;  %v1164_v7 = vpop.f32.mrb[88].mxu1  ;;  %3218 = vmatpush1.bf16.msra.mxu0 %v4587_v31  ;;  %v5595_v31 = vpack.c.bf16 %v1821_v4, %v1813_v11 }
 0x235   : > { %v1165_v22 = vadd.f32 %v1164_v7, %v5494_v42  ;;  %v1166_v60 = vpop.f32.mrb[89].mxu1  ;;  %3219 = vmatprep.subr.bf16.mxu0 %v4592_v54  ;;  %v5598_v3 = vpack.c.bf16 %v1822_v26, %v1814_v28  ;;  %v1407_v54 = vpop.f32.mrb[44].mxu0 }
 0x236   : > { %v1167_v57 = vadd.f32 %v1166_v60, %v5497_v23  ;;  %v1168_v10 = vpop.f32.mrb[90].mxu1  ;;  %3088 = vmatprep.mubr.bf16.mxu0 %v1948_v55  ;;  %v4598_v55 = vld [vmem:[#allocation8 + $0x2c4] ss:$8 sps:$4 sm:$0xff]   ;;  %v1408_v7 = vadd.f32 %v1407_v54, %v5414_v47  ;;  %v1409_v46 = vpop.f32.mrb[45].mxu0 }
 0x237   : > { %v1169_v56 = vadd.f32 %v1168_v10, %v5494_v42  ;;  %v1170_v18 = vpop.f32.mrb[91].mxu1  ;;  %3089 = vmatmul.mubr.bf16.gmra.mrb[84].mxu0 %v1947_v36  ;;  %v1747_v15 = vmax.f32 %v1165_v22, 0.0  ;;  %v1410_v11 = vadd.f32 %v1409_v46, %v5417_v49 }
 0x238   : > { %v1171_v44 = vadd.f32 %v1170_v18, %v5497_v23  ;;  %3220 = vmatpush1.bf16.msra.mxu0 %v4590_v27  ;;  %v1748_v60 = vmax.f32 %v1167_v57, 0.0  ;;  %v1411_v27 = vpop.f32.mrb[46].mxu0  ;;  %v1829_v28 = vmax.f32 %v1408_v7, 0.0 }
 0x239   : > { %v1755_v5 = vmax.f32 %v1169_v56, 0.0  ;;  %2856 = vmatmul.mubr.bf16.gmra.mrb[196].mxu1 %v5312_v41  ;;  %3221 = vmatprep.subr.bf16.mxu0 %v4595_v43  ;;  %v1412_v10 = vadd.f32 %v1411_v27, %v5414_v47  ;;  %v1413_v22 = vpop.f32.mrb[47].mxu0  ;;  %v4596_v41 = vld [vmem:[#allocation8 + $0x2c0] ss:$8 sps:$4 sm:$0xff]   ;;  %v1830_v43 = vmax.f32 %v1410_v11, 0.0 }
 0x23a   : > { %v1756_v36 = vmax.f32 %v1171_v44, 0.0  ;;  %2865 = vmatprep.mubr.bf16.mxu1 %v5324_v9  ;;  %v1414_v18 = vadd.f32 %v1413_v22, %v5417_v49  ;;  %v4601_v9 = vld [vmem:[#allocation8 + $0x2d4] ss:$8 sps:$4 sm:$0xff]   ;;  %v4599_v11 = vld [vmem:[#allocation8 + $0x2d0] ss:$8 sps:$4 sm:$0xff]  }
 0x23b   : > { %v1955_v4 = vpack.c.bf16 %v1755_v5, %v1747_v15  ;;  %v1837_v54 = vmax.f32 %v1412_v10, 0.0 }
 0x23c   : > { %v1956_v26 = vpack.c.bf16 %v1756_v36, %v1748_v60  ;;  %v1174_v56 = vpop.f32.mrb[92].mxu1  ;;  %3222 = vmatpush1.bf16.msra.mxu0 %v4593_v48  ;;  %v1838_v5 = vmax.f32 %v1414_v18, 0.0 }
 0x23d   : > { %v1175_v57 = vadd.f32 %v1174_v56, %v5494_v42  ;;  %v1176_v44 = vpop.f32.mrb[93].mxu1  ;;  %3223 = vmatprep.subr.bf16.mxu0 %v4598_v55  ;;  %v5609_v48 = vpack.c.bf16 %v1837_v54, %v1829_v28  ;;  %v1417_v55 = vpop.f32.mrb[48].mxu0 }
 0x23e   : > { %v1177_v46 = vadd.f32 %v1176_v44, %v5497_v23  ;;  %v1178_v15 = vpop.f32.mrb[94].mxu1  ;;  %3098 = vmatprep.mubr.bf16.mxu0 %v1956_v26  ;;  %v5612_v27 = vpack.c.bf16 %v1838_v5, %v1830_v43  ;;  %v4604_v26 = vld [vmem:[#allocation8 + $0x2e4] ss:$8 sps:$4 sm:$0xff]   ;;  %v1418_v56 = vadd.f32 %v1417_v55, %v5414_v47  ;;  %v1419_v18 = vpop.f32.mrb[49].mxu0 }
 0x23f   : > { %v1179_v7 = vadd.f32 %v1178_v15, %v5494_v42  ;;  %v1180_v60 = vpop.f32.mrb[95].mxu1  ;;  %3099 = vmatmul.mubr.bf16.gmra.mrb[88].mxu0 %v1955_v4  ;;  %v1763_v22 = vmax.f32 %v1175_v57, 0.0  ;;  %v1420_v28 = vadd.f32 %v1419_v18, %v5417_v49 }
 0x240   : > { %v1181_v36 = vadd.f32 %v1180_v60, %v5497_v23  ;;  %3224 = vmatpush1.bf16.msra.mxu0 %v4596_v41  ;;  %v1764_v44 = vmax.f32 %v1177_v46, 0.0  ;;  %v1421_v41 = vpop.f32.mrb[50].mxu0  ;;  %v1845_v43 = vmax.f32 %v1418_v56, 0.0 }
 0x241   : > { %v1771_v10 = vmax.f32 %v1179_v7, 0.0  ;;  %2866 = vmatmul.mubr.bf16.gmra.mrb[200].mxu1 %v5322_v62  ;;  %3225 = vmatprep.subr.bf16.mxu0 %v4601_v9  ;;  %v1422_v15 = vadd.f32 %v1421_v41, %v5414_v47  ;;  %v1423_v57 = vpop.f32.mrb[51].mxu0  ;;  %v4602_v62 = vld [vmem:[#allocation8 + $0x2e0] ss:$8 sps:$4 sm:$0xff]   ;;  %v1846_v9 = vmax.f32 %v1420_v28, 0.0 }
 0x242   : > { %v1772_v4 = vmax.f32 %v1181_v36, 0.0  ;;  %2875 = vmatprep.mubr.bf16.mxu1 %v5334_v37  ;;  %v1424_v60 = vadd.f32 %v1423_v57, %v5417_v49  ;;  %v4607_v37 = vld [vmem:[#allocation8 + $0x2f4] ss:$8 sps:$4 sm:$0xff]   ;;  %v4605_v28 = vld [vmem:[#allocation8 + $0x2f0] ss:$8 sps:$4 sm:$0xff]  }
 0x243   : > { %v1963_v54 = vpack.c.bf16 %v1771_v10, %v1763_v22  ;;  %v1853_v55 = vmax.f32 %v1422_v15, 0.0 }
 0x244   : > { %v1964_v5 = vpack.c.bf16 %v1772_v4, %v1764_v44  ;;  %v1184_v7 = vpop.f32.mrb[96].mxu1  ;;  %3226 = vmatpush1.bf16.msra.mxu0 %v4599_v11  ;;  %v1854_v10 = vmax.f32 %v1424_v60, 0.0 }
 0x245   : > { %v1185_v46 = vadd.f32 %v1184_v7, %v5494_v42  ;;  %v1186_v36 = vpop.f32.mrb[97].mxu1  ;;  %3227 = vmatprep.subr.bf16.mxu0 %v4604_v26  ;;  %v5623_v11 = vpack.c.bf16 %v1853_v55, %v1845_v43  ;;  %v1427_v26 = vpop.f32.mrb[52].mxu0 }
 0x246   : > { %v1187_v18 = vadd.f32 %v1186_v36, %v5497_v23  ;;  %v1188_v22 = vpop.f32.mrb[98].mxu1  ;;  %3108 = vmatprep.mubr.bf16.mxu0 %v1964_v5  ;;  %v5626_v41 = vpack.c.bf16 %v1854_v10, %v1846_v9  ;;  %v4610_v5 = vld [vmem:[#allocation8 + $0x304] ss:$8 sps:$4 sm:$0xff]   ;;  %v1428_v7 = vadd.f32 %v1427_v26, %v5414_v47  ;;  %v1429_v60 = vpop.f32.mrb[53].mxu0 }
 0x247   : > { %v1189_v56 = vadd.f32 %v1188_v22, %v5494_v42  ;;  %v1190_v44 = vpop.f32.mrb[99].mxu1  ;;  %3109 = vmatmul.mubr.bf16.gmra.mrb[92].mxu0 %v1963_v54  ;;  %v1779_v57 = vmax.f32 %v1185_v46, 0.0  ;;  %v1430_v43 = vadd.f32 %v1429_v60, %v5417_v49 }
 0x248   : > { %v1191_v4 = vadd.f32 %v1190_v44, %v5497_v23  ;;  %3228 = vmatpush1.bf16.msra.mxu0 %v4602_v62  ;;  %v1780_v36 = vmax.f32 %v1187_v18, 0.0  ;;  %v1431_v62 = vpop.f32.mrb[54].mxu0  ;;  %v1861_v9 = vmax.f32 %v1428_v7, 0.0 }
 0x249   : > { %v1787_v15 = vmax.f32 %v1189_v56, 0.0  ;;  %2876 = vmatmul.mubr.bf16.gmra.mrb[204].mxu1 %v5332_v20  ;;  %3229 = vmatprep.subr.bf16.mxu0 %v4607_v37  ;;  %v1432_v22 = vadd.f32 %v1431_v62, %v5414_v47  ;;  %v1433_v46 = vpop.f32.mrb[55].mxu0  ;;  %v1862_v20 = vmax.f32 %v1430_v43, 0.0 }
 0x24a   : > { %v1788_v54 = vmax.f32 %v1191_v4, 0.0  ;;  %2885 = vmatprep.mubr.bf16.mxu1 %v5344_v35  ;;  %v1434_v37 = vadd.f32 %v1433_v46, %v5417_v49 }
 0x24b   : > { %v1971_v55 = vpack.c.bf16 %v1787_v15, %v1779_v57  ;;  %v1869_v4 = vmax.f32 %v1432_v22, 0.0 }
 0x24c   : > { %v1972_v10 = vpack.c.bf16 %v1788_v54, %v1780_v36  ;;  %v1194_v56 = vpop.f32.mrb[100].mxu1  ;;  %3230 = vmatpush1.bf16.msra.mxu0 %v4605_v28  ;;  %v1870_v57 = vmax.f32 %v1434_v37, 0.0  ;;  %v1437_v54 = vpop.f32.mrb[56].mxu0 }
 0x24d   : > { %v1195_v44 = vadd.f32 %v1194_v56, %v5494_v42  ;;  %v1196_v18 = vpop.f32.mrb[101].mxu1  ;;  %3392 = vmatprep.subr.bf16.mxu0 %v4610_v5  ;;  %v5637_v60 = vpack.c.bf16 %v1869_v4, %v1861_v9  ;;  %v1438_v5 = vadd.f32 %v1437_v54, %v5414_v47  ;;  %v1439_v22 = vpop.f32.mrb[57].mxu0 }
 0x24e   : > { %v1197_v35 = vadd.f32 %v1196_v18, %v5497_v23  ;;  %v1198_v26 = vpop.f32.mrb[102].mxu1  ;;  %3118 = vmatprep.mubr.bf16.mxu0 %v1972_v10  ;;  %v5640_v36 = vpack.c.bf16 %v1870_v57, %v1862_v20  ;;  %v1441_v9 = vpop.f32.mrb[58].mxu0 }
 0x24f   : > { %v1199_v15 = vadd.f32 %v1198_v26, %v5494_v42  ;;  %v1200_v7 = vpop.f32.mrb[103].mxu1  ;;  %3119 = vmatmul.mubr.bf16.gmra.mrb[96].mxu0 %v1971_v55  ;;  %v1795_v43 = vmax.f32 %v1195_v44, 0.0  ;;  %v1440_v55 = vadd.f32 %v1439_v22, %v5417_v49  ;;  %v1877_v37 = vmax.f32 %v1438_v5, 0.0  ;;  %v1443_v18 = vpop.f32.mrb[59].mxu0 }
 0x250   : > { %v1201_v28 = vadd.f32 %v1200_v7, %v5497_v23  ;;  %v1796_v46 = vmax.f32 %v1197_v35, 0.0  ;;  %v1442_v20 = vadd.f32 %v1441_v9, %v5414_v47 }
 0x251   : > { %v1803_v62 = vmax.f32 %v1199_v15, 0.0  ;;  %2886 = vmatmul.mubr.bf16.gmra.mrb[208].mxu1 %v5342_v34  ;;  %v1878_v26 = vmax.f32 %v1440_v55, 0.0  ;;  %v1444_v34 = vadd.f32 %v1443_v18, %v5417_v49 }
 0x252   : > { %v1804_v10 = vmax.f32 %v1201_v28, 0.0  ;;  %2895 = vmatprep.mubr.bf16.mxu1 %v5354_v2  ;;  %v1885_v35 = vmax.f32 %v1442_v20, 0.0 }
 0x253   : > { %v1979_v56 = vpack.c.bf16 %v1803_v62, %v1795_v43  ;;  %v1886_v28 = vmax.f32 %v1444_v34, 0.0 }
 0x254   : > { %v1980_v4 = vpack.c.bf16 %v1804_v10, %v1796_v46  ;;  %v1204_v44 = vpop.f32.mrb[104].mxu1  ;;  %v5651_v62 = vpack.c.bf16 %v1885_v35, %v1877_v37  ;;  %v1447_v46 = vpop.f32.mrb[60].mxu0 }
 0x255   : > { %v1205_v57 = vadd.f32 %v1204_v44, %v5494_v42  ;;  %v1206_v15 = vpop.f32.mrb[105].mxu1  ;;  %v5654_v22 = vpack.c.bf16 %v1886_v28, %v1878_v26  ;;  %v1448_v9 = vadd.f32 %v1447_v46, %v5414_v47  ;;  %v1449_v20 = vpop.f32.mrb[61].mxu0 }
 0x256   : > { %v1207_v7 = vadd.f32 %v1206_v15, %v5497_v23  ;;  %v1208_v2 = vpop.f32.mrb[106].mxu1  ;;  %3128 = vmatprep.mubr.bf16.mxu0 %v1980_v4  ;;  %v1451_v37 = vpop.f32.mrb[62].mxu0 }
 0x257   : > { %v1209_v54 = vadd.f32 %v1208_v2, %v5494_v42  ;;  %v1210_v43 = vpop.f32.mrb[107].mxu1  ;;  %3129 = vmatmul.mubr.bf16.gmra.mrb[100].mxu0 %v1979_v56  ;;  %v1811_v10 = vmax.f32 %v1205_v57, 0.0  ;;  %v1450_v56 = vadd.f32 %v1449_v20, %v5417_v49  ;;  %v1893_v34 = vmax.f32 %v1448_v9, 0.0  ;;  %v1453_v15 = vpop.f32.mrb[63].mxu0 }
 0x258   : > { %v1211_v5 = vadd.f32 %v1210_v43, %v5497_v23  ;;  %v1812_v18 = vmax.f32 %v1207_v7, 0.0  ;;  %v1452_v26 = vadd.f32 %v1451_v37, %v5414_v47 }
 0x259   : > { %v1819_v55 = vmax.f32 %v1209_v54, 0.0  ;;  %2896 = vmatmul.mubr.bf16.gmra.mrb[212].mxu1 %v5352_v59  ;;  %v1894_v2 = vmax.f32 %v1450_v56, 0.0  ;;  %v1454_v59 = vadd.f32 %v1453_v15, %v5417_v49 }
 0x25a   : > { %v1820_v4 = vmax.f32 %v1211_v5, 0.0  ;;  %2905 = vmatprep.mubr.bf16.mxu1 %v5364_v58  ;;  %v1901_v7 = vmax.f32 %v1452_v26, 0.0 }
 0x25b   : > { %v1987_v44 = vpack.c.bf16 %v1819_v55, %v1811_v10  ;;  %v1902_v5 = vmax.f32 %v1454_v59, 0.0 }
 0x25c   : > { %v1988_v35 = vpack.c.bf16 %v1820_v4, %v1812_v18  ;;  %v1214_v57 = vpop.f32.mrb[108].mxu1  ;;  %v5665_v47 = vpack.c.bf16 %v1901_v7, %v1893_v34 }
 0x25d   : > { %v1215_v28 = vadd.f32 %v1214_v57, %v5494_v42  ;;  %v1216_v54 = vpop.f32.mrb[109].mxu1  ;;  %v5668_v9 = vpack.c.bf16 %v1902_v5, %v1894_v2 }
 0x25e   : > { %v1217_v43 = vadd.f32 %v1216_v54, %v5497_v23  ;;  %v1218_v58 = vpop.f32.mrb[110].mxu1  ;;  %3138 = vmatprep.mubr.bf16.mxu0 %v1988_v35 }
 0x25f   : > { %v1219_v46 = vadd.f32 %v1218_v58, %v5494_v42  ;;  %v1220_v10 = vpop.f32.mrb[111].mxu1  ;;  %3139 = vmatmul.mubr.bf16.gmra.mrb[104].mxu0 %v1987_v44  ;;  %v1827_v49 = vmax.f32 %v1215_v28, 0.0 }
 0x260   : > { %v1221_v55 = vadd.f32 %v1220_v10, %v5497_v23  ;;  %v1828_v18 = vmax.f32 %v1217_v43, 0.0 }
 0x261   : > { %v1835_v20 = vmax.f32 %v1219_v46, 0.0  ;;  %2906 = vmatmul.mubr.bf16.gmra.mrb[216].mxu1 %v5362_v29 }
 0x262   : > { %v1836_v4 = vmax.f32 %v1221_v55, 0.0  ;;  %2915 = vmatprep.mubr.bf16.mxu1 %v5374_v53 }
 0x263   : > { %v1995_v56 = vpack.c.bf16 %v1835_v20, %v1827_v49 }
 0x264   : > { %v1996_v37 = vpack.c.bf16 %v1836_v4, %v1828_v18  ;;  %v1224_v26 = vpop.f32.mrb[112].mxu1 }
 0x265   : > { %v1225_v15 = vadd.f32 %v1224_v26, %v5494_v42  ;;  %v1226_v44 = vpop.f32.mrb[113].mxu1 }
 0x266   : > { %v1227_v34 = vadd.f32 %v1226_v44, %v5497_v23  ;;  %v1228_v35 = vpop.f32.mrb[114].mxu1  ;;  %3148 = vmatprep.mubr.bf16.mxu0 %v1996_v37 }
 0x267   : > { %v1229_v57 = vadd.f32 %v1228_v35, %v5494_v42  ;;  %v1230_v2 = vpop.f32.mrb[115].mxu1  ;;  %3149 = vmatmul.mubr.bf16.gmra.mrb[108].mxu0 %v1995_v56  ;;  %v1843_v59 = vmax.f32 %v1225_v15, 0.0 }
 0x268   : > { %v1231_v29 = vadd.f32 %v1230_v2, %v5497_v23  ;;  %v1844_v53 = vmax.f32 %v1227_v34, 0.0 }
 0x269   : > { %v1851_v28 = vmax.f32 %v1229_v57, 0.0  ;;  %2916 = vmatmul.mubr.bf16.gmra.mrb[220].mxu1 %v5372_v52 }
 0x26a   : > { %v1852_v54 = vmax.f32 %v1231_v29, 0.0  ;;  %2925 = vmatprep.mubr.bf16.mxu1 %v5384_v24 }
 0x26b   : > { %v2003_v7 = vpack.c.bf16 %v1851_v28, %v1843_v59 }
 0x26c   : > { %v2004_v43 = vpack.c.bf16 %v1852_v54, %v1844_v53  ;;  %v1234_v58 = vpop.f32.mrb[116].mxu1 }
 0x26d   : > { %v1235_v5 = vadd.f32 %v1234_v58, %v5494_v42  ;;  %v1236_v46 = vpop.f32.mrb[117].mxu1 }
 0x26e   : > { %v1237_v10 = vadd.f32 %v1236_v46, %v5497_v23  ;;  %v1238_v55 = vpop.f32.mrb[118].mxu1  ;;  %3158 = vmatprep.mubr.bf16.mxu0 %v2004_v43  ;;  %v447_v46 = vsub.s32 6, %v5274_v63 }
 0x26f   : > { %v1239_v49 = vadd.f32 %v1238_v55, %v5494_v42  ;;  %v1240_v20 = vpop.f32.mrb[119].mxu1  ;;  %3159 = vmatmul.mubr.bf16.gmra.mrb[112].mxu0 %v2003_v7  ;;  %v1859_v18 = vmax.f32 %v1235_v5, 0.0 }
 0x270   : > { %v1241_v52 = vadd.f32 %v1240_v20, %v5497_v23  ;;  %v1860_v24 = vmax.f32 %v1237_v10, 0.0 }
 0x271   : > { %v1867_v4 = vmax.f32 %v1239_v49, 0.0  ;;  %2926 = vmatmul.mubr.bf16.gmra.mrb[224].mxu1 %v5382_v21  ;;  %v451_v49 = vsub.s32 7, %v5274_v63 }
 0x272   : > { %v1868_v56 = vmax.f32 %v1241_v52, 0.0  ;;  %2935 = vmatprep.mubr.bf16.mxu1 %v5394_v50 }
 0x273   : > { %v2011_v37 = vpack.c.bf16 %v1867_v4, %v1859_v18  ;;  %v4667_v4 = vld [vmem:[#allocation7] sm:$0xff] }
 0x274   : > { %v2012_v26 = vpack.c.bf16 %v1868_v56, %v1860_v24  ;;  %v1244_v15 = vpop.f32.mrb[120].mxu1  ;;  %v5697_v24 = vrot.slane %v4667_v4, %v447_v46 }
 0x275   : > { %v1245_v44 = vadd.f32 %v1244_v15, %v5494_v42  ;;  %v1246_v34 = vpop.f32.mrb[121].mxu1 }
 0x276   : > { %v1247_v35 = vadd.f32 %v1246_v34, %v5497_v23  ;;  %v1248_v57 = vpop.f32.mrb[122].mxu1  ;;  %3168 = vmatprep.mubr.bf16.mxu0 %v2012_v26  ;;  %v5700_v26 = vrot.slane %v4667_v4, %v451_v49 }
 0x277   : > { %v1249_v2 = vadd.f32 %v1248_v57, %v5494_v42  ;;  %v1250_v29 = vpop.f32.mrb[123].mxu1  ;;  %3169 = vmatmul.mubr.bf16.gmra.mrb[116].mxu0 %v2011_v37  ;;  %v1875_v59 = vmax.f32 %v1245_v44, 0.0 }
 0x278   : > { %v1251_v21 = vadd.f32 %v1250_v29, %v5497_v23  ;;  %v1876_v50 = vmax.f32 %v1247_v35, 0.0 }
 0x279   : > { %v1883_v28 = vmax.f32 %v1249_v2, 0.0  ;;  %2936 = vmatmul.mubr.bf16.gmra.mrb[228].mxu1 %v5392_v61 }
 0x27a   : > { %v1884_v53 = vmax.f32 %v1251_v21, 0.0  ;;  %2945 = vmatprep.mubr.bf16.mxu1 %v5404_v19 }
 0x27b   : > { %v2019_v54 = vpack.c.bf16 %v1883_v28, %v1875_v59 }
 0x27c   : > { %v2020_v7 = vpack.c.bf16 %v1884_v53, %v1876_v50  ;;  %v1254_v43 = vpop.f32.mrb[124].mxu1  ;;  %v4608_v53 = vld [vmem:[#allocation8 + $0x300] ss:$8 sps:$4 sm:$0xff]  }
 0x27d   : > { %v1255_v58 = vadd.f32 %v1254_v43, %v5494_v42  ;;  %v1256_v5 = vpop.f32.mrb[125].mxu1  ;;  %v4613_v43 = vld [vmem:[#allocation8 + $0x314] ss:$8 sps:$4 sm:$0xff]  }
 0x27e   : > { %v1257_v10 = vadd.f32 %v1256_v5, %v5497_v23  ;;  %v1258_v55 = vpop.f32.mrb[126].mxu1  ;;  %3178 = vmatprep.mubr.bf16.mxu0 %v2020_v7 }
 0x27f   : > { %v1259_v61 = vadd.f32 %v1258_v55, %v5494_v42  ;;  %v1260_v20 = vpop.f32.mrb[127].mxu1  ;;  %3179 = vmatmul.mubr.bf16.gmra.mrb[120].mxu0 %v2019_v54  ;;  %v1891_v52 = vmax.f32 %v1255_v58, 0.0  ;;  %v4611_v55 = vld [vmem:[#allocation8 + $0x310] ss:$8 sps:$4 sm:$0xff]  }
 0x280   : > { %v1261_v19 = vadd.f32 %v1260_v20, %v5497_v23  ;;  %v1892_v56 = vmax.f32 %v1257_v10, 0.0  ;;  %v4616_v20 = vld [vmem:[#allocation8 + $0x324] ss:$8 sps:$4 sm:$0xff]  }
 0x281   : > { %v1899_v18 = vmax.f32 %v1259_v61, 0.0  ;;  %2946 = vmatmul.mubr.bf16.gmra.mrb[232].mxu1 %v5402_v17 }
 0x282   : > { %v1900_v37 = vmax.f32 %v1261_v19, 0.0  ;;  %2955 = vmatprep.mubr.bf16.mxu1 %v5425_v12 }
 0x283   : > { %v2027_v15 = vpack.c.bf16 %v1899_v18, %v1891_v52  ;;  %v4614_v18 = vld [vmem:[#allocation8 + $0x320] ss:$8 sps:$4 sm:$0xff]  }
 0x284   : > { %v2028_v44 = vpack.c.bf16 %v1900_v37, %v1892_v56  ;;  %v1490_v42 = vpop.f32.mrb[128].mxu1  ;;  %v4619_v56 = vld [vmem:[#allocation8 + $0x334] ss:$8 sps:$4 sm:$0xff]  }
 0x285   : > { %v1491_v34 = vadd.f32 %v1490_v42, %v5697_v24  ;;  %v1492_v35 = vpop.f32.mrb[129].mxu1 }
 0x286   : > { %3188 = vmatprep.mubr.bf16.mxu0 %v2028_v44  ;;  %v1493_v23 = vadd.f32 %v1492_v35, %v5700_v26  ;;  %v1494_v57 = vpop.f32.mrb[130].mxu1  ;;  %v4617_v35 = vld [vmem:[#allocation8 + $0x330] ss:$8 sps:$4 sm:$0xff]  }
 0x287   : > { %3189 = vmatmul.mubr.bf16.gmra.mrb[124].mxu0 %v2027_v15  ;;  %v1655_v17 = vmax.f32 %v1491_v34, 0.0  ;;  %v1495_v2 = vadd.f32 %v1494_v57, %v5697_v24  ;;  %v1496_v29 = vpop.f32.mrb[131].mxu1 }
 0x288   : > { %3231 = vmatprep.mubr.bf16.mxu0 %v5434_v38  ;;  %v1656_v12 = vmax.f32 %v1493_v23, 0.0  ;;  %v1497_v21 = vadd.f32 %v1496_v29, %v5700_v26 }
 0x289   : > { %2956 = vmatmul.mubr.bf16.gmra.mrb[236].mxu1 %v5420_v6  ;;  %v1663_v59 = vmax.f32 %v1495_v2, 0.0 }
 0x28a   : > { %2965 = vmatprep.mubr.bf16.mxu1 %v5443_v13  ;;  %v1664_v28 = vmax.f32 %v1497_v21, 0.0 }
 0x28b   : > { %v5709_v50 = vpack.c.bf16 %v1663_v59, %v1655_v17  ;;  %v4622_v17 = vld [vmem:[#allocation8 + $0x344] ss:$8 sps:$4 sm:$0xff]   ;;  %v4625_v59 = vld [vmem:[#allocation8 + $0x354] ss:$8 sps:$4 sm:$0xff]  }
 0x28c   : > { %v5711_v54 = vpack.c.bf16 %v1664_v28, %v1656_v12  ;;  %v1500_v7 = vpop.f32.mrb[132].mxu1  ;;  %v4620_v12 = vld [vmem:[#allocation8 + $0x340] ss:$8 sps:$4 sm:$0xff]  }
 0x28d   : > { %v1501_v58 = vadd.f32 %v1500_v7, %v5697_v24  ;;  %v1502_v5 = vpop.f32.mrb[133].mxu1 }
 0x28e   : > { %v1503_v38 = vadd.f32 %v1502_v5, %v5700_v26  ;;  %v1504_v46 = vpop.f32.mrb[134].mxu1  ;;  %v6340_v5 = vld [vmem:[#allocation19_spill] sm:$0xff] }
 0x28f   : > { %3232 = vmatmul.mubr.bf16.vlgmr.msra.gmra.mrb[64].mxu0 %v5431_v33  ;;  %v1671_v6 = vmax.f32 %v1501_v58, 0.0  ;;  %v1505_v10 = vadd.f32 %v1504_v46, %v5697_v24  ;;  %v1506_v13 = vpop.f32.mrb[135].mxu1 }
 0x290   : > { %3241 = vmatprep.mubr.bf16.mxu0 %v5452_v39  ;;  %3393 = vmatpush1.bf16.msra.mxu0 %v4608_v53  ;;  %v1672_v49 = vmax.f32 %v1503_v38, 0.0  ;;  %v1507_v61 = vadd.f32 %v1506_v13, %v5700_v26  ;;  %v4623_v38 = vld [vmem:[#allocation8 + $0x350] ss:$8 sps:$4 sm:$0xff]   ;;  %v4628_v13 = vld [vmem:[#allocation8 + $0x364] ss:$8 sps:$4 sm:$0xff]  }
 0x291   : > { %2966 = vmatmul.mubr.bf16.gmra.mrb[240].mxu1 %v5438_v14  ;;  %3394 = vmatprep.subr.bf16.mxu0 %v4613_v43  ;;  %v1679_v19 = vmax.f32 %v1505_v10, 0.0  ;;  %v6341_v10 = vld [vmem:[#allocation17_spill] sm:$0xff] }
 0x292   : > { %2975 = vmatprep.mubr.bf16.mxu1 %v5461_v32  ;;  %v1680_v52 = vmax.f32 %v1507_v61, 0.0 }
 0x293   : > { %v5721_v33 = vpack.c.bf16 %v1679_v19, %v1671_v6 }
 0x294   : > { %3395 = vmatpush1.bf16.msra.mxu0 %v4611_v55  ;;  %v5723_v4 = vpack.c.bf16 %v1680_v52, %v1672_v49  ;;  %v1510_v39 = vpop.f32.mrb[136].mxu1  ;;  %v6342_v49 = vld [vmem:[#allocation21_spill] sm:$0xff] }
 0x295   : > { %3396 = vmatprep.subr.bf16.mxu0 %v4616_v20  ;;  %v1511_v37 = vadd.f32 %v1510_v39, %v5697_v24  ;;  %v1512_v15 = vpop.f32.mrb[137].mxu1  ;;  %v4626_v20 = vld [vmem:[#allocation8 + $0x360] ss:$8 sps:$4 sm:$0xff]  }
 0x296   : > { %v1513_v14 = vadd.f32 %v1512_v15, %v5700_v26  ;;  %v1514_v44 = vpop.f32.mrb[138].mxu1 }
 0x297   : > { %3242 = vmatmul.mubr.bf16.gmra.mrb[68].mxu0 %v5449_v1  ;;  %v1687_v42 = vmax.f32 %v1511_v37, 0.0  ;;  %v1515_v32 = vadd.f32 %v1514_v44, %v5697_v24  ;;  %v1516_v34 = vpop.f32.mrb[139].mxu1 }
 0x298   : > { %3251 = vmatprep.mubr.bf16.mxu0 %v5470_v51  ;;  %3397 = vmatpush1.bf16.msra.mxu0 %v4614_v18  ;;  %v1688_v23 = vmax.f32 %v1513_v14, 0.0  ;;  %v1517_v57 = vadd.f32 %v1516_v34, %v5700_v26  ;;  %v4631_v18 = vld [vmem:[#allocation8 + $0x374] ss:$8 sps:$4 sm:$0xff]   ;;  %v6343_v14 = vld [vmem:[#allocation18_spill] sm:$0xff] }
 0x299   : > { %2976 = vmatmul.mubr.bf16.gmra.mrb[244].mxu1 %v5456_v8  ;;  %3398 = vmatprep.subr.bf16.mxu0 %v4619_v56  ;;  %v1695_v2 = vmax.f32 %v1515_v32, 0.0  ;;  %v6344_v34 = vld [vmem:[#allocation23_spill] sm:$0xff] }
 0x29a   : > { %2985 = vmatprep.mubr.bf16.mxu1 %v5479_v30  ;;  %v1696_v29 = vmax.f32 %v1517_v57, 0.0 }
 0x29b   : > { %v5733_v1 = vpack.c.bf16 %v1695_v2, %v1687_v42  ;;  %v4634_v2 = vld [vmem:[#allocation8 + $0x384] ss:$8 sps:$4 sm:$0xff]  }
 0x29c   : > { %3399 = vmatpush1.bf16.msra.mxu0 %v4617_v35  ;;  %v5735_v21 = vpack.c.bf16 %v1696_v29, %v1688_v23  ;;  %v1520_v51 = vpop.f32.mrb[140].mxu1  ;;  %v4629_v35 = vld [vmem:[#allocation8 + $0x370] ss:$8 sps:$4 sm:$0xff]  }
 0x29d   : > { %3400 = vmatprep.subr.bf16.mxu0 %v4622_v17  ;;  %v1521_v28 = vadd.f32 %v1520_v51, %v5697_v24  ;;  %v1522_v53 = vpop.f32.mrb[141].mxu1  ;;  %v6345_v17 = vld [vmem:[#allocation20_spill] sm:$0xff] }
 0x29e   : > { %v1523_v8 = vadd.f32 %v1522_v53, %v5700_v26  ;;  %v1524_v7 = vpop.f32.mrb[142].mxu1 }
 0x29f   : > { %3252 = vmatmul.mubr.bf16.gmra.mrb[72].mxu0 %v5467_v40  ;;  %v1703_v43 = vmax.f32 %v1521_v28, 0.0  ;;  %v1525_v30 = vadd.f32 %v1524_v7, %v5697_v24  ;;  %v1526_v58 = vpop.f32.mrb[143].mxu1 }
 0x2a0   : > { %3261 = vmatprep.mubr.bf16.mxu0 %v6340_v5  ;;  %3401 = vmatpush1.bf16.msra.mxu0 %v4620_v12  ;;  %v1704_v46 = vmax.f32 %v1523_v8, 0.0  ;;  %v1527_v6 = vadd.f32 %v1526_v58, %v5700_v26  ;;  %v4637_v8 = vld [vmem:[#allocation8 + $0x394] ss:$8 sps:$4 sm:$0xff]   ;;  %v6346_v5 = vld [vmem:[#allocation22_spill] sm:$0xff] }
 0x2a1   : > { %2986 = vmatmul.mubr.bf16.gmra.mrb[248].mxu1 %v6341_v10  ;;  %3402 = vmatprep.subr.bf16.mxu0 %v4625_v59  ;;  %v1711_v55 = vmax.f32 %v1525_v30, 0.0  ;;  %v4632_v59 = vld [vmem:[#allocation8 + $0x380] ss:$8 sps:$4 sm:$0xff]  }
 0x2a2   : > { %2995 = vmatprep.mubr.bf16.mxu1 %v6342_v49  ;;  %v1712_v61 = vmax.f32 %v1527_v6, 0.0  ;;  %v6347_v10 = vld [vmem:[#allocation25_spill] sm:$0xff] }
 0x2a3   : > { %v5745_v40 = vpack.c.bf16 %v1711_v55, %v1703_v43 }
 0x2a4   : > { %3403 = vmatpush1.bf16.msra.mxu0 %v4623_v38  ;;  %v5747_v19 = vpack.c.bf16 %v1712_v61, %v1704_v46  ;;  %v1530_v52 = vpop.f32.mrb[144].mxu1 }
 0x2a5   : > { %3404 = vmatprep.subr.bf16.mxu0 %v4628_v13  ;;  %v1531_v39 = vadd.f32 %v1530_v52, %v5697_v24  ;;  %v1532_v56 = vpop.f32.mrb[145].mxu1  ;;  %v4635_v13 = vld [vmem:[#allocation8 + $0x390] ss:$8 sps:$4 sm:$0xff]  }
 0x2a6   : > { %v1533_v37 = vadd.f32 %v1532_v56, %v5700_v26  ;;  %v1534_v15 = vpop.f32.mrb[146].mxu1 }
 0x2a7   : > { %3262 = vmatmul.mubr.bf16.gmra.mrb[76].mxu0 %v6343_v14  ;;  %v1719_v44 = vmax.f32 %v1531_v39, 0.0  ;;  %v1535_v42 = vadd.f32 %v1534_v15, %v5697_v24  ;;  %v1536_v32 = vpop.f32.mrb[147].mxu1 }
 0x2a8   : > { %3271 = vmatprep.mubr.bf16.mxu0 %v6344_v34  ;;  %3405 = vmatpush1.bf16.msra.mxu0 %v4626_v20  ;;  %v1720_v23 = vmax.f32 %v1533_v37, 0.0  ;;  %v1537_v57 = vadd.f32 %v1536_v32, %v5700_v26  ;;  %v4640_v20 = vld [vmem:[#allocation8 + $0x3a4] ss:$8 sps:$4 sm:$0xff]   ;;  %v4638_v37 = vld [vmem:[#allocation8 + $0x3a0] ss:$8 sps:$4 sm:$0xff]   ;;  %v6348_v34 = vld [vmem:[#allocation24_spill] sm:$0xff] }
 0x2a9   : > { %2996 = vmatmul.mubr.bf16.gmra.mrb[252].mxu1 %v6345_v17  ;;  %3406 = vmatprep.subr.bf16.mxu0 %v4631_v18  ;;  %v1727_v29 = vmax.f32 %v1535_v42, 0.0  ;;  %v6349_v17 = vld [vmem:[#allocation27_spill] sm:$0xff] }
 0x2aa   : > { %v1728_v12 = vmax.f32 %v1537_v57, 0.0 }
 0x2ab   : > { %v5756_v51 = vpack.c.bf16 %v1727_v29, %v1719_v44  ;;  %v4643_v44 = vld [vmem:[#allocation8 + $0x3b4] ss:$8 sps:$4 sm:$0xff]  }
 0x2ac   : > { %3407 = vmatpush1.bf16.msra.mxu0 %v4629_v35  ;;  %v5758_v28 = vpack.c.bf16 %v1728_v12, %v1720_v23  ;;  %v1540_v53 = vpop.f32.mrb[148].mxu1  ;;  %v4641_v12 = vld [vmem:[#allocation8 + $0x3b0] ss:$8 sps:$4 sm:$0xff]  }
 0x2ad   : > { %3408 = vmatprep.subr.bf16.mxu0 %v4634_v2  ;;  %v1541_v7 = vadd.f32 %v1540_v53, %v5697_v24  ;;  %v1542_v43 = vpop.f32.mrb[149].mxu1  ;;  %v4646_v53 = vld [vmem:[#allocation8 + $0x3c4] ss:$8 sps:$4 sm:$0xff]  }
 0x2ae   : > { %v1543_v30 = vadd.f32 %v1542_v43, %v5700_v26  ;;  %v1544_v58 = vpop.f32.mrb[150].mxu1 }
 0x2af   : > { %3272 = vmatmul.mubr.bf16.gmra.mrb[80].mxu0 %v6346_v5  ;;  %v1735_v38 = vmax.f32 %v1541_v7, 0.0  ;;  %v1545_v46 = vadd.f32 %v1544_v58, %v5697_v24  ;;  %v1546_v6 = vpop.f32.mrb[151].mxu1  ;;  %v4644_v58 = vld [vmem:[#allocation8 + $0x3c0] ss:$8 sps:$4 sm:$0xff]  }
 0x2b0   : > { %3281 = vmatprep.mubr.bf16.mxu0 %v6347_v10  ;;  %3409 = vmatpush1.bf16.msra.mxu0 %v4632_v59  ;;  %v1736_v55 = vmax.f32 %v1543_v30, 0.0  ;;  %v1547_v49 = vadd.f32 %v1546_v6, %v5700_v26 }
 0x2b1   : > { %3410 = vmatprep.subr.bf16.mxu0 %v4637_v8  ;;  %v1743_v61 = vmax.f32 %v1545_v46, 0.0  ;;  %v4649_v46 = vld [vmem:[#allocation8 + $0x3d4] ss:$8 sps:$4 sm:$0xff]  }
 0x2b2   : > { %v1744_v52 = vmax.f32 %v1547_v49, 0.0 }
 0x2b3   : > { %v5766_v18 = vpack.c.bf16 %v1743_v61, %v1735_v38 }
 0x2b4   : > { %3411 = vmatpush1.bf16.msra.mxu0 %v4635_v13  ;;  %v5768_v39 = vpack.c.bf16 %v1744_v52, %v1736_v55  ;;  %v1550_v56 = vpop.f32.mrb[152].mxu1  ;;  %v6350_v13 = vld [vmem:[#allocation26_spill] sm:$0xff] }
 0x2b5   : > { %v1551_v15 = vadd.f32 %v1550_v56, %v5697_v24  ;;  %v1552_v14 = vpop.f32.mrb[153].mxu1  ;;  %3412 = vmatprep.subr.bf16.mxu0 %v4640_v20  ;;  %v4647_v56 = vld [vmem:[#allocation8 + $0x3d0] ss:$8 sps:$4 sm:$0xff]  }
 0x2b6   : > { %v1553_v42 = vadd.f32 %v1552_v14, %v5700_v26  ;;  %v1554_v32 = vpop.f32.mrb[154].mxu1 }
 0x2b7   : > { %3282 = vmatmul.mubr.bf16.gmra.mrb[84].mxu0 %v6348_v34  ;;  %v1751_v35 = vmax.f32 %v1551_v15, 0.0  ;;  %v1555_v23 = vadd.f32 %v1554_v32, %v5697_v24  ;;  %v1556_v57 = vpop.f32.mrb[155].mxu1  ;;  %v4652_v15 = vld [vmem:[#allocation8 + $0x3e4] ss:$8 sps:$4 sm:$0xff]   ;;  %v4650_v34 = vld [vmem:[#allocation8 + $0x3e0] ss:$8 sps:$4 sm:$0xff]  }
 0x2b8   : > { %3291 = vmatprep.mubr.bf16.mxu0 %v6349_v17  ;;  %v1752_v2 = vmax.f32 %v1553_v42, 0.0  ;;  %v1557_v29 = vadd.f32 %v1556_v57, %v5700_v26  ;;  %3413 = vmatpush1.bf16.msra.mxu0 %v4638_v37 }
 0x2b9   : > { %v1759_v59 = vmax.f32 %v1555_v23, 0.0  ;;  %3414 = vmatprep.subr.bf16.mxu0 %v4643_v44 }
 0x2ba   : > { %v1760_v8 = vmax.f32 %v1557_v29, 0.0 }
 0x2bb   : > { %v5776_v7 = vpack.c.bf16 %v1759_v59, %v1751_v35 }
 0x2bc   : > { %v5778_v43 = vpack.c.bf16 %v1760_v8, %v1752_v2  ;;  %v1560_v30 = vpop.f32.mrb[156].mxu1  ;;  %3415 = vmatpush1.bf16.msra.mxu0 %v4641_v12  ;;  %v6351_v2 = vld [vmem:[#allocation28_spill] sm:$0xff] }
 0x2bd   : > { %v1561_v5 = vadd.f32 %v1560_v30, %v5697_v24  ;;  %v1562_v38 = vpop.f32.mrb[157].mxu1  ;;  %3416 = vmatprep.subr.bf16.mxu0 %v4646_v53  ;;  %v4653_v30 = vld [vmem:[#allocation8 + $0x3f0] ss:$8 sps:$4 sm:$0xff]  }
 0x2be   : > { %v1563_v6 = vadd.f32 %v1562_v38, %v5700_v26  ;;  %v1564_v10 = vpop.f32.mrb[158].mxu1 }
 0x2bf   : > { %3292 = vmatmul.mubr.bf16.gmra.mrb[88].mxu0 %v6350_v13  ;;  %v1767_v55 = vmax.f32 %v1561_v5, 0.0  ;;  %v1565_v49 = vadd.f32 %v1564_v10, %v5697_v24  ;;  %v1566_v61 = vpop.f32.mrb[159].mxu1 }
 0x2c0   : > { %3301 = vmatprep.mubr.bf16.mxu0 %v5556_v0  ;;  %v1768_v20 = vmax.f32 %v1563_v6, 0.0  ;;  %v1567_v52 = vadd.f32 %v1566_v61, %v5700_v26  ;;  %3417 = vmatpush1.bf16.msra.mxu0 %v4644_v58  ;;  %v4655_v0 = vld [vmem:[#allocation8 + $0x3f4] ss:$8 sps:$4 sm:$0xff]  }
 0x2c1   : > { %v1775_v37 = vmax.f32 %v1565_v49, 0.0  ;;  %3418 = vmatprep.subr.bf16.mxu0 %v4649_v46  ;;  %v6352_v49 = vld [vmem:[#allocation29_spill] sm:$0xff] }
 0x2c2   : > { %v1776_v14 = vmax.f32 %v1567_v52, 0.0 }
 0x2c3   : > { %v5786_v44 = vpack.c.bf16 %v1775_v37, %v1767_v55 }
 0x2c4   : > { %v5788_v42 = vpack.c.bf16 %v1776_v14, %v1768_v20  ;;  %v1570_v32 = vpop.f32.mrb[160].mxu1  ;;  %3419 = vmatpush1.bf16.msra.mxu0 %v4647_v56 }
 0x2c5   : > { %v1571_v35 = vadd.f32 %v1570_v32, %v5697_v24  ;;  %v1572_v23 = vpop.f32.mrb[161].mxu1  ;;  %3420 = vmatprep.subr.bf16.mxu0 %v4652_v15 }
 0x2c6   : > { %v1573_v57 = vadd.f32 %v1572_v23, %v5700_v26  ;;  %v1574_v17 = vpop.f32.mrb[162].mxu1 }
 0x2c7   : > { %3302 = vmatmul.mubr.bf16.gmra.mrb[92].mxu0 %v6351_v2  ;;  %v1783_v29 = vmax.f32 %v1571_v35, 0.0  ;;  %v1575_v12 = vadd.f32 %v1574_v17, %v5697_v24  ;;  %v1576_v59 = vpop.f32.mrb[163].mxu1 }
 0x2c8   : > { %3311 = vmatprep.mubr.bf16.mxu0 %v5570_v16  ;;  %v1784_v53 = vmax.f32 %v1573_v57, 0.0  ;;  %v1577_v8 = vadd.f32 %v1576_v59, %v5700_v26  ;;  %3421 = vmatpush1.bf16.msra.mxu0 %v4650_v34 }
 0x2c9   : > { %v1791_v58 = vmax.f32 %v1575_v12, 0.0  ;;  %3422 = vmatprep.subr.bf16.mxu0 %v4655_v0 }
 0x2ca   : > { %v1792_v5 = vmax.f32 %v1577_v8, 0.0 }
 0x2cb   : > { %v5796_v38 = vpack.c.bf16 %v1791_v58, %v1783_v29 }
 0x2cc   : > { %v5798_v46 = vpack.c.bf16 %v1792_v5, %v1784_v53  ;;  %v1580_v6 = vpop.f32.mrb[164].mxu1  ;;  %3423 = vmatpush1.bf16.msra.mxu0 %v4653_v30 }
 0x2cd   : > { %v1581_v10 = vadd.f32 %v1580_v6, %v5697_v24  ;;  %v1582_v13 = vpop.f32.mrb[165].mxu1 }
 0x2ce   : > { %v1583_v55 = vadd.f32 %v1582_v13, %v5700_v26  ;;  %v1584_v16 = vpop.f32.mrb[166].mxu1 }
 0x2cf   : > { %3312 = vmatmul.mubr.bf16.gmra.mrb[96].mxu0 %v6352_v49  ;;  %v1799_v61 = vmax.f32 %v1581_v10, 0.0  ;;  %v1585_v20 = vadd.f32 %v1584_v16, %v5697_v24  ;;  %v1586_v52 = vpop.f32.mrb[167].mxu1 }
 0x2d0   : > { %3321 = vmatprep.mubr.bf16.mxu0 %v5584_v45  ;;  %v1800_v56 = vmax.f32 %v1583_v55, 0.0  ;;  %v1587_v37 = vadd.f32 %v1586_v52, %v5700_v26 }
 0x2d1   : > { %v1807_v15 = vmax.f32 %v1585_v20, 0.0 }
 0x2d2   : > { %v1808_v14 = vmax.f32 %v1587_v37, 0.0 }
 0x2d3   : > { %v5806_v32 = vpack.c.bf16 %v1807_v15, %v1799_v61 }
 0x2d4   : > { %v5808_v34 = vpack.c.bf16 %v1808_v14, %v1800_v56  ;;  %v1590_v35 = vpop.f32.mrb[168].mxu1 }
 0x2d5   : > { %v1591_v23 = vadd.f32 %v1590_v35, %v5697_v24  ;;  %v1592_v0 = vpop.f32.mrb[169].mxu1 }
 0x2d6   : > { %v1593_v57 = vadd.f32 %v1592_v0, %v5700_v26  ;;  %v1594_v17 = vpop.f32.mrb[170].mxu1 }
 0x2d7   : > { %3322 = vmatmul.mubr.bf16.gmra.mrb[100].mxu0 %v5581_v25  ;;  %v1815_v2 = vmax.f32 %v1591_v23, 0.0  ;;  %v1595_v45 = vadd.f32 %v1594_v17, %v5697_v24  ;;  %v1596_v29 = vpop.f32.mrb[171].mxu1 }
 0x2d8   : > { %3331 = vmatprep.mubr.bf16.mxu0 %v5598_v3  ;;  %v1816_v12 = vmax.f32 %v1593_v57, 0.0  ;;  %v1597_v59 = vadd.f32 %v1596_v29, %v5700_v26 }
 0x2d9   : > { %v1823_v53 = vmax.f32 %v1595_v45, 0.0 }
 0x2da   : > { %v1824_v8 = vmax.f32 %v1597_v59, 0.0 }
 0x2db   : > { %v5816_v30 = vpack.c.bf16 %v1823_v53, %v1815_v2 }
 0x2dc   : > { %v5818_v58 = vpack.c.bf16 %v1824_v8, %v1816_v12  ;;  %v1600_v5 = vpop.f32.mrb[172].mxu1 }
 0x2dd   : > { %v1601_v6 = vadd.f32 %v1600_v5, %v5697_v24  ;;  %v1602_v10 = vpop.f32.mrb[173].mxu1 }
 0x2de   : > { %v1603_v25 = vadd.f32 %v1602_v10, %v5700_v26  ;;  %v1604_v13 = vpop.f32.mrb[174].mxu1 }
 0x2df   : > { %3332 = vmatmul.mubr.bf16.gmra.mrb[104].mxu0 %v5595_v31  ;;  %v1831_v55 = vmax.f32 %v1601_v6, 0.0  ;;  %v1605_v3 = vadd.f32 %v1604_v13, %v5697_v24  ;;  %v1606_v16 = vpop.f32.mrb[175].mxu1 }
 0x2e0   : > { %3341 = vmatprep.mubr.bf16.mxu0 %v5612_v27  ;;  %v1832_v49 = vmax.f32 %v1603_v25, 0.0  ;;  %v1607_v61 = vadd.f32 %v1606_v16, %v5700_v26 }
 0x2e1   : > { %v1839_v20 = vmax.f32 %v1605_v3, 0.0 }
 0x2e2   : > { %v1840_v52 = vmax.f32 %v1607_v61, 0.0 }
 0x2e3   : > { %v5826_v56 = vpack.c.bf16 %v1839_v20, %v1831_v55 }
 0x2e4   : > { %v5828_v37 = vpack.c.bf16 %v1840_v52, %v1832_v49  ;;  %v1610_v15 = vpop.f32.mrb[176].mxu1 }
 0x2e5   : > { %v1611_v14 = vadd.f32 %v1610_v15, %v5697_v24  ;;  %v1612_v35 = vpop.f32.mrb[177].mxu1 }
 0x2e6   : > { %v1613_v31 = vadd.f32 %v1612_v35, %v5700_v26  ;;  %v1614_v23 = vpop.f32.mrb[178].mxu1 }
 0x2e7   : > { %3342 = vmatmul.mubr.bf16.gmra.mrb[108].mxu0 %v5609_v48  ;;  %v1847_v0 = vmax.f32 %v1611_v14, 0.0  ;;  %v1615_v27 = vadd.f32 %v1614_v23, %v5697_v24  ;;  %v1616_v57 = vpop.f32.mrb[179].mxu1 }
 0x2e8   : > { %3351 = vmatprep.mubr.bf16.mxu0 %v5626_v41  ;;  %v1848_v17 = vmax.f32 %v1613_v31, 0.0  ;;  %v1617_v2 = vadd.f32 %v1616_v57, %v5700_v26 }
 0x2e9   : > { %v1855_v45 = vmax.f32 %v1615_v27, 0.0 }
 0x2ea   : > { %v1856_v29 = vmax.f32 %v1617_v2, 0.0 }
 0x2eb   : > { %v5836_v12 = vpack.c.bf16 %v1855_v45, %v1847_v0 }
 0x2ec   : > { %v5838_v59 = vpack.c.bf16 %v1856_v29, %v1848_v17  ;;  %v1620_v53 = vpop.f32.mrb[180].mxu1 }
 0x2ed   : > { %v1621_v8 = vadd.f32 %v1620_v53, %v5697_v24  ;;  %v1622_v5 = vpop.f32.mrb[181].mxu1 }
 0x2ee   : > { %v1623_v48 = vadd.f32 %v1622_v5, %v5700_v26  ;;  %v1624_v6 = vpop.f32.mrb[182].mxu1 }
 0x2ef   : > { %3352 = vmatmul.mubr.bf16.gmra.mrb[112].mxu0 %v5623_v11  ;;  %v1863_v10 = vmax.f32 %v1621_v8, 0.0  ;;  %v1625_v41 = vadd.f32 %v1624_v6, %v5697_v24  ;;  %v1626_v25 = vpop.f32.mrb[183].mxu1 }
 0x2f0   : > { %3361 = vmatprep.mubr.bf16.mxu0 %v5640_v36  ;;  %v1864_v13 = vmax.f32 %v1623_v48, 0.0  ;;  %v1627_v55 = vadd.f32 %v1626_v25, %v5700_v26 }
 0x2f1   : > { %v1871_v3 = vmax.f32 %v1625_v41, 0.0 }
 0x2f2   : > { %v1872_v16 = vmax.f32 %v1627_v55, 0.0 }
 0x2f3   : > { %v5846_v49 = vpack.c.bf16 %v1871_v3, %v1863_v10 }
 0x2f4   : > { %v5848_v61 = vpack.c.bf16 %v1872_v16, %v1864_v13  ;;  %v1630_v20 = vpop.f32.mrb[184].mxu1 }
 0x2f5   : > { %v1631_v52 = vadd.f32 %v1630_v20, %v5697_v24  ;;  %v1632_v15 = vpop.f32.mrb[185].mxu1 }
 0x2f6   : > { %v1633_v11 = vadd.f32 %v1632_v15, %v5700_v26  ;;  %v1634_v14 = vpop.f32.mrb[186].mxu1 }
 0x2f7   : > { %3362 = vmatmul.mubr.bf16.gmra.mrb[116].mxu0 %v5637_v60  ;;  %v1879_v35 = vmax.f32 %v1631_v52, 0.0  ;;  %v1635_v36 = vadd.f32 %v1634_v14, %v5697_v24  ;;  %v1636_v31 = vpop.f32.mrb[187].mxu1 }
 0x2f8   : > { %3371 = vmatprep.mubr.bf16.mxu0 %v5654_v22  ;;  %v1880_v23 = vmax.f32 %v1633_v11, 0.0  ;;  %v1637_v0 = vadd.f32 %v1636_v31, %v5700_v26 }
 0x2f9   : > { %v1887_v27 = vmax.f32 %v1635_v36, 0.0 }
 0x2fa   : > { %v1888_v57 = vmax.f32 %v1637_v0, 0.0 }
 0x2fb   : > { %v5856_v17 = vpack.c.bf16 %v1887_v27, %v1879_v35 }
 0x2fc   : > { %v5858_v2 = vpack.c.bf16 %v1888_v57, %v1880_v23  ;;  %v1640_v45 = vpop.f32.mrb[188].mxu1 }
 0x2fd   : > { %v1641_v29 = vadd.f32 %v1640_v45, %v5697_v24  ;;  %v1642_v53 = vpop.f32.mrb[189].mxu1 }
 0x2fe   : > { %v1643_v60 = vadd.f32 %v1642_v53, %v5700_v26  ;;  %v1644_v8 = vpop.f32.mrb[190].mxu1 }
 0x2ff   : > { %3372 = vmatmul.mubr.bf16.gmra.mrb[120].mxu0 %v5651_v62  ;;  %v1895_v5 = vmax.f32 %v1641_v29, 0.0  ;;  %v1645_v22 = vadd.f32 %v1644_v8, %v5697_v24  ;;  %v1646_v48 = vpop.f32.mrb[191].mxu1 }
 0x300   : > { %3381 = vmatprep.mubr.bf16.mxu0 %v5668_v9  ;;  %v1896_v6 = vmax.f32 %v1643_v60, 0.0  ;;  %v1647_v10 = vadd.f32 %v1646_v48, %v5700_v26 }
 0x301   : > { %v1903_v41 = vmax.f32 %v1645_v22, 0.0 }
 0x302   : > { %v1904_v25 = vmax.f32 %v1647_v10, 0.0 }
 0x303   : > { %v5866_v13 = vpack.c.bf16 %v1903_v41, %v1895_v5 }
 0x304   : > { %v5868_v55 = vpack.c.bf16 %v1904_v25, %v1896_v6  ;;  %v5870_v3 = vpop.f32.mrb[192].mxu1 }
 0x305   : > { %v5872_v16 = vpop.f32.mrb[193].mxu1 }
 0x306   : > { %v5874_v62 = vpop.f32.mrb[194].mxu1 }
 0x307   : > { %v5876_v20 = vpop.f32.mrb[195].mxu1  ;;  %3382 = vmatmul.mubr.bf16.gmra.mrb[124].mxu0 %v5665_v47 }
 0x308   : > { %3424 = vmatprep.mubr.bf16.mxu0 %v5711_v54 }
 0x30c   : > { %v5880_v9 = vpop.f32.mrb[196].mxu1 }
 0x30d   : > { %v5882_v24 = vpop.f32.mrb[197].mxu1 }
 0x30e   : > { %v5884_v26 = vpop.f32.mrb[198].mxu1 }
 0x30f   : > { %v5886_v52 = vpop.f32.mrb[199].mxu1  ;;  %3425 = vmatmul.mubr.bf16.vlgmr.msra.gmra.mrb[64].mxu0 %v5709_v50 }
 0x310   : > { %3434 = vmatprep.mubr.bf16.mxu0 %v5723_v4 }
 0x314   : > { %v5890_v15 = vpop.f32.mrb[200].mxu1 }
 0x315   : > { %v5892_v11 = vpop.f32.mrb[201].mxu1 }
 0x316   : > { %v5894_v14 = vpop.f32.mrb[202].mxu1 }
 0x317   : > { %v5896_v47 = vpop.f32.mrb[203].mxu1  ;;  %3435 = vmatmul.mubr.bf16.gmra.mrb[68].mxu0 %v5721_v33 }
 0x318   : > { %3444 = vmatprep.mubr.bf16.mxu0 %v5735_v21 }
 0x31c   : > { %v5900_v54 = vpop.f32.mrb[204].mxu1 }
 0x31d   : > { %v5902_v35 = vpop.f32.mrb[205].mxu1 }
 0x31e   : > { %v5904_v36 = vpop.f32.mrb[206].mxu1 }
 0x31f   : > { %v5906_v50 = vpop.f32.mrb[207].mxu1  ;;  %3445 = vmatmul.mubr.bf16.gmra.mrb[72].mxu0 %v5733_v1 }
 0x320   : > { %3454 = vmatprep.mubr.bf16.mxu0 %v5747_v19 }
 0x324   : > { %v5910_v4 = vpop.f32.mrb[208].mxu1 }
 0x325   : > { %v5912_v31 = vpop.f32.mrb[209].mxu1 }
 0x326   : > { %v5914_v23 = vpop.f32.mrb[210].mxu1 }
 0x327   : > { %v5916_v33 = vpop.f32.mrb[211].mxu1  ;;  %3455 = vmatmul.mubr.bf16.gmra.mrb[76].mxu0 %v5745_v40 }
 0x328   : > { %3464 = vmatprep.mubr.bf16.mxu0 %v5758_v28 }
 0x32c   : > { %v5920_v21 = vpop.f32.mrb[212].mxu1 }
 0x32d   : > { %v5922_v0 = vpop.f32.mrb[213].mxu1 }
 0x32e   : > { %v5924_v27 = vpop.f32.mrb[214].mxu1 }
 0x32f   : > { %v5926_v1 = vpop.f32.mrb[215].mxu1  ;;  %3465 = vmatmul.mubr.bf16.gmra.mrb[80].mxu0 %v5756_v51 }
 0x330   : > { %3474 = vmatprep.mubr.bf16.mxu0 %v5768_v39 }
 0x334   : > { %v5930_v19 = vpop.f32.mrb[216].mxu1 }
 0x335   : > { %v5932_v57 = vpop.f32.mrb[217].mxu1 }
 0x336   : > { %v5934_v45 = vpop.f32.mrb[218].mxu1 }
 0x337   : > { %v5936_v40 = vpop.f32.mrb[219].mxu1  ;;  %3475 = vmatmul.mubr.bf16.gmra.mrb[84].mxu0 %v5766_v18 }
 0x338   : > { %3484 = vmatprep.mubr.bf16.mxu0 %v5778_v43 }
 0x33c   : > { %v5940_v28 = vpop.f32.mrb[220].mxu1 }
 0x33d   : > { %v5942_v29 = vpop.f32.mrb[221].mxu1 }
 0x33e   : > { %v5944_v53 = vpop.f32.mrb[222].mxu1 }
 0x33f   : > { %v5946_v51 = vpop.f32.mrb[223].mxu1  ;;  %3485 = vmatmul.mubr.bf16.gmra.mrb[88].mxu0 %v5776_v7 }
 0x340   : > { %3494 = vmatprep.mubr.bf16.mxu0 %v5788_v42 }
 0x344   : > { %v5950_v39 = vpop.f32.mrb[224].mxu1 }
 0x345   : > { %v5952_v60 = vpop.f32.mrb[225].mxu1 }
 0x346   : > { %v5954_v8 = vpop.f32.mrb[226].mxu1 }
 0x347   : > { %v5956_v18 = vpop.f32.mrb[227].mxu1  ;;  %3495 = vmatmul.mubr.bf16.gmra.mrb[92].mxu0 %v5786_v44 }
 0x348   : > { %3504 = vmatprep.mubr.bf16.mxu0 %v5798_v46 }
 0x34c   : > { %v5960_v43 = vpop.f32.mrb[228].mxu1 }
 0x34d   : > { %v5962_v5 = vpop.f32.mrb[229].mxu1 }
 0x34e   : > { %v5964_v22 = vpop.f32.mrb[230].mxu1 }
 0x34f   : > { %v5966_v7 = vpop.f32.mrb[231].mxu1  ;;  %3505 = vmatmul.mubr.bf16.gmra.mrb[96].mxu0 %v5796_v38 }
 0x350   : > { %3514 = vmatprep.mubr.bf16.mxu0 %v5808_v34 }
 0x354   : > { %v5970_v42 = vpop.f32.mrb[232].mxu1 }
 0x355   : > { %v5972_v48 = vpop.f32.mrb[233].mxu1 }
 0x356   : > { %v5974_v6 = vpop.f32.mrb[234].mxu1 }
 0x357   : > { %v5976_v44 = vpop.f32.mrb[235].mxu1  ;;  %3515 = vmatmul.mubr.bf16.gmra.mrb[100].mxu0 %v5806_v32 }
 0x358   : > { %6353 = vst [vmem:[#allocation19_spill] sm:$0xff] %v5976_v44  ;;  %3524 = vmatprep.mubr.bf16.mxu0 %v5818_v58 }
 0x35c   : > { %v5980_v46 = vpop.f32.mrb[236].mxu1 }
 0x35d   : > { %v5982_v10 = vpop.f32.mrb[237].mxu1 }
 0x35e   : > { %v5984_v41 = vpop.f32.mrb[238].mxu1 }
 0x35f   : > { %6354 = vst [vmem:[#allocation17_spill] sm:$0xff] %v5984_v41  ;;  %v5986_v38 = vpop.f32.mrb[239].mxu1  ;;  %3525 = vmatmul.mubr.bf16.gmra.mrb[104].mxu0 %v5816_v30 }
 0x360   : > { %6355 = vst [vmem:[#allocation21_spill] sm:$0xff] %v5986_v38  ;;  %3534 = vmatprep.mubr.bf16.mxu0 %v5828_v37 }
 0x364   : > { %v5990_v34 = vpop.f32.mrb[240].mxu1 }
 0x365   : > { %v5992_v25 = vpop.f32.mrb[241].mxu1 }
 0x366   : > { %v5994_v44 = vpop.f32.mrb[242].mxu1 }
 0x367   : > { %v5996_v32 = vpop.f32.mrb[243].mxu1  ;;  %3535 = vmatmul.mubr.bf16.gmra.mrb[108].mxu0 %v5826_v56 }
 0x368   : > { %6356 = vst [vmem:[#allocation18_spill] sm:$0xff] %v5996_v32  ;;  %3544 = vmatprep.mubr.bf16.mxu0 %v5838_v59 }
 0x36c   : > { %v6000_v58 = vpop.f32.mrb[244].mxu1 }
 0x36d   : > { %v6002_v41 = vpop.f32.mrb[245].mxu1 }
 0x36e   : > { %6357 = vst [vmem:[#allocation23_spill] sm:$0xff] %v6002_v41  ;;  %v6004_v38 = vpop.f32.mrb[246].mxu1 }
 0x36f   : > { %6358 = vst [vmem:[#allocation20_spill] sm:$0xff] %v6004_v38  ;;  %v6006_v30 = vpop.f32.mrb[247].mxu1  ;;  %3545 = vmatmul.mubr.bf16.gmra.mrb[112].mxu0 %v5836_v12 }
 0x370   : > { %6359 = vst [vmem:[#allocation22_spill] sm:$0xff] %v6006_v30  ;;  %3554 = vmatprep.mubr.bf16.mxu0 %v5848_v61 }
 0x374   : > { %v6010_v37 = vpop.f32.mrb[248].mxu1 }
 0x375   : > { %6360 = vst [vmem:[#allocation25_spill] sm:$0xff] %v6010_v37  ;;  %v6012_v32 = vpop.f32.mrb[249].mxu1 }
 0x376   : > { %6361 = vst [vmem:[#allocation24_spill] sm:$0xff] %v6012_v32  ;;  %v6014_v56 = vpop.f32.mrb[250].mxu1 }
 0x377   : > { %6362 = vst [vmem:[#allocation27_spill] sm:$0xff] %v6014_v56  ;;  %v6016_v59 = vpop.f32.mrb[251].mxu1  ;;  %3555 = vmatmul.mubr.bf16.gmra.mrb[116].mxu0 %v5846_v49  ;;  %v2161_v49 = vld [vmem:[%s320_s6] sm:$0x3] }
 0x378   : > { %6363 = vst [vmem:[#allocation26_spill] sm:$0xff] %v6016_v59  ;;  %3564 = vmatprep.mubr.bf16.mxu0 %v5858_v2  ;;  %v6368_v2 = vsub.s32 0, %v5274_v63 }
 0x37c   : > { %v6020_v30 = vpop.f32.mrb[252].mxu1 }
 0x37d   : > { %6364 = vst [vmem:[#allocation28_spill] sm:$0xff] %v6020_v30  ;;  %v6022_v38 = vpop.f32.mrb[253].mxu1 }
 0x37e   : > { %6365 = vst [vmem:[#allocation29_spill] sm:$0xff] %v6022_v38  ;;  %v6024_v12 = vpop.f32.mrb[254].mxu1  ;;  %v6038_v38 = vrot.slane %v2161_v49, %v6368_v2 }
 0x37f   : > { %6366 = vst [vmem:[#allocation30_spill] sm:$0xff] %v6024_v12  ;;  %v6026_v61 = vpop.f32.mrb[255].mxu1  ;;  %3565 = vmatmul.mubr.bf16.gmra.mrb[120].mxu0 %v5856_v17 }
 0x380   : > { %6367 = vst [vmem:[#allocation31_spill] sm:$0xff] %v6026_v61  ;;  %3574 = vmatprep.mubr.bf16.mxu0 %v5868_v55  ;;  %v6369_v61 = vsub.s32 1, %v5274_v63  ;;  %v2848_v17 = vadd.f32 %v5870_v3, %v6038_v38  ;;  %v2852_v30 = vadd.f32 %v5874_v62, %v6038_v38 }
 0x382   : > { %v6042_v12 = vrot.slane %v2161_v49, %v6369_v61 }
 0x384   : > { %v2854_v2 = vadd.f32 %v5876_v20, %v6042_v12  ;;  %v2858_v20 = vadd.f32 %v5880_v9, %v6038_v38 }
 0x387   : > { %3575 = vmatmul.mubr.bf16.gmra.mrb[124].mxu0 %v5866_v13  ;;  %v2850_v13 = vadd.f32 %v5872_v16, %v6042_v12 }
 0x3e2   : > { %v3426_v55 = vpop.f32.mrb[64].mxu0 }
 0x3e3   : > { %v4091_v59 = vadd.f32 %v3426_v55, %v2848_v17  ;;  %v3428_v56 = vpop.f32.mrb[65].mxu0 }
 0x3e4   : > { %v4093_v32 = vadd.f32 %v3428_v56, %v2850_v13  ;;  %v3430_v63 = vpop.f32.mrb[66].mxu0 }
 0x3e5   : > { %v3585_v61 = vmax.f32 %v4091_v59, 0.0  ;;  %v4095_v49 = vadd.f32 %v3430_v63, %v2852_v30  ;;  %v3432_v37 = vpop.f32.mrb[67].mxu0  ;;  %v2860_v30 = vadd.f32 %v5882_v24, %v6042_v12 }
 0x3e6   : > { %v3586_v41 = vmax.f32 %v4093_v32, 0.0  ;;  %v4097_v3 = vadd.f32 %v3432_v37, %v2854_v2  ;;  %v2862_v37 = vadd.f32 %v5884_v26, %v6038_v38  ;;  %v2868_v26 = vadd.f32 %v5890_v15, %v6038_v38 }
 0x3e7   : > { %3649 = vst [vmem:[%s6053_s24] sm:$0xff] %v3585_v61  ;;  %v3587_v16 = vmax.f32 %v4095_v49, 0.0 }
 0x3e8   : > { %3650 = vst [vmem:[%s6053_s24 + $0x8] sm:$0xff] %v3586_v41  ;;  %v3588_v62 = vmax.f32 %v4097_v3, 0.0  ;;  %v2864_v41 = vadd.f32 %v5886_v52, %v6042_v12  ;;  %v2870_v3 = vadd.f32 %v5892_v11, %v6042_v12 }
 0x3e9   : > { %3651 = vst [vmem:[%s6053_s24 + $0x10] sm:$0xff] %v3587_v16  ;;  %v2872_v16 = vadd.f32 %v5894_v14, %v6038_v38  ;;  %v2878_v14 = vadd.f32 %v5900_v54, %v6038_v38 }
 0x3ea   : > { %3652 = vst [vmem:[%s6053_s24 + $0x18] sm:$0xff] %v3588_v62  ;;  %v3436_v32 = vpop.f32.mrb[68].mxu0 }
 0x3eb   : > { %v4099_v56 = vadd.f32 %v3436_v32, %v2858_v20  ;;  %v3438_v59 = vpop.f32.mrb[69].mxu0 }
 0x3ec   : > { %v4101_v17 = vadd.f32 %v3438_v59, %v2860_v30  ;;  %v3440_v9 = vpop.f32.mrb[70].mxu0  ;;  %v2874_v30 = vadd.f32 %v5896_v47, %v6042_v12 }
 0x3ed   : > { %v3589_v13 = vmax.f32 %v4099_v56, 0.0  ;;  %v4103_v55 = vadd.f32 %v3440_v9, %v2862_v37  ;;  %v3442_v2 = vpop.f32.mrb[71].mxu0 }
 0x3ee   : > { %v3590_v63 = vmax.f32 %v4101_v17, 0.0  ;;  %v4105_v24 = vadd.f32 %v3442_v2, %v2864_v41 }
 0x3ef   : > { %3653 = vst [vmem:[%s6053_s24 + $0x20] sm:$0xff] %v3589_v13  ;;  %v3591_v61 = vmax.f32 %v4103_v55, 0.0  ;;  %v2880_v13 = vadd.f32 %v5902_v35, %v6042_v12  ;;  %v2882_v55 = vadd.f32 %v5904_v36, %v6038_v38  ;;  %v2888_v36 = vadd.f32 %v5910_v4, %v6038_v38 }
 0x3f0   : > { %3654 = vst [vmem:[%s6053_s24 + $0x28] sm:$0xff] %v3590_v63  ;;  %v3592_v49 = vmax.f32 %v4105_v24, 0.0  ;;  %v2884_v24 = vadd.f32 %v5906_v50, %v6042_v12 }
 0x3f1   : > { %3655 = vst [vmem:[%s6053_s24 + $0x30] sm:$0xff] %v3591_v61 }
 0x3f2   : > { %3656 = vst [vmem:[%s6053_s24 + $0x38] sm:$0xff] %v3592_v49  ;;  %v3446_v52 = vpop.f32.mrb[72].mxu0 }
 0x3f3   : > { %v4107_v62 = vadd.f32 %v3446_v52, %v2868_v26  ;;  %v3448_v20 = vpop.f32.mrb[73].mxu0 }
 0x3f4   : > { %v4109_v32 = vadd.f32 %v3448_v20, %v2870_v3  ;;  %v3450_v15 = vpop.f32.mrb[74].mxu0  ;;  %v2890_v20 = vadd.f32 %v5912_v31, %v6042_v12 }
 0x3f5   : > { %v3593_v37 = vmax.f32 %v4107_v62, 0.0  ;;  %v4111_v56 = vadd.f32 %v3450_v15, %v2872_v16  ;;  %v3452_v59 = vpop.f32.mrb[75].mxu0 }
 0x3f6   : > { %v3594_v41 = vmax.f32 %v4109_v32, 0.0  ;;  %v4113_v11 = vadd.f32 %v3452_v59, %v2874_v30  ;;  %v2892_v30 = vadd.f32 %v5914_v23, %v6038_v38  ;;  %v2898_v23 = vadd.f32 %v5920_v21, %v6038_v38 }
 0x3f7   : > { %3657 = vst [vmem:[%s6053_s24 + $0x40] sm:$0xff] %v3593_v37  ;;  %v3595_v17 = vmax.f32 %v4111_v56, 0.0  ;;  %v2894_v37 = vadd.f32 %v5916_v33, %v6042_v12 }
 0x3f8   : > { %3658 = vst [vmem:[%s6053_s24 + $0x48] sm:$0xff] %v3594_v41  ;;  %v3596_v9 = vmax.f32 %v4113_v11, 0.0 }
 0x3f9   : > { %3659 = vst [vmem:[%s6053_s24 + $0x50] sm:$0xff] %v3595_v17 }
 0x3fa   : > { %3660 = vst [vmem:[%s6053_s24 + $0x58] sm:$0xff] %v3596_v9  ;;  %v3456_v47 = vpop.f32.mrb[76].mxu0 }
 0x3fb   : > { %v4115_v2 = vadd.f32 %v3456_v47, %v2878_v14  ;;  %v3458_v63 = vpop.f32.mrb[77].mxu0  ;;  %v2902_v47 = vadd.f32 %v5924_v27, %v6038_v38  ;;  %v2908_v27 = vadd.f32 %v5930_v19, %v6038_v38 }
 0x3fc   : > { %v4117_v61 = vadd.f32 %v3458_v63, %v2880_v13  ;;  %v3460_v54 = vpop.f32.mrb[78].mxu0  ;;  %v2900_v13 = vadd.f32 %v5922_v0, %v6042_v12  ;;  %v2904_v63 = vadd.f32 %v5926_v1, %v6042_v12 }
 0x3fd   : > { %v3597_v49 = vmax.f32 %v4115_v2, 0.0  ;;  %v4119_v26 = vadd.f32 %v3460_v54, %v2882_v55  ;;  %v3462_v3 = vpop.f32.mrb[79].mxu0 }
 0x3fe   : > { %v3598_v52 = vmax.f32 %v4117_v61, 0.0  ;;  %v4121_v35 = vadd.f32 %v3462_v3, %v2884_v24 }
 0x3ff   : > { %3661 = vst [vmem:[%s6053_s24 + $0x60] sm:$0xff] %v3597_v49  ;;  %v3599_v16 = vmax.f32 %v4119_v26, 0.0 }
 0x400   : > { %3662 = vst [vmem:[%s6053_s24 + $0x68] sm:$0xff] %v3598_v52  ;;  %v3600_v62 = vmax.f32 %v4121_v35, 0.0  ;;  %v2910_v35 = vadd.f32 %v5932_v57, %v6042_v12 }
 0x401   : > { %3663 = vst [vmem:[%s6053_s24 + $0x70] sm:$0xff] %v3599_v16  ;;  %v2912_v16 = vadd.f32 %v5934_v45, %v6038_v38  ;;  %v2918_v45 = vadd.f32 %v5940_v28, %v6038_v38 }
 0x402   : > { %3664 = vst [vmem:[%s6053_s24 + $0x78] sm:$0xff] %v3600_v62  ;;  %v3466_v50 = vpop.f32.mrb[80].mxu0 }
 0x403   : > { %v4123_v32 = vadd.f32 %v3466_v50, %v2888_v36  ;;  %v3468_v15 = vpop.f32.mrb[81].mxu0 }
 0x404   : > { %v4125_v56 = vadd.f32 %v3468_v15, %v2890_v20  ;;  %v3470_v4 = vpop.f32.mrb[82].mxu0  ;;  %v2914_v20 = vadd.f32 %v5936_v40, %v6042_v12 }
 0x405   : > { %v3601_v59 = vmax.f32 %v4123_v32, 0.0  ;;  %v4127_v41 = vadd.f32 %v3470_v4, %v2892_v30  ;;  %v3472_v11 = vpop.f32.mrb[83].mxu0 }
 0x406   : > { %v3602_v17 = vmax.f32 %v4125_v56, 0.0  ;;  %v4129_v31 = vadd.f32 %v3472_v11, %v2894_v37 }
 0x407   : > { %3665 = vst [vmem:[%s6053_s24 + $0x80] sm:$0xff] %v3601_v59  ;;  %v3603_v9 = vmax.f32 %v4127_v41, 0.0  ;;  %v2920_v59 = vadd.f32 %v5942_v29, %v6042_v12  ;;  %v2922_v41 = vadd.f32 %v5944_v53, %v6038_v38  ;;  %v2928_v53 = vadd.f32 %v5950_v39, %v6038_v38 }
 0x408   : > { %3666 = vst [vmem:[%s6053_s24 + $0x88] sm:$0xff] %v3602_v17  ;;  %v3604_v14 = vmax.f32 %v4129_v31, 0.0  ;;  %v2924_v31 = vadd.f32 %v5946_v51, %v6042_v12 }
 0x409   : > { %3667 = vst [vmem:[%s6053_s24 + $0x90] sm:$0xff] %v3603_v9 }
 0x40a   : > { %3668 = vst [vmem:[%s6053_s24 + $0x98] sm:$0xff] %v3604_v14  ;;  %v3476_v33 = vpop.f32.mrb[84].mxu0 }
 0x40b   : > { %v4131_v55 = vadd.f32 %v3476_v33, %v2898_v23  ;;  %v3478_v2 = vpop.f32.mrb[85].mxu0 }
 0x40c   : > { %v4133_v24 = vadd.f32 %v3478_v2, %v2900_v13  ;;  %v3480_v21 = vpop.f32.mrb[86].mxu0  ;;  %v2930_v2 = vadd.f32 %v5952_v60, %v6042_v12 }
 0x40d   : > { %v3605_v61 = vmax.f32 %v4131_v55, 0.0  ;;  %v4135_v54 = vadd.f32 %v3480_v21, %v2902_v47  ;;  %v3482_v49 = vpop.f32.mrb[87].mxu0 }
 0x40e   : > { %v3606_v26 = vmax.f32 %v4133_v24, 0.0  ;;  %v4137_v0 = vadd.f32 %v3482_v49, %v2904_v63  ;;  %v2932_v63 = vadd.f32 %v5954_v8, %v6038_v38  ;;  %v2938_v8 = vadd.f32 %v5960_v43, %v6038_v38 }
 0x40f   : > { %3669 = vst [vmem:[%s6053_s24 + $0xa0] sm:$0xff] %v3605_v61  ;;  %v3607_v3 = vmax.f32 %v4135_v54, 0.0  ;;  %v2934_v61 = vadd.f32 %v5956_v18, %v6042_v12 }
 0x410   : > { %3670 = vst [vmem:[%s6053_s24 + $0xa8] sm:$0xff] %v3606_v26  ;;  %v3608_v52 = vmax.f32 %v4137_v0, 0.0 }
 0x411   : > { %3671 = vst [vmem:[%s6053_s24 + $0xb0] sm:$0xff] %v3607_v3 }
 0x412   : > { %3672 = vst [vmem:[%s6053_s24 + $0xb8] sm:$0xff] %v3608_v52  ;;  %v3486_v1 = vpop.f32.mrb[88].mxu0 }
 0x413   : > { %v4139_v62 = vadd.f32 %v3486_v1, %v2908_v27  ;;  %v3488_v36 = vpop.f32.mrb[89].mxu0  ;;  %v2942_v1 = vadd.f32 %v5964_v22, %v6038_v38  ;;  %v2948_v22 = vadd.f32 %v5970_v42, %v6038_v38 }
 0x414   : > { %v4141_v50 = vadd.f32 %v3488_v36, %v2910_v35  ;;  %v3490_v19 = vpop.f32.mrb[90].mxu0  ;;  %v2940_v35 = vadd.f32 %v5962_v5, %v6042_v12  ;;  %v2944_v36 = vadd.f32 %v5966_v7, %v6042_v12 }
 0x415   : > { %v3609_v30 = vmax.f32 %v4139_v62, 0.0  ;;  %v4143_v32 = vadd.f32 %v3490_v19, %v2912_v16  ;;  %v3492_v15 = vpop.f32.mrb[91].mxu0 }
 0x416   : > { %v3610_v37 = vmax.f32 %v4141_v50, 0.0  ;;  %v4145_v57 = vadd.f32 %v3492_v15, %v2914_v20 }
 0x417   : > { %3673 = vst [vmem:[%s6053_s24 + $0xc0] sm:$0xff] %v3609_v30  ;;  %v3611_v56 = vmax.f32 %v4143_v32, 0.0 }
 0x418   : > { %3674 = vst [vmem:[%s6053_s24 + $0xc8] sm:$0xff] %v3610_v37  ;;  %v3612_v4 = vmax.f32 %v4145_v57, 0.0  ;;  %v2950_v57 = vadd.f32 %v5972_v48, %v6042_v12 }
 0x419   : > { %3675 = vst [vmem:[%s6053_s24 + $0xd0] sm:$0xff] %v3611_v56  ;;  %v2952_v56 = vadd.f32 %v5974_v6, %v6038_v38  ;;  %v2958_v6 = vadd.f32 %v5980_v46, %v6038_v38 }
 0x41a   : > { %3676 = vst [vmem:[%s6053_s24 + $0xd8] sm:$0xff] %v3612_v4  ;;  %v3496_v40 = vpop.f32.mrb[92].mxu0 }
 0x41b   : > { %v4147_v11 = vadd.f32 %v3496_v40, %v2918_v45  ;;  %v3498_v17 = vpop.f32.mrb[93].mxu0 }
 0x41c   : > { %v4149_v9 = vadd.f32 %v3498_v17, %v2920_v59  ;;  %v3500_v28 = vpop.f32.mrb[94].mxu0  ;;  %v6370_v59 = vld [vmem:[#allocation19_spill] sm:$0xff] }
 0x41d   : > { %v3613_v14 = vmax.f32 %v4147_v11, 0.0  ;;  %v4151_v23 = vadd.f32 %v3500_v28, %v2922_v41  ;;  %v3502_v13 = vpop.f32.mrb[95].mxu0  ;;  %v2954_v40 = vadd.f32 %v6370_v59, %v6042_v12 }
 0x41e   : > { %v3614_v33 = vmax.f32 %v4149_v9, 0.0  ;;  %v4153_v29 = vadd.f32 %v3502_v13, %v2924_v31 }
 0x41f   : > { %3677 = vst [vmem:[%s6053_s24 + $0xe0] sm:$0xff] %v3613_v14  ;;  %v3615_v47 = vmax.f32 %v4151_v23, 0.0  ;;  %v2960_v23 = vadd.f32 %v5982_v10, %v6042_v12 }
 0x420   : > { %3678 = vst [vmem:[%s6053_s24 + $0xe8] sm:$0xff] %v3614_v33  ;;  %v3616_v55 = vmax.f32 %v4153_v29, 0.0  ;;  %v6371_v33 = vld [vmem:[#allocation17_spill] sm:$0xff] }
 0x421   : > { %3679 = vst [vmem:[%s6053_s24 + $0xf0] sm:$0xff] %v3615_v47  ;;  %v2962_v29 = vadd.f32 %v6371_v33, %v6038_v38 }
 0x422   : > { %3680 = vst [vmem:[%s6053_s24 + $0xf8] sm:$0xff] %v3616_v55  ;;  %v3506_v51 = vpop.f32.mrb[96].mxu0 }
 0x423   : > { %v4155_v24 = vadd.f32 %v3506_v51, %v2928_v53  ;;  %v3508_v21 = vpop.f32.mrb[97].mxu0  ;;  %v6372_v53 = vld [vmem:[#allocation21_spill] sm:$0xff] }
 0x424   : > { %v4157_v54 = vadd.f32 %v3508_v21, %v2930_v2  ;;  %v3510_v39 = vpop.f32.mrb[98].mxu0  ;;  %v2964_v2 = vadd.f32 %v6372_v53, %v6042_v12 }
 0x425   : > { %v3617_v49 = vmax.f32 %v4155_v24, 0.0  ;;  %v4159_v26 = vadd.f32 %v3510_v39, %v2932_v63  ;;  %v3512_v0 = vpop.f32.mrb[99].mxu0 }
 0x426   : > { %v3618_v3 = vmax.f32 %v4157_v54, 0.0  ;;  %v4161_v60 = vadd.f32 %v3512_v0, %v2934_v61 }
 0x427   : > { %3681 = vst [vmem:[%s6053_s24 + $0x100] sm:$0xff] %v3617_v49  ;;  %v3619_v52 = vmax.f32 %v4159_v26, 0.0  ;;  %v2968_v49 = vadd.f32 %v5990_v34, %v6038_v38  ;;  %v2970_v26 = vadd.f32 %v5992_v25, %v6042_v12 }
 0x428   : > { %3682 = vst [vmem:[%s6053_s24 + $0x108] sm:$0xff] %v3618_v3  ;;  %v3620_v27 = vmax.f32 %v4161_v60, 0.0  ;;  %v2972_v3 = vadd.f32 %v5994_v44, %v6038_v38  ;;  %v2978_v44 = vadd.f32 %v6000_v58, %v6038_v38 }
 0x429   : > { %3683 = vst [vmem:[%s6053_s24 + $0x110] sm:$0xff] %v3619_v52 }
 0x42a   : > { %3684 = vst [vmem:[%s6053_s24 + $0x118] sm:$0xff] %v3620_v27  ;;  %v3516_v18 = vpop.f32.mrb[100].mxu0  ;;  %v6373_v27 = vld [vmem:[#allocation18_spill] sm:$0xff] }
 0x42b   : > { %v4163_v16 = vadd.f32 %v3516_v18, %v2938_v8  ;;  %v3518_v62 = vpop.f32.mrb[101].mxu0  ;;  %v2974_v8 = vadd.f32 %v6373_v27, %v6042_v12 }
 0x42c   : > { %v4165_v20 = vadd.f32 %v3518_v62, %v2940_v35  ;;  %v3520_v43 = vpop.f32.mrb[102].mxu0 }
 0x42d   : > { %v3621_v50 = vmax.f32 %v4163_v16, 0.0  ;;  %v4167_v19 = vadd.f32 %v3520_v43, %v2942_v1  ;;  %v3522_v30 = vpop.f32.mrb[103].mxu0  ;;  %v6374_v43 = vld [vmem:[#allocation23_spill] sm:$0xff] }
 0x42e   : > { %v3622_v32 = vmax.f32 %v4165_v20, 0.0  ;;  %v4169_v5 = vadd.f32 %v3522_v30, %v2944_v36  ;;  %v6375_v30 = vld [vmem:[#allocation20_spill] sm:$0xff] }
 0x42f   : > { %3685 = vst [vmem:[%s6053_s24 + $0x120] sm:$0xff] %v3621_v50  ;;  %v3623_v15 = vmax.f32 %v4167_v19, 0.0  ;;  %v2980_v50 = vadd.f32 %v6374_v43, %v6042_v12 }
 0x430   : > { %3686 = vst [vmem:[%s6053_s24 + $0x128] sm:$0xff] %v3622_v32  ;;  %v3624_v37 = vmax.f32 %v4169_v5, 0.0  ;;  %v2982_v32 = vadd.f32 %v6375_v30, %v6038_v38 }
 0x431   : > { %3687 = vst [vmem:[%s6053_s24 + $0x130] sm:$0xff] %v3623_v15 }
 0x432   : > { %3688 = vst [vmem:[%s6053_s24 + $0x138] sm:$0xff] %v3624_v37  ;;  %v3526_v7 = vpop.f32.mrb[104].mxu0  ;;  %v6376_v37 = vld [vmem:[#allocation22_spill] sm:$0xff] }
 0x433   : > { %v4171_v4 = vadd.f32 %v3526_v7, %v2948_v22  ;;  %v3528_v45 = vpop.f32.mrb[105].mxu0  ;;  %v2984_v22 = vadd.f32 %v6376_v37, %v6042_v12 }
 0x434   : > { %v4173_v41 = vadd.f32 %v3528_v45, %v2950_v57  ;;  %v3530_v42 = vpop.f32.mrb[106].mxu0 }
 0x435   : > { %v3625_v11 = vmax.f32 %v4171_v4, 0.0  ;;  %v4175_v17 = vadd.f32 %v3530_v42, %v2952_v56  ;;  %v3532_v31 = vpop.f32.mrb[107].mxu0  ;;  %v6377_v42 = vld [vmem:[#allocation25_spill] sm:$0xff] }
 0x436   : > { %v3626_v9 = vmax.f32 %v4173_v41, 0.0  ;;  %v4177_v48 = vadd.f32 %v3532_v31, %v2954_v40 }
 0x437   : > { %3689 = vst [vmem:[%s6053_s24 + $0x140] sm:$0xff] %v3625_v11  ;;  %v3627_v28 = vmax.f32 %v4175_v17, 0.0  ;;  %v2988_v11 = vadd.f32 %v6377_v42, %v6038_v38  ;;  %v6378_v17 = vld [vmem:[#allocation24_spill] sm:$0xff] }
 0x438   : > { %3690 = vst [vmem:[%s6053_s24 + $0x148] sm:$0xff] %v3626_v9  ;;  %v3628_v14 = vmax.f32 %v4177_v48, 0.0  ;;  %v2990_v31 = vadd.f32 %v6378_v17, %v6042_v12  ;;  %v6379_v48 = vld [vmem:[#allocation27_spill] sm:$0xff] }
 0x439   : > { %3691 = vst [vmem:[%s6053_s24 + $0x150] sm:$0xff] %v3627_v28  ;;  %v2992_v28 = vadd.f32 %v6379_v48, %v6038_v38 }
 0x43a   : > { %3692 = vst [vmem:[%s6053_s24 + $0x158] sm:$0xff] %v3628_v14  ;;  %v3536_v13 = vpop.f32.mrb[108].mxu0 }
 0x43b   : > { %v4179_v47 = vadd.f32 %v3536_v13, %v2958_v6  ;;  %v3538_v55 = vpop.f32.mrb[109].mxu0 }
 0x43c   : > { %v4181_v51 = vadd.f32 %v3538_v55, %v2960_v23  ;;  %v3540_v46 = vpop.f32.mrb[110].mxu0  ;;  %v6380_v23 = vld [vmem:[#allocation26_spill] sm:$0xff] }
 0x43d   : > { %v3629_v63 = vmax.f32 %v4179_v47, 0.0  ;;  %v4183_v24 = vadd.f32 %v3540_v46, %v2962_v29  ;;  %v3542_v21 = vpop.f32.mrb[111].mxu0  ;;  %v2994_v13 = vadd.f32 %v6380_v23, %v6042_v12 }
 0x43e   : > { %v3630_v61 = vmax.f32 %v4181_v51, 0.0  ;;  %v4185_v10 = vadd.f32 %v3542_v21, %v2964_v2 }
 0x43f   : > { %3693 = vst [vmem:[%s6053_s24 + $0x160] sm:$0xff] %v3629_v63  ;;  %v3631_v54 = vmax.f32 %v4183_v24, 0.0  ;;  %v6381_v24 = vld [vmem:[#allocation28_spill] sm:$0xff] }
 0x440   : > { %3694 = vst [vmem:[%s6053_s24 + $0x168] sm:$0xff] %v3630_v61  ;;  %v3632_v39 = vmax.f32 %v4185_v10, 0.0  ;;  %v2998_v21 = vadd.f32 %v6381_v24, %v6038_v38  ;;  %v6382_v61 = vld [vmem:[#allocation29_spill] sm:$0xff] }
 0x441   : > { %3695 = vst [vmem:[%s6053_s24 + $0x170] sm:$0xff] %v3631_v54  ;;  %v3000_v10 = vadd.f32 %v6382_v61, %v6042_v12 }
 0x442   : > { %3696 = vst [vmem:[%s6053_s24 + $0x178] sm:$0xff] %v3632_v39  ;;  %v3546_v0 = vpop.f32.mrb[112].mxu0  ;;  %v6383_v39 = vld [vmem:[#allocation30_spill] sm:$0xff] }
 0x443   : > { %v4187_v60 = vadd.f32 %v3546_v0, %v2968_v49  ;;  %v3548_v52 = vpop.f32.mrb[113].mxu0  ;;  %v3002_v49 = vadd.f32 %v6383_v39, %v6038_v38 }
 0x444   : > { %v4189_v35 = vadd.f32 %v3548_v52, %v2970_v26  ;;  %v3550_v34 = vpop.f32.mrb[114].mxu0 }
 0x445   : > { %v3633_v18 = vmax.f32 %v4187_v60, 0.0  ;;  %v4191_v1 = vadd.f32 %v3550_v34, %v2972_v3  ;;  %v3552_v16 = vpop.f32.mrb[115].mxu0  ;;  %v6384_v3 = vld [vmem:[#allocation31_spill] sm:$0xff] }
 0x446   : > { %v3634_v62 = vmax.f32 %v4189_v35, 0.0  ;;  %v4193_v25 = vadd.f32 %v3552_v16, %v2974_v8  ;;  %v3004_v60 = vadd.f32 %v6384_v3, %v6042_v12 }
 0x447   : > { %3697 = vst [vmem:[%s6053_s24 + $0x180] sm:$0xff] %v3633_v18  ;;  %v3635_v36 = vmax.f32 %v4191_v1, 0.0 }
 0x448   : > { %3698 = vst [vmem:[%s6053_s24 + $0x188] sm:$0xff] %v3634_v62  ;;  %v3636_v20 = vmax.f32 %v4193_v25, 0.0 }
 0x449   : > { %3699 = vst [vmem:[%s6053_s24 + $0x190] sm:$0xff] %v3635_v36 }
 0x44a   : > { %3700 = vst [vmem:[%s6053_s24 + $0x198] sm:$0xff] %v3636_v20  ;;  %v3556_v19 = vpop.f32.mrb[116].mxu0 }
 0x44b   : > { %v4195_v5 = vadd.f32 %v3556_v19, %v2978_v44  ;;  %v3558_v15 = vpop.f32.mrb[117].mxu0 }
 0x44c   : > { %v4197_v57 = vadd.f32 %v3558_v15, %v2980_v50  ;;  %v3560_v58 = vpop.f32.mrb[118].mxu0 }
 0x44d   : > { %v3637_v7 = vmax.f32 %v4195_v5, 0.0  ;;  %v4199_v56 = vadd.f32 %v3560_v58, %v2982_v32  ;;  %v3562_v4 = vpop.f32.mrb[119].mxu0 }
 0x44e   : > { %v3638_v45 = vmax.f32 %v4197_v57, 0.0  ;;  %v4201_v59 = vadd.f32 %v3562_v4, %v2984_v22 }
 0x44f   : > { %3701 = vst [vmem:[%s6053_s24 + $0x1a0] sm:$0xff] %v3637_v7  ;;  %v3639_v40 = vmax.f32 %v4199_v56, 0.0 }
 0x450   : > { %3702 = vst [vmem:[%s6053_s24 + $0x1a8] sm:$0xff] %v3638_v45  ;;  %v3640_v41 = vmax.f32 %v4201_v59, 0.0 }
 0x451   : > { %3703 = vst [vmem:[%s6053_s24 + $0x1b0] sm:$0xff] %v3639_v40 }
 0x452   : > { %3704 = vst [vmem:[%s6053_s24 + $0x1b8] sm:$0xff] %v3640_v41  ;;  %v3566_v9 = vpop.f32.mrb[120].mxu0 }
 0x453   : > { %v4203_v14 = vadd.f32 %v3566_v9, %v2988_v11  ;;  %v3568_v6 = vpop.f32.mrb[121].mxu0 }
 0x454   : > { %v4205_v33 = vadd.f32 %v3568_v6, %v2990_v31  ;;  %v3570_v29 = vpop.f32.mrb[122].mxu0 }
 0x455   : > { %v3641_v47 = vmax.f32 %v4203_v14, 0.0  ;;  %v4207_v55 = vadd.f32 %v3570_v29, %v2992_v28  ;;  %v3572_v53 = vpop.f32.mrb[123].mxu0 }
 0x456   : > { %v3642_v2 = vmax.f32 %v4205_v33, 0.0  ;;  %v4209_v51 = vadd.f32 %v3572_v53, %v2994_v13 }
 0x457   : > { %3705 = vst [vmem:[%s6053_s24 + $0x1c0] sm:$0xff] %v3641_v47  ;;  %v3643_v46 = vmax.f32 %v4207_v55, 0.0 }
 0x458   : > { %3706 = vst [vmem:[%s6053_s24 + $0x1c8] sm:$0xff] %v3642_v2  ;;  %v3644_v63 = vmax.f32 %v4209_v51, 0.0 }
 0x459   : > { %3707 = vst [vmem:[%s6053_s24 + $0x1d0] sm:$0xff] %v3643_v46 }
 0x45a   : > { %3708 = vst [vmem:[%s6053_s24 + $0x1d8] sm:$0xff] %v3644_v63  ;;  %v3576_v54 = vpop.f32.mrb[124].mxu0 }
 0x45b   : > { %v4211_v26 = vadd.f32 %v3576_v54, %v2998_v21  ;;  %v3578_v0 = vpop.f32.mrb[125].mxu0 }
 0x45c   : > { %v4213_v52 = vadd.f32 %v3578_v0, %v3000_v10  ;;  %v3580_v27 = vpop.f32.mrb[126].mxu0 }
 0x45d   : > { %v3645_v8 = vmax.f32 %v4211_v26, 0.0  ;;  %v4215_v35 = vadd.f32 %v3580_v27, %v3002_v49  ;;  %v3582_v34 = vpop.f32.mrb[127].mxu0 }
 0x45e   : > { %v3646_v18 = vmax.f32 %v4213_v52, 0.0  ;;  %v4217_v1 = vadd.f32 %v3582_v34, %v3004_v60 }
 0x45f   : > { %3709 = vst [vmem:[%s6053_s24 + $0x1e0] sm:$0xff] %v3645_v8  ;;  %v3647_v38 = vmax.f32 %v4215_v35, 0.0 }
 0x460   : > { %3710 = vst [vmem:[%s6053_s24 + $0x1e8] sm:$0xff] %v3646_v18  ;;  %v3648_v12 = vmax.f32 %v4217_v1, 0.0 }
 0x461   : > { %3711 = vst [vmem:[%s6053_s24 + $0x1f0] sm:$0xff] %v3647_v38 }
 0x462   : > { %3712 = vst [vmem:[%s6053_s24 + $0x1f8] sm:$0xff] %v3648_v12 }
 0x463   : > { %4795 = shalt.err (!%p4792_p4)
}
 0x464   : > { %s4796_s26 = scalar_lea.hbm %s6241_s9, 8192  ;;  %s4800_s27 = scalar_lea.hbm %s6300_s5, 16384 }
 0x465   : > { %p4797_p2 = scmp.ne.s32.totalorder %s6241_s9, %s4796_s26  ;;  %p4801_p1 = scmp.lt.u32.totalorder %s6241_s9, %s6300_s5 }
 0x466   : > { %p4802_p11 = scmp.lt.u32.totalorder %s4800_s27, %s4796_s26  ;;  %p4804_p6 = scmp.lt.u32.totalorder %s4796_s26, %s6241_s9 }
 0x467   : > { %p4798_p8 = pnand %p4797_p2, %p5069_p10 }
 0x468   : > { %p4803_p13 = por %p4802_p11, %p4801_p1 }
 0x469   : > { %p4799_p12 = pneg %p4798_p8 }
 0x46a   : > { %p4805_p3 = por %p4804_p6, %p4803_p13 }
 0x46c   : > { %p4806_p5 = pnand %p4805_p3, %p4799_p12 }
 0x46e   : > { %4809 = shalt.err (!%p4806_p5)
}
 0x46f   : > { %s4886_s24 = smov 256   ;;  %s4887_s8 = smov 16  }
 0x470   : > { %4360 = dma.vmem_to_hbm [thread:$0]  (%p5069_p10), %s6243_s16, 8192, %s6241_s9, %s3714_s21, %s4886_s24, %s4886_s24, %s4887_s8  }
 0x471 PF: > { %s6385_s17 = sld [smem:[#allocation15_spill]]  ;;  %s6386_s25 = sld [smem:[#allocation16_spill]] }
 0x472   : > { %p6388_p9 = scmp.ge.s32.totalorder %s4872_s23, 2 }
 0x477   : > { %s3745_s7 = sand.u32 1, %s6385_s17   ;;  %p6387_p7 = scmp.ne.s32.totalorder %s6386_s25, 0 }
 0x478   : > { %s3746_s13 = scalar_lea.sflag [#allocation4], %s3745_s7 }
 0x479   : > { %p4377_p0 = pnand %p6388_p9, %p6387_p7 }
 0x47b   : > { %4847 = dma.done.wait (!%p4377_p0), %s3746_s13, 8192  }
 0x47c   : > { %4849 = vsyncadd (!%p4377_p0), %s3746_s13, 4294959104  ;;  %s23_s23 = sadd.s32 1, %s4872_s23   ;;  %s6389_s18 = smov %s4856_s19 }
 0x47d   : > { %p20_p4 = scmp.ge.s32.totalorder %s23_s23, 4   ;;  %s6390_s19 = smov %s4860_s20 }
 0x47e   : > { %s6391_s20 = smov %s5081_s15  ;;  %s6392_s21 = smov %s4868_s22 }
 0x47f   : > { %s6393_s22 = smov %s6395_s29  ;;  %22 = sbr.rel (!%p20_p4) target bundleno = 8 (0x8), region = 100 }
 0x486   :  { %3751 = vsyncpa [#allocation3], 1 }
 0x487   :  { %3753 = vsyncpa [#allocation3 + $0x1], 1 }
 0x488   :  { %3754 = vsyncpa [#allocation6], 1 }
 0x489   :  { %3755 = vsyncpa [#allocation9], 1 }
 0x48a   :  { %3756 = vsyncpa [#allocation4], 1 }
 0x48b   :  { %3758 = vsyncpa [#allocation4 + $0x1], 1 }

</bundles_post_ra>
